<compile_context>
chip_gen: v7x
topology: tpu7x:2x2x1
jax: 0.10.0
libtpu: 0.0.40
codegen_flags: <defaults>
</compile_context>

<pallas_src>
import functools

import jax
import jax.numpy as jnp
from jax.experimental import pallas as pl
from jax.experimental.pallas import tpu as pltpu

_EPS = 1e-5


# ---------------------------------------------------------------------------
# In-kernel helpers
# ---------------------------------------------------------------------------
def _decim_rows(x, start, n):
    """Rows start, start+2, ..., start+2*(n-1) of a (R, W, C) array."""
    W2, C = x.shape[1], x.shape[2]
    return x[start:start + 2 * n].reshape(n, 2, W2, C)[:, 0]


def _decim_cols(x, start, n):
    """Cols start, start+2, ..., start+2*(n-1) of a (R, W, C) array."""
    R, C = x.shape[0], x.shape[2]
    y = x[:, start:start + 2 * n, :].reshape(R * 2 * n, C)
    return y.reshape(R * n, 2, C)[:, 0, :].reshape(R, n, C)


def _taps3x3(xp, H, W, C, stride):
    """List of 9 (Ho*Wo, C) tap matrices of a 3x3 conv over padded image xp."""
    Ho, Wo = H // stride, W // stride
    if stride == 1:
        return [xp[kh:kh + Ho, kw:kw + Wo, :].reshape(Ho * Wo, C)
                for kh in range(3) for kw in range(3)]
    assert stride == 2
    # Phase-decimate once: 2 row planes x 2 col planes, then all 9 taps are
    # plain contiguous slices of those planes.
    rplanes = (_decim_rows(xp, 0, Ho + 1), _decim_rows(xp, 1, Ho))
    planes = [(_decim_cols(rp, 0, Wo + 1), _decim_cols(rp, 1, Wo))
              for rp in rplanes]
    taps = []
    for kh in range(3):
        for kw in range(3):
            p = planes[kh % 2][kw % 2]
            taps.append(p[kh // 2:kh // 2 + Ho,
                          kw // 2:kw // 2 + Wo, :].reshape(Ho * Wo, C))
    return taps


def _tap_groups(C, ntaps):
    """Group consecutive taps so each im2col store is 128-lane dense when
    possible; otherwise emit one grouped store for everything."""
    if C % 128 == 0:
        return [(t, t + 1) for t in range(ntaps)]
    g = 128 // C if 128 % C == 0 else ntaps
    return [(lo, min(lo + g, ntaps)) for lo in range(0, ntaps, g)]


def _write_patches(p_ref, row0, taps, C):
    """Write the 9 taps of one image into rows [row0, row0+M) of p_ref."""
    M = taps[0].shape[0]
    for lo, hi in _tap_groups(C, len(taps)):
        blk = taps[lo] if hi - lo == 1 else jnp.concatenate(taps[lo:hi], axis=-1)
        p_ref[row0:row0 + M, lo * C:hi * C] = blk


# ---------------------------------------------------------------------------
# Fused BasicBlock kernel (one grid step == IB images)
# ---------------------------------------------------------------------------
def _fused_basic_block_kernel(*refs, H, W, Cin, Cout, stride, has_proj, IB):
    if has_proj:
        (x_ref, w1_ref, s1_ref, b1_ref, w2_ref, s2_ref, b2_ref,
         ssc_ref, bsc_ref, o_ref, xp_ref, mid_ref, p1_ref, p2_ref) = refs
    else:
        (x_ref, w1_ref, s1_ref, b1_ref, w2_ref, s2_ref, b2_ref,
         o_ref, xp_ref, mid_ref, p1_ref, p2_ref) = refs

    Ho, Wo = H // stride, W // stride
    M = Ho * Wo
    cdt = xp_ref.dtype                                   # compute dtype (bf16)

    # ---- padded input in VMEM: zero only the 1-px halo, fill interior ------
    for b in range(IB):
        zr = jnp.zeros((1, W + 2, Cin), cdt)
        zc = jnp.zeros((H, 1, Cin), cdt)
        xp_ref[b, 0:1, :, :] = zr
        xp_ref[b, H + 1:H + 2, :, :] = zr
        xp_ref[b, 1:H + 1, 0:1, :] = zc
        xp_ref[b, 1:H + 1, W + 1:W + 2, :] = zc
        xp_ref[b, 1:H + 1, 1:W + 1, :] = x_ref[b].astype(cdt)
        # conv1 im2col rows for image b (stride-aware, phase-decimated taps)
        _write_patches(p1_ref, b * M, _taps3x3(xp_ref[b], H, W, Cin, stride), Cin)

    # ---- conv1 (+ fused 1x1 projection columns): single bf16 MXU matmul ----
    a1 = jnp.dot(p1_ref[...], w1_ref[...], preferred_element_type=jnp.float32)
    y1 = jnp.maximum(a1[:, :Cout] * s1_ref[...] + b1_ref[...], 0.0)      # f32
    if has_proj:
        sc = a1[:, Cout:] * ssc_ref[...] + bsc_ref[...]                  # f32
    else:
        sc = x_ref[...].reshape(IB * H * W, Cin).astype(jnp.float32)     # id

    # ---- conv1 output stays in VMEM (padded, bf16) for conv2 ---------------
    for b in range(IB):
        zr = jnp.zeros((1, Wo + 2, Cout), cdt)
        zc = jnp.zeros((Ho, 1, Cout), cdt)
        mid_ref[b, 0:1, :, :] = zr
        mid_ref[b, Ho + 1:Ho + 2, :, :] = zr
        mid_ref[b, 1:Ho + 1, 0:1, :] = zc
        mid_ref[b, 1:Ho + 1, Wo + 1:Wo + 2, :] = zc
        mid_ref[b, 1:Ho + 1, 1:Wo + 1, :] = (
            y1[b * M:(b + 1) * M].reshape(Ho, Wo, Cout).astype(cdt))
        _write_patches(p2_ref, b * M, _taps3x3(mid_ref[b], Ho, Wo, Cout, 1), Cout)

    # ---- conv2 + bn2, residual add, relu (all epilogue math in f32) --------
    a2 = jnp.dot(p2_ref[...], w2_ref[...], preferred_element_type=jnp.float32)
    a2 = a2 * s2_ref[...] + b2_ref[...]
    o_ref[...] = jnp.maximum(a2 + sc, 0.0).reshape(IB, M, Cout).astype(o_ref.dtype)


# ---------------------------------------------------------------------------
# Parameter packing (hoisted off the hot path, done once per model)
# ---------------------------------------------------------------------------
def _pack_conv3x3(w_oihw):
    """OIHW (Cout, Cin, 3, 3) -> im2col weight (9*Cin, Cout), tap-major, f32."""
    cout, cin = w_oihw.shape[:2]
    return jnp.transpose(w_oihw, (2, 3, 1, 0)).reshape(9 * cin, cout).astype(jnp.float32)


def _fold_bn(bn):
    scale = bn["gamma"] / jnp.sqrt(bn["var"] + _EPS)
    bias = bn["beta"] - bn["mean"] * scale
    c = scale.shape[0]
    return (scale.reshape(1, c).astype(jnp.float32),
            bias.reshape(1, c).astype(jnp.float32))


def prepare_block_params(params, stride, compute_dtype=jnp.bfloat16):
    """Fold BN stats, pack conv weights (and fuse the 1x1 shortcut into the
    conv1 weight columns).  Do ONCE per model, off the hot path."""
    cout, cin = params["w1"].shape[:2]
    packed = {}
    packed["s1"], packed["b1"] = _fold_bn(params["bn1"])
    packed["s2"], packed["b2"] = _fold_bn(params["bn2"])
    packed["w2"] = _pack_conv3x3(params["w2"]).astype(compute_dtype)
    w1 = _pack_conv3x3(params["w1"])                         # (9*Cin, Cout)
    if stride != 1:
        wsc = params["wsc"].reshape(cout, cin).T.astype(jnp.float32)   # (Cin, Cout)
        wsc_full = jnp.zeros((9 * cin, cout), jnp.float32)
        wsc_full = wsc_full.at[4 * cin:5 * cin].set(wsc)     # center-tap rows only
        w1 = jnp.concatenate([w1, wsc_full], axis=1)         # (9*Cin, 2*Cout)
        packed["ssc"], packed["bsc"] = _fold_bn(params["bnsc"])
    packed["w1"] = w1.astype(compute_dtype)
    return packed


# ---------------------------------------------------------------------------
# pallas_call wrappers
# ---------------------------------------------------------------------------
@functools.partial(jax.jit, static_argnames=("stride", "out_dtype", "imgs_per_block"))
def basic_block_forward_nhwc(x_nhwc, packed, *, stride, out_dtype=jnp.float32,
                             imgs_per_block=None):
    """Fused BasicBlock forward on NHWC activations."""
    N, H, W, Cin = x_nhwc.shape
    Cout = packed["s1"].shape[1]
    has_proj = "ssc" in packed
    cdt = packed["w1"].dtype
    assert stride in (1, 2)
    assert H % stride == 0 and W % stride == 0
    if not has_proj:
        # Matches the PyTorch module: identity shortcut is only valid when the
        # channel count is unchanged (the module only projects when stride != 1).
        assert Cin == Cout, "identity shortcut requires in_planes == planes"
    Ho, Wo = H // stride, W // stride
    M = Ho * Wo

    # Images per grid step: batch small feature maps so matmul M fills the MXU.
    if imgs_per_block is None:
        IB = N
        for cand in range(1, N + 1):
            if N % cand == 0 and cand * M >= 128:
                IB = cand
                break
    else:
        IB = imgs_per_block
    assert N % IB == 0
    grid = (N // IB,)

    kernel = functools.partial(_fused_basic_block_kernel, H=H, W=W, Cin=Cin,
                               Cout=Cout, stride=stride, has_proj=has_proj, IB=IB)

    chan = pl.BlockSpec((1, Cout), lambda n: (0, 0))
    in_specs = [
        pl.BlockSpec((IB, H, W, Cin), lambda n: (n, 0, 0, 0)),
        pl.BlockSpec(packed["w1"].shape, lambda n: (0, 0)),
        chan, chan,
        pl.BlockSpec(packed["w2"].shape, lambda n: (0, 0)),
        chan, chan,
    ]
    args = [x_nhwc, packed["w1"], packed["s1"], packed["b1"],
            packed["w2"], packed["s2"], packed["b2"]]
    if has_proj:
        in_specs += [chan, chan]
        args += [packed["ssc"], packed["bsc"]]

    scratch = [
        pltpu.VMEM((IB, H + 2, W + 2, Cin), cdt),        # padded input
        pltpu.VMEM((IB, Ho + 2, Wo + 2, Cout), cdt),     # padded conv1 output
        pltpu.VMEM((IB * M, 9 * Cin), cdt),              # im2col (conv1)
        pltpu.VMEM((IB * M, 9 * Cout), cdt),             # im2col (conv2)
    ]

    # Shape-aware scoped-VMEM budget (defaults 16/32 MiB are too small for
    # realistic ResNet feature maps).
    csz = jnp.dtype(cdt).itemsize
    scratch_bytes = (IB * (H + 2) * (W + 2) * Cin
                     + IB * (Ho + 2) * (Wo + 2) * Cout
                     + IB * M * 9 * Cin + IB * M * 9 * Cout) * csz
    io_bytes = 2 * (IB * H * W * Cin * x_nhwc.dtype.itemsize
                    + IB * M * Cout * jnp.dtype(out_dtype).itemsize
                    + packed["w1"].size * csz + packed["w2"].size * csz
                    + 8 * Cout * 4)
    vmem_limit = int(min(max(1.5 * (scratch_bytes + io_bytes) + (8 << 20),
                             32 << 20), 100 << 20))

    out2d = pl.pallas_call(
        kernel,
        out_shape=jax.ShapeDtypeStruct((N, M, Cout), out_dtype),
        grid=grid,
        in_specs=in_specs,
        out_specs=pl.BlockSpec((IB, M, Cout), lambda n: (n, 0, 0)),
        scratch_shapes=scratch,
        compiler_params=pltpu.CompilerParams(
            dimension_semantics=("parallel",),
            vmem_limit_bytes=vmem_limit),
    )(*args)
    return out2d.reshape(N, Ho, Wo, Cout)


@functools.partial(jax.jit, static_argnames=("stride",))
def _basic_block_forward_nchw(x_nchw, packed, *, stride):
    x = jnp.transpose(x_nchw, (0, 2, 3, 1))                # boundary glue only
    y = basic_block_forward_nhwc(x, packed, stride=stride)
    return jnp.transpose(y, (0, 3, 1, 2))


def basic_block_forward(x_nchw, params, stride):
    """NCHW wrapper matching the PyTorch BasicBlock API."""
    packed = prepare_block_params(params, stride)  # hoist once per model in real use
    return _basic_block_forward_nchw(x_nchw, packed, stride=stride)


# ---------------------------------------------------------------------------
# Deterministic parameter init + pure-JAX references
# ---------------------------------------------------------------------------
def make_params(key, in_planes, planes, stride):
    ks = jax.random.split(key, 16)

    def bn_params(i):
        return dict(
            gamma=1.0 + 0.1 * jax.random.normal(ks[i], (planes,), jnp.float32),
            beta=0.1 * jax.random.normal(ks[i + 1], (planes,), jnp.float32),
            mean=0.05 * jax.random.normal(ks[i + 2], (planes,), jnp.float32),
            var=1.0 + 0.1 * jax.random.uniform(ks[i + 3], (planes,), jnp.float32),
        )

    p = {
        "w1": 0.1 * jax.random.normal(ks[0], (planes, in_planes, 3, 3), jnp.float32),
        "bn1": bn_params(1),
        "w2": 0.1 * jax.random.normal(ks[5], (planes, planes, 3, 3), jnp.float32),
        "bn2": bn_params(6),
    }
    if stride != 1:
        p["wsc"] = 0.1 * jax.random.normal(ks[10], (planes, in_planes, 1, 1),
                                           jnp.float32)
        p["bnsc"] = bn_params(11)
    return p


def ref_basic_block(x, p, stride, *, cast_bf16=False):
    """Reference.  cast_bf16=True mirrors the kernel's bf16-input / f32-accum
    matmuls so it can be compared tightly against the Pallas result."""
    cdt = jnp.bfloat16 if cast_bf16 else jnp.float32

    def bn(y, b):
        s = b["gamma"] / jnp.sqrt(b["var"] + _EPS)
        return (y * s[None, :, None, None]
                + (b["beta"] - b["mean"] * s)[None, :, None, None])

    def conv(xx, w, s, pad):
        return jax.lax.conv_general_dilated(
            xx.astype(cdt), w.astype(cdt), (s, s), ((pad, pad), (pad, pad)),
            dimension_numbers=("NCHW", "OIHW", "NCHW"),
            preferred_element_type=jnp.float32)

    out = jax.nn.relu(bn(conv(x, p["w1"], stride, 1), p["bn1"]))
    out = bn(conv(out, p["w2"], 1, 1), p["bn2"])
    if stride != 1:
        sc = bn(conv(x, p["wsc"], stride, 0), p["bnsc"])
    else:
        sc = x
    return jax.nn.relu(out + sc)


# ---------------------------------------------------------------------------
if __name__ == "__main__":
    key = jax.random.PRNGKey(0)
    kx, kp1, kp2 = jax.random.split(key, 3)

    N, C, Hs, Ws = 2, 8, 16, 16
    x = jax.random.normal(kx, (N, C, Hs, Ws), jnp.float32)

    # ---- stride = 1 (identity shortcut, planes == in_planes) ---------------
    p1 = make_params(kp1, C, C, stride=1)
    y1 = basic_block_forward(x, p1, stride=1)
    jax.block_until_ready(y1)
    assert y1.shape == (N, C, Hs, Ws)
    r1_bf = ref_basic_block(x, p1, 1, cast_bf16=True)    # mirrors kernel rounding
    r1_f32 = ref_basic_block(x, p1, 1, cast_bf16=False)  # module semantics
    assert jnp.allclose(y1, r1_bf, atol=2e-3, rtol=2e-3), \
        float(jnp.max(jnp.abs(y1 - r1_bf)))
    assert jnp.allclose(y1, r1_f32, atol=1e-1, rtol=1e-1), \
        float(jnp.max(jnp.abs(y1 - r1_f32)))

    # ---- stride = 2 (projection shortcut, channel expansion 8 -> 16) -------
    planes2 = 16
    p2 = make_params(kp2, C, planes2, stride=2)
    y2 = basic_block_forward(x, p2, stride=2)
    jax.block_until_ready(y2)
    assert y2.shape == (N, planes2, Hs // 2, Ws // 2)
    r2_bf = ref_basic_block(x, p2, 2, cast_bf16=True)
    r2_f32 = ref_basic_block(x, p2, 2, cast_bf16=False)
    assert jnp.allclose(y2, r2_bf, atol=2e-3, rtol=2e-3), \
        float(jnp.max(jnp.abs(y2 - r2_bf)))
    assert jnp.allclose(y2, r2_f32, atol=1e-1, rtol=1e-1), \
        float(jnp.max(jnp.abs(y2 - r2_f32)))

    print("KERNEL_OK")
</pallas_src>

<mosaic_0001>
module attributes {stable_mosaic.version = 11 : i64} {
  func.func @_fused_basic_block_kernel(%arg0: i32, %arg1: memref<1x16x16x8xf32, #tpu.memory_space<vmem>>, %arg2: memref<72x8xbf16, #tpu.memory_space<vmem>>, %arg3: memref<1x8xf32, #tpu.memory_space<vmem>>, %arg4: memref<1x8xf32, #tpu.memory_space<vmem>>, %arg5: memref<72x8xbf16, #tpu.memory_space<vmem>>, %arg6: memref<1x8xf32, #tpu.memory_space<vmem>>, %arg7: memref<1x8xf32, #tpu.memory_space<vmem>>, %arg8: memref<1x256x8xf32, #tpu.memory_space<vmem>>, %arg9: memref<1x18x18x8xbf16, #tpu.memory_space<vmem>>, %arg10: memref<1x18x18x8xbf16, #tpu.memory_space<vmem>>, %arg11: memref<256x72xbf16, #tpu.memory_space<vmem>>, %arg12: memref<256x72xbf16, #tpu.memory_space<vmem>>) attributes {dimension_semantics = [#tpu.dimension_semantics<parallel>], iteration_bounds = array<i64: 2>, scalar_prefetch = 0 : i64, scratch_operands = 4 : i64, tpu.core_type = #tpu.core_type<tc>, window_params = [{transform_indices = @transform_0, window_bounds = array<i64: 1, 16, 16, 8>}, {pipeline_mode = #tpu.pipeline_mode<synchronous>, transform_indices = @transform_1, window_bounds = array<i64: 72, 8>}, {pipeline_mode = #tpu.pipeline_mode<synchronous>, transform_indices = @transform_2, window_bounds = array<i64: 1, 8>}, {pipeline_mode = #tpu.pipeline_mode<synchronous>, transform_indices = @transform_3, window_bounds = array<i64: 1, 8>}, {pipeline_mode = #tpu.pipeline_mode<synchronous>, transform_indices = @transform_4, window_bounds = array<i64: 72, 8>}, {pipeline_mode = #tpu.pipeline_mode<synchronous>, transform_indices = @transform_5, window_bounds = array<i64: 1, 8>}, {pipeline_mode = #tpu.pipeline_mode<synchronous>, transform_indices = @transform_6, window_bounds = array<i64: 1, 8>}, {transform_indices = @transform_7, window_bounds = array<i64: 1, 256, 8>}]} {
    %cst = arith.constant 0.000000e+00 : bf16
    %0 = vector.broadcast %cst : bf16 to vector<1x18x8xbf16>
    %cst_0 = arith.constant 0.000000e+00 : bf16
    %1 = vector.broadcast %cst_0 : bf16 to vector<16x1x8xbf16>
    %c0 = arith.constant 0 : index
    %c0_1 = arith.constant 0 : index
    %c0_2 = arith.constant 0 : index
    %c0_3 = arith.constant 0 : index
    %2 = vector.load %arg9[%c0, %c0_1, %c0_2, %c0_3] : memref<1x18x18x8xbf16, #tpu.memory_space<vmem>>, vector<1x1x18x8xbf16>
    %3 = vector.shape_cast %2 : vector<1x1x18x8xbf16> to vector<1x18x8xbf16>
    %4 = vector.shape_cast %0 : vector<1x18x8xbf16> to vector<1x1x18x8xbf16>
    tpu.vector_store %arg9[%c0, %c0_1, %c0_2, %c0_3], %4 {strides = array<i32>} : memref<1x18x18x8xbf16, #tpu.memory_space<vmem>>, vector<1x1x18x8xbf16>,
    %c0_4 = arith.constant 0 : index
    %c17 = arith.constant 17 : index
    %c0_5 = arith.constant 0 : index
    %c0_6 = arith.constant 0 : index
    %5 = vector.load %arg9[%c0_4, %c17, %c0_5, %c0_6] : memref<1x18x18x8xbf16, #tpu.memory_space<vmem>>, vector<1x1x18x8xbf16>
    %6 = vector.shape_cast %5 : vector<1x1x18x8xbf16> to vector<1x18x8xbf16>
    %7 = vector.shape_cast %0 : vector<1x18x8xbf16> to vector<1x1x18x8xbf16>
    tpu.vector_store %arg9[%c0_4, %c17, %c0_5, %c0_6], %7 {strides = array<i32>} : memref<1x18x18x8xbf16, #tpu.memory_space<vmem>>, vector<1x1x18x8xbf16>,
    %c0_7 = arith.constant 0 : index
    %c1 = arith.constant 1 : index
    %c0_8 = arith.constant 0 : index
    %c0_9 = arith.constant 0 : index
    %8 = vector.load %arg9[%c0_7, %c1, %c0_8, %c0_9] : memref<1x18x18x8xbf16, #tpu.memory_space<vmem>>, vector<1x16x1x8xbf16>
    %9 = vector.shape_cast %8 : vector<1x16x1x8xbf16> to vector<16x1x8xbf16>
    %10 = vector.shape_cast %1 : vector<16x1x8xbf16> to vector<1x16x1x8xbf16>
    tpu.vector_store %arg9[%c0_7, %c1, %c0_8, %c0_9], %10 {strides = array<i32>} : memref<1x18x18x8xbf16, #tpu.memory_space<vmem>>, vector<1x16x1x8xbf16>,
    %c0_10 = arith.constant 0 : index
    %c1_11 = arith.constant 1 : index
    %c17_12 = arith.constant 17 : index
    %c0_13 = arith.constant 0 : index
    %11 = vector.load %arg9[%c0_10, %c1_11, %c17_12, %c0_13] : memref<1x18x18x8xbf16, #tpu.memory_space<vmem>>, vector<1x16x1x8xbf16>
    %12 = vector.shape_cast %11 : vector<1x16x1x8xbf16> to vector<16x1x8xbf16>
    %13 = vector.shape_cast %1 : vector<16x1x8xbf16> to vector<1x16x1x8xbf16>
    tpu.vector_store %arg9[%c0_10, %c1_11, %c17_12, %c0_13], %13 {strides = array<i32>} : memref<1x18x18x8xbf16, #tpu.memory_space<vmem>>, vector<1x16x1x8xbf16>,
    %c0_14 = arith.constant 0 : index
    %c0_15 = arith.constant 0 : index
    %c0_16 = arith.constant 0 : index
    %c0_17 = arith.constant 0 : index
    %14 = vector.load %arg1[%c0_14, %c0_15, %c0_16, %c0_17] : memref<1x16x16x8xf32, #tpu.memory_space<vmem>>, vector<1x16x16x8xf32>
    %15 = vector.shape_cast %14 : vector<1x16x16x8xf32> to vector<16x16x8xf32>
    %16 = arith.truncf %15 : vector<16x16x8xf32> to vector<16x16x8xbf16>
    %c0_18 = arith.constant 0 : index
    %c1_19 = arith.constant 1 : index
    %c1_20 = arith.constant 1 : index
    %c0_21 = arith.constant 0 : index
    %17 = vector.load %arg9[%c0_18, %c1_19, %c1_20, %c0_21] : memref<1x18x18x8xbf16, #tpu.memory_space<vmem>>, vector<1x16x16x8xbf16>
    %18 = vector.shape_cast %17 : vector<1x16x16x8xbf16> to vector<16x16x8xbf16>
    %19 = vector.shape_cast %16 : vector<16x16x8xbf16> to vector<1x16x16x8xbf16>
    tpu.vector_store %arg9[%c0_18, %c1_19, %c1_20, %c0_21], %19 {strides = array<i32>} : memref<1x18x18x8xbf16, #tpu.memory_space<vmem>>, vector<1x16x16x8xbf16>,
    %c0_22 = arith.constant 0 : index
    %c0_23 = arith.constant 0 : index
    %c0_24 = arith.constant 0 : index
    %c0_25 = arith.constant 0 : index
    %20 = vector.load %arg9[%c0_22, %c0_23, %c0_24, %c0_25] : memref<1x18x18x8xbf16, #tpu.memory_space<vmem>>, vector<1x18x18x8xbf16>
    %21 = vector.shape_cast %20 : vector<1x18x18x8xbf16> to vector<18x18x8xbf16>
    %22 = vector.extract_strided_slice %21 {offsets = [0, 0, 0], sizes = [16, 16, 8], strides = [1, 1, 1]} : vector<18x18x8xbf16> to vector<16x16x8xbf16>
    %23 = vector.shape_cast %22 : vector<16x16x8xbf16> to vector<256x8xbf16>
    %24 = vector.extract_strided_slice %21 {offsets = [0, 1, 0], sizes = [16, 16, 8], strides = [1, 1, 1]} : vector<18x18x8xbf16> to vector<16x16x8xbf16>
    %25 = vector.shape_cast %24 : vector<16x16x8xbf16> to vector<256x8xbf16>
    %26 = vector.extract_strided_slice %21 {offsets = [0, 2, 0], sizes = [16, 16, 8], strides = [1, 1, 1]} : vector<18x18x8xbf16> to vector<16x16x8xbf16>
    %27 = vector.shape_cast %26 : vector<16x16x8xbf16> to vector<256x8xbf16>
    %28 = vector.extract_strided_slice %21 {offsets = [1, 0, 0], sizes = [16, 16, 8], strides = [1, 1, 1]} : vector<18x18x8xbf16> to vector<16x16x8xbf16>
    %29 = vector.shape_cast %28 : vector<16x16x8xbf16> to vector<256x8xbf16>
    %30 = vector.extract_strided_slice %21 {offsets = [1, 1, 0], sizes = [16, 16, 8], strides = [1, 1, 1]} : vector<18x18x8xbf16> to vector<16x16x8xbf16>
    %31 = vector.shape_cast %30 : vector<16x16x8xbf16> to vector<256x8xbf16>
    %32 = vector.extract_strided_slice %21 {offsets = [1, 2, 0], sizes = [16, 16, 8], strides = [1, 1, 1]} : vector<18x18x8xbf16> to vector<16x16x8xbf16>
    %33 = vector.shape_cast %32 : vector<16x16x8xbf16> to vector<256x8xbf16>
    %34 = vector.extract_strided_slice %21 {offsets = [2, 0, 0], sizes = [16, 16, 8], strides = [1, 1, 1]} : vector<18x18x8xbf16> to vector<16x16x8xbf16>
    %35 = vector.shape_cast %34 : vector<16x16x8xbf16> to vector<256x8xbf16>
    %36 = vector.extract_strided_slice %21 {offsets = [2, 1, 0], sizes = [16, 16, 8], strides = [1, 1, 1]} : vector<18x18x8xbf16> to vector<16x16x8xbf16>
    %37 = vector.shape_cast %36 : vector<16x16x8xbf16> to vector<256x8xbf16>
    %38 = vector.extract_strided_slice %21 {offsets = [2, 2, 0], sizes = [16, 16, 8], strides = [1, 1, 1]} : vector<18x18x8xbf16> to vector<16x16x8xbf16>
    %39 = vector.shape_cast %38 : vector<16x16x8xbf16> to vector<256x8xbf16>
    %40 = tpu.concatenate %23, %25, %27, %29, %31, %33, %35, %37, %39 in 1 : vector<256x8xbf16>, vector<256x8xbf16>, vector<256x8xbf16>, vector<256x8xbf16>, vector<256x8xbf16>, vector<256x8xbf16>, vector<256x8xbf16>, vector<256x8xbf16>, vector<256x8xbf16> -> vector<256x72xbf16>
    %c0_26 = arith.constant 0 : index
    %c0_27 = arith.constant 0 : index
    %41 = vector.load %arg11[%c0_26, %c0_27] : memref<256x72xbf16, #tpu.memory_space<vmem>>, vector<256x72xbf16>
    tpu.vector_store %arg11[%c0_26, %c0_27], %40 {strides = array<i32>} : memref<256x72xbf16, #tpu.memory_space<vmem>>, vector<256x72xbf16>,
    %c0_28 = arith.constant 0 : index
    %c0_29 = arith.constant 0 : index
    %42 = vector.load %arg11[%c0_28, %c0_29] : memref<256x72xbf16, #tpu.memory_space<vmem>>, vector<256x72xbf16>
    %c0_30 = arith.constant 0 : index
    %c0_31 = arith.constant 0 : index
    %43 = vector.load %arg2[%c0_30, %c0_31] : memref<72x8xbf16, #tpu.memory_space<vmem>>, vector<72x8xbf16>
    %cst_32 = arith.constant dense<0.000000e+00> : vector<256x8xf32>
    %44 = tpu.matmul %42, %43, %cst_32 {dimension_numbers = #tpu.dot_dimension_numbers<[1], [0], [0], [1], [0, 0, 1, 1], [], []>} : vector<256x72xbf16>, vector<72x8xbf16>, vector<256x8xf32> -> vector<256x8xf32>
    %c0_33 = arith.constant 0 : index
    %c0_34 = arith.constant 0 : index
    %45 = vector.load %arg3[%c0_33, %c0_34] : memref<1x8xf32, #tpu.memory_space<vmem>>, vector<1x8xf32>
    %46 = vector.broadcast %45 : vector<1x8xf32> to vector<256x8xf32>
    %47 = arith.mulf %44, %46 : vector<256x8xf32>
    %c0_35 = arith.constant 0 : index
    %c0_36 = arith.constant 0 : index
    %48 = vector.load %arg4[%c0_35, %c0_36] : memref<1x8xf32, #tpu.memory_space<vmem>>, vector<1x8xf32>
    %49 = vector.broadcast %48 : vector<1x8xf32> to vector<256x8xf32>
    %50 = arith.addf %47, %49 : vector<256x8xf32>
    %cst_37 = arith.constant 0.000000e+00 : f32
    %51 = vector.broadcast %cst_37 : f32 to vector<256x8xf32>
    %52 = arith.maximumf %50, %51 : vector<256x8xf32>
    %c0_38 = arith.constant 0 : index
    %c0_39 = arith.constant 0 : index
    %c0_40 = arith.constant 0 : index
    %c0_41 = arith.constant 0 : index
    %53 = vector.load %arg1[%c0_38, %c0_39, %c0_40, %c0_41] : memref<1x16x16x8xf32, #tpu.memory_space<vmem>>, vector<1x16x16x8xf32>
    %54 = vector.shape_cast %53 : vector<1x16x16x8xf32> to vector<256x8xf32>
    %cst_42 = arith.constant 0.000000e+00 : bf16
    %55 = vector.broadcast %cst_42 : bf16 to vector<1x18x8xbf16>
    %cst_43 = arith.constant 0.000000e+00 : bf16
    %56 = vector.broadcast %cst_43 : bf16 to vector<16x1x8xbf16>
    %c0_44 = arith.constant 0 : index
    %c0_45 = arith.constant 0 : index
    %c0_46 = arith.constant 0 : index
    %c0_47 = arith.constant 0 : index
    %57 = vector.load %arg10[%c0_44, %c0_45, %c0_46, %c0_47] : memref<1x18x18x8xbf16, #tpu.memory_space<vmem>>, vector<1x1x18x8xbf16>
    %58 = vector.shape_cast %57 : vector<1x1x18x8xbf16> to vector<1x18x8xbf16>
    %59 = vector.shape_cast %55 : vector<1x18x8xbf16> to vector<1x1x18x8xbf16>
    tpu.vector_store %arg10[%c0_44, %c0_45, %c0_46, %c0_47], %59 {strides = array<i32>} : memref<1x18x18x8xbf16, #tpu.memory_space<vmem>>, vector<1x1x18x8xbf16>,
    %c0_48 = arith.constant 0 : index
    %c17_49 = arith.constant 17 : index
    %c0_50 = arith.constant 0 : index
    %c0_51 = arith.constant 0 : index
    %60 = vector.load %arg10[%c0_48, %c17_49, %c0_50, %c0_51] : memref<1x18x18x8xbf16, #tpu.memory_space<vmem>>, vector<1x1x18x8xbf16>
    %61 = vector.shape_cast %60 : vector<1x1x18x8xbf16> to vector<1x18x8xbf16>
    %62 = vector.shape_cast %55 : vector<1x18x8xbf16> to vector<1x1x18x8xbf16>
    tpu.vector_store %arg10[%c0_48, %c17_49, %c0_50, %c0_51], %62 {strides = array<i32>} : memref<1x18x18x8xbf16, #tpu.memory_space<vmem>>, vector<1x1x18x8xbf16>,
    %c0_52 = arith.constant 0 : index
    %c1_53 = arith.constant 1 : index
    %c0_54 = arith.constant 0 : index
    %c0_55 = arith.constant 0 : index
    %63 = vector.load %arg10[%c0_52, %c1_53, %c0_54, %c0_55] : memref<1x18x18x8xbf16, #tpu.memory_space<vmem>>, vector<1x16x1x8xbf16>
    %64 = vector.shape_cast %63 : vector<1x16x1x8xbf16> to vector<16x1x8xbf16>
    %65 = vector.shape_cast %56 : vector<16x1x8xbf16> to vector<1x16x1x8xbf16>
    tpu.vector_store %arg10[%c0_52, %c1_53, %c0_54, %c0_55], %65 {strides = array<i32>} : memref<1x18x18x8xbf16, #tpu.memory_space<vmem>>, vector<1x16x1x8xbf16>,
    %c0_56 = arith.constant 0 : index
    %c1_57 = arith.constant 1 : index
    %c17_58 = arith.constant 17 : index
    %c0_59 = arith.constant 0 : index
    %66 = vector.load %arg10[%c0_56, %c1_57, %c17_58, %c0_59] : memref<1x18x18x8xbf16, #tpu.memory_space<vmem>>, vector<1x16x1x8xbf16>
    %67 = vector.shape_cast %66 : vector<1x16x1x8xbf16> to vector<16x1x8xbf16>
    %68 = vector.shape_cast %56 : vector<16x1x8xbf16> to vector<1x16x1x8xbf16>
    tpu.vector_store %arg10[%c0_56, %c1_57, %c17_58, %c0_59], %68 {strides = array<i32>} : memref<1x18x18x8xbf16, #tpu.memory_space<vmem>>, vector<1x16x1x8xbf16>,
    %69 = vector.shape_cast %52 : vector<256x8xf32> to vector<16x16x8xf32>
    %70 = arith.truncf %69 : vector<16x16x8xf32> to vector<16x16x8xbf16>
    %c0_60 = arith.constant 0 : index
    %c1_61 = arith.constant 1 : index
    %c1_62 = arith.constant 1 : index
    %c0_63 = arith.constant 0 : index
    %71 = vector.load %arg10[%c0_60, %c1_61, %c1_62, %c0_63] : memref<1x18x18x8xbf16, #tpu.memory_space<vmem>>, vector<1x16x16x8xbf16>
    %72 = vector.shape_cast %71 : vector<1x16x16x8xbf16> to vector<16x16x8xbf16>
    %73 = vector.shape_cast %70 : vector<16x16x8xbf16> to vector<1x16x16x8xbf16>
    tpu.vector_store %arg10[%c0_60, %c1_61, %c1_62, %c0_63], %73 {strides = array<i32>} : memref<1x18x18x8xbf16, #tpu.memory_space<vmem>>, vector<1x16x16x8xbf16>,
    %c0_64 = arith.constant 0 : index
    %c0_65 = arith.constant 0 : index
    %c0_66 = arith.constant 0 : index
    %c0_67 = arith.constant 0 : index
    %74 = vector.load %arg10[%c0_64, %c0_65, %c0_66, %c0_67] : memref<1x18x18x8xbf16, #tpu.memory_space<vmem>>, vector<1x18x18x8xbf16>
    %75 = vector.shape_cast %74 : vector<1x18x18x8xbf16> to vector<18x18x8xbf16>
    %76 = vector.extract_strided_slice %75 {offsets = [0, 0, 0], sizes = [16, 16, 8], strides = [1, 1, 1]} : vector<18x18x8xbf16> to vector<16x16x8xbf16>
    %77 = vector.shape_cast %76 : vector<16x16x8xbf16> to vector<256x8xbf16>
    %78 = vector.extract_strided_slice %75 {offsets = [0, 1, 0], sizes = [16, 16, 8], strides = [1, 1, 1]} : vector<18x18x8xbf16> to vector<16x16x8xbf16>
    %79 = vector.shape_cast %78 : vector<16x16x8xbf16> to vector<256x8xbf16>
    %80 = vector.extract_strided_slice %75 {offsets = [0, 2, 0], sizes = [16, 16, 8], strides = [1, 1, 1]} : vector<18x18x8xbf16> to vector<16x16x8xbf16>
    %81 = vector.shape_cast %80 : vector<16x16x8xbf16> to vector<256x8xbf16>
    %82 = vector.extract_strided_slice %75 {offsets = [1, 0, 0], sizes = [16, 16, 8], strides = [1, 1, 1]} : vector<18x18x8xbf16> to vector<16x16x8xbf16>
    %83 = vector.shape_cast %82 : vector<16x16x8xbf16> to vector<256x8xbf16>
    %84 = vector.extract_strided_slice %75 {offsets = [1, 1, 0], sizes = [16, 16, 8], strides = [1, 1, 1]} : vector<18x18x8xbf16> to vector<16x16x8xbf16>
    %85 = vector.shape_cast %84 : vector<16x16x8xbf16> to vector<256x8xbf16>
    %86 = vector.extract_strided_slice %75 {offsets = [1, 2, 0], sizes = [16, 16, 8], strides = [1, 1, 1]} : vector<18x18x8xbf16> to vector<16x16x8xbf16>
    %87 = vector.shape_cast %86 : vector<16x16x8xbf16> to vector<256x8xbf16>
    %88 = vector.extract_strided_slice %75 {offsets = [2, 0, 0], sizes = [16, 16, 8], strides = [1, 1, 1]} : vector<18x18x8xbf16> to vector<16x16x8xbf16>
    %89 = vector.shape_cast %88 : vector<16x16x8xbf16> to vector<256x8xbf16>
    %90 = vector.extract_strided_slice %75 {offsets = [2, 1, 0], sizes = [16, 16, 8], strides = [1, 1, 1]} : vector<18x18x8xbf16> to vector<16x16x8xbf16>
    %91 = vector.shape_cast %90 : vector<16x16x8xbf16> to vector<256x8xbf16>
    %92 = vector.extract_strided_slice %75 {offsets = [2, 2, 0], sizes = [16, 16, 8], strides = [1, 1, 1]} : vector<18x18x8xbf16> to vector<16x16x8xbf16>
    %93 = vector.shape_cast %92 : vector<16x16x8xbf16> to vector<256x8xbf16>
    %94 = tpu.concatenate %77, %79, %81, %83, %85, %87, %89, %91, %93 in 1 : vector<256x8xbf16>, vector<256x8xbf16>, vector<256x8xbf16>, vector<256x8xbf16>, vector<256x8xbf16>, vector<256x8xbf16>, vector<256x8xbf16>, vector<256x8xbf16>, vector<256x8xbf16> -> vector<256x72xbf16>
    %c0_68 = arith.constant 0 : index
    %c0_69 = arith.constant 0 : index
    %95 = vector.load %arg12[%c0_68, %c0_69] : memref<256x72xbf16, #tpu.memory_space<vmem>>, vector<256x72xbf16>
    tpu.vector_store %arg12[%c0_68, %c0_69], %94 {strides = array<i32>} : memref<256x72xbf16, #tpu.memory_space<vmem>>, vector<256x72xbf16>,
    %c0_70 = arith.constant 0 : index
    %c0_71 = arith.constant 0 : index
    %96 = vector.load %arg12[%c0_70, %c0_71] : memref<256x72xbf16, #tpu.memory_space<vmem>>, vector<256x72xbf16>
    %c0_72 = arith.constant 0 : index
    %c0_73 = arith.constant 0 : index
    %97 = vector.load %arg5[%c0_72, %c0_73] : memref<72x8xbf16, #tpu.memory_space<vmem>>, vector<72x8xbf16>
    %cst_74 = arith.constant dense<0.000000e+00> : vector<256x8xf32>
    %98 = tpu.matmul %96, %97, %cst_74 {dimension_numbers = #tpu.dot_dimension_numbers<[1], [0], [0], [1], [0, 0, 1, 1], [], []>} : vector<256x72xbf16>, vector<72x8xbf16>, vector<256x8xf32> -> vector<256x8xf32>
    %c0_75 = arith.constant 0 : index
    %c0_76 = arith.constant 0 : index
    %99 = vector.load %arg6[%c0_75, %c0_76] : memref<1x8xf32, #tpu.memory_space<vmem>>, vector<1x8xf32>
    %100 = vector.broadcast %99 : vector<1x8xf32> to vector<256x8xf32>
    %101 = arith.mulf %98, %100 : vector<256x8xf32>
    %c0_77 = arith.constant 0 : index
    %c0_78 = arith.constant 0 : index
    %102 = vector.load %arg7[%c0_77, %c0_78] : memref<1x8xf32, #tpu.memory_space<vmem>>, vector<1x8xf32>
    %103 = vector.broadcast %102 : vector<1x8xf32> to vector<256x8xf32>
    %104 = arith.addf %101, %103 : vector<256x8xf32>
    %105 = arith.addf %104, %54 : vector<256x8xf32>
    %cst_79 = arith.constant 0.000000e+00 : f32
    %106 = vector.broadcast %cst_79 : f32 to vector<256x8xf32>
    %107 = arith.maximumf %105, %106 : vector<256x8xf32>
    %108 = vector.shape_cast %107 : vector<256x8xf32> to vector<1x256x8xf32>
    %c0_80 = arith.constant 0 : index
    %c0_81 = arith.constant 0 : index
    %c0_82 = arith.constant 0 : index
    %109 = vector.load %arg8[%c0_80, %c0_81, %c0_82] : memref<1x256x8xf32, #tpu.memory_space<vmem>>, vector<1x256x8xf32>
    tpu.vector_store %arg8[%c0_80, %c0_81, %c0_82], %108 {strides = array<i32>} : memref<1x256x8xf32, #tpu.memory_space<vmem>>, vector<1x256x8xf32>,
    return
  }
  func.func @transform_0(%arg0: i32) -> (i32, i32, i32, i32) {
    %c0_i32 = arith.constant 0 : i32
    %c0_i32_0 = arith.constant 0 : i32
    %c0_i32_1 = arith.constant 0 : i32
    %c0_i32_2 = arith.constant 0 : i32
    return %arg0, %c0_i32, %c0_i32_0, %c0_i32_1 : i32, i32, i32, i32
  }
  func.func @transform_1(%arg0: i32) -> (i32, i32) {
    %c0_i32 = arith.constant 0 : i32
    %c0_i32_0 = arith.constant 0 : i32
    %c0_i32_1 = arith.constant 0 : i32
    return %c0_i32, %c0_i32_0 : i32, i32
  }
  func.func @transform_2(%arg0: i32) -> (i32, i32) {
    %c0_i32 = arith.constant 0 : i32
    %c0_i32_0 = arith.constant 0 : i32
    %c0_i32_1 = arith.constant 0 : i32
    return %c0_i32, %c0_i32_0 : i32, i32
  }
  func.func @transform_3(%arg0: i32) -> (i32, i32) {
    %c0_i32 = arith.constant 0 : i32
    %c0_i32_0 = arith.constant 0 : i32
    %c0_i32_1 = arith.constant 0 : i32
    return %c0_i32, %c0_i32_0 : i32, i32
  }
  func.func @transform_4(%arg0: i32) -> (i32, i32) {
    %c0_i32 = arith.constant 0 : i32
    %c0_i32_0 = arith.constant 0 : i32
    %c0_i32_1 = arith.constant 0 : i32
    return %c0_i32, %c0_i32_0 : i32, i32
  }
  func.func @transform_5(%arg0: i32) -> (i32, i32) {
    %c0_i32 = arith.constant 0 : i32
    %c0_i32_0 = arith.constant 0 : i32
    %c0_i32_1 = arith.constant 0 : i32
    return %c0_i32, %c0_i32_0 : i32, i32
  }
  func.func @transform_6(%arg0: i32) -> (i32, i32) {
    %c0_i32 = arith.constant 0 : i32
    %c0_i32_0 = arith.constant 0 : i32
    %c0_i32_1 = arith.constant 0 : i32
    return %c0_i32, %c0_i32_0 : i32, i32
  }
  func.func @transform_7(%arg0: i32) -> (i32, i32, i32) {
    %c0_i32 = arith.constant 0 : i32
    %c0_i32_0 = arith.constant 0 : i32
    %c0_i32_1 = arith.constant 0 : i32
    return %arg0, %c0_i32, %c0_i32_0 : i32, i32, i32
  }
}

</mosaic_0001>

<bundles_post_ra>
// kernel: basic_block_forward_nhwc.1
= control target key start
LH: loop header
LB: loop body
LE: loop exit
PB: predicated region body
PF: predicated region fallthrough
CT: control target
= control target key end

     0   :  { %s5861_s24 = smov 0   ;;  %s8713_s0 = inlined_call_operand.vmem [shape: f32[2,16,16,8], index: 0, kind: input, shape index: {}]   ;;  %s8714_s1 = inlined_call_operand.vmem [shape: bf16[72,8], index: 1, kind: input, shape index: {}]   ;;  %s8715_s2 = inlined_call_operand.vmem [shape: f32[1,8], index: 2, kind: input, shape index: {}]   ;;  %s8716_s3 = inlined_call_operand.vmem [shape: f32[1,8], index: 3, kind: input, shape index: {}]   ;;  %s8717_s4 = inlined_call_operand.vmem [shape: bf16[72,8], index: 4, kind: input, shape index: {}]   ;;  %s8718_s5 = inlined_call_operand.vmem [shape: f32[1,8], index: 5, kind: input, shape index: {}]   ;;  %s8719_s6 = inlined_call_operand.vmem [shape: f32[1,8], index: 6, kind: input, shape index: {}]   ;;  %s8720_s7 = inlined_call_operand.vmem [shape: f32[2,256,8], index: 7, kind: output, shape index: {}]  }
   0x1 LB: > { %s5278_s25 = sadd.s32 4294967295, %s5810_s24   ;;  %p5282_p0 = scmp.ge.s32.totalorder %s5810_s24, 1  ;;  %s5810_s24 = sphi %s5861_s24, %s17_s24  }
   0x2   : > { %p237_p1 = scmp.lt.s32.totalorder %s5810_s24, 3 }
   0x4   : > { %p238_p2 = pnand %p5282_p0, %p237_p1 }
   0x6   : > { %241 = sbr.rel (%p238_p2) target bundleno = 1068 (0x42c), region = 48 }
   0xd   : > { %vm280_vm0 = vcmask 60416   ;;  %vm283_vm1 = vcmask 57344   ;;  %vm291_vm2 = vsmask.f32 256  ;;  %v5812_v0 = vmov 0   ;;  %p269_p3 = scmp.lt.s32.totalorder %s5278_s25, 1 }
   0xe   : > { %281 = vst.msk [vmem:[#allocation2] sm:$0xf] %vm280_vm0, %v5812_v0  ;;  %282 = vst.msk [vmem:[#allocation2 + $0x4] sm:$0xf] %vm280_vm0, %v5812_v0  ;;  %vm341_vm4 = vsmask.f32 7938 }
   0xf   : > { %284 = vst.msk [vmem:[#allocation2 + $0x8] sm:$0x1] %vm283_vm1, %v5812_v0  ;;  %vm5874_vm3 = vmand %vm283_vm1, %vm291_vm2  ;;  %v296_v3 = vld [vmem:[#allocation2 + $0x18] sm:$0x1]  ;;  %vm1444_vm6 = vcmask 1042432   ;;  %vm1445_vm7 = vcmask 1046532  }
  0x10   : > { %286 = vst.msk [vmem:[#allocation2 + $0xcc] sm:$0xf] %vm280_vm0, %v5812_v0  ;;  %287 = vst.msk [vmem:[#allocation2 + $0xd0] sm:$0xf] %vm280_vm0, %v5812_v0  ;;  %v297_v4 = vsel %vm5874_vm3, 0, %v296_v3  ;;  %s8793_s25 = smov (!%p269_p3, %s5278_s25), 1 }
  0x11   : > { %288 = vst.msk [vmem:[#allocation2 + $0xd4] sm:$0x1] %vm283_vm1, %v5812_v0  ;;  %2767 = vst.msk [vmem:[#allocation3 + $0x8] sm:$0x1] %vm283_vm1, %v5812_v0  ;;  %v293_v5 = vld [vmem:[#allocation2 + $0xc] sm:$0x1] }
  0x12   : > { %2765 = vst.msk [vmem:[#allocation3] sm:$0xf] %vm280_vm0, %v5812_v0  ;;  %2766 = vst.msk [vmem:[#allocation3 + $0x4] sm:$0xf] %vm280_vm0, %v5812_v0  ;;  %v294_v6 = vsel %vm5874_vm3, 0, %v293_v5  ;;  %s5543_s26 = sshll.u32 %s8793_s25, 8 }
  0x13   : > { %2769 = vst.msk [vmem:[#allocation3 + $0xcc] sm:$0xf] %vm280_vm0, %v5812_v0  ;;  %2770 = vst.msk [vmem:[#allocation3 + $0xd0] sm:$0xf] %vm280_vm0, %v5812_v0  ;;  %v299_v7 = vld [vmem:[#allocation2 + $0x24] sm:$0x1]  ;;  %s5921_s29 = scalar_lea.vmem %s8713_s0, %s5543_s26 }
  0x14   : > { %2771 = vst.msk [vmem:[#allocation3 + $0xd4] sm:$0x1] %vm283_vm1, %v5812_v0  ;;  %vm5889_vm5 = vmand %vm283_vm1, %vm341_vm4  ;;  %v343_v8 = vld [vmem:[#allocation2 + $0x14] sm:$0x1]  ;;  %v300_v9 = vsel %vm5874_vm3, 0, %v299_v7  ;;  %v394_v28 = vld [vmem:[%s5921_s29 + $0x18] sm:$0xff] }
  0x15   : > { %298 = vst [vmem:[#allocation2 + $0x18] sm:$0x1] %v297_v4  ;;  %295 = vst [vmem:[#allocation2 + $0xc] sm:$0x1] %v294_v6  ;;  %v344_v10 = vsel %vm5889_vm5, 0, %v343_v8  ;;  %v393_v23 = vld [vmem:[%s5921_s29 + $0x10] sm:$0xff]  ;;  %v5548_v40 = vpack.c.bf16 %v394_v28, %v394_v28 }
  0x16   : > { %v346_v11 = vld [vmem:[#allocation2 + $0x20] sm:$0x1]  ;;  %vm1009_vm8 = vsmask.f32 3328  ;;  %301 = vst [vmem:[#allocation2 + $0x24] sm:$0x1] %v300_v9  ;;  %vm5912_vm9 = vmor %vm1444_vm6, %vm1445_vm7  ;;  %v5547_v32 = vpack.c.bf16 %v393_v23, %v393_v23 }
  0x17   : > { %345 = vst [vmem:[#allocation2 + $0x14] sm:$0x1] %v344_v10  ;;  %v347_v12 = vsel %vm5889_vm5, 0, %v346_v11  ;;  %v349_v13 = vld [vmem:[#allocation2 + $0x2c] sm:$0x1]  ;;  %v391_v33 = vld [vmem:[%s5921_s29] sm:$0xff]  ;;  %vm5942_vm13 = vmand %vm280_vm0, %vm341_vm4 }
  0x18   : > { %vm1010_vm10 = vsmask.f32 7440  ;;  %vm519_vm11 = vsmask.f32 4368  ;;  %348 = vst [vmem:[#allocation2 + $0x20] sm:$0x1] %v347_v12  ;;  %v5545_v46 = vpack.c.bf16 %v391_v33, %v391_v33 }
  0x19   : > { %v350_v15 = vsel %vm5889_vm5, 0, %v349_v13  ;;  %v955_v16 = vld [vmem:[#allocation2] sm:$0xf]  ;;  %v956_v17 = vld [vmem:[#allocation2 + $0x4] sm:$0xf]  ;;  %v392_v38 = vld [vmem:[%s5921_s29 + $0x8] sm:$0xff] }
  0x1a   : > { %v957_v18 = vld [vmem:[#allocation2 + $0x8] sm:$0x1]  ;;  %351 = vst [vmem:[#allocation2 + $0x2c] sm:$0x1] %v350_v15  ;;  %v5319_v19 = vrot.slane %v955_v16, 9  ;;  %v1449_v20 = vrot.slane %v956_v17, 5  ;;  %vm5935_vm12 = vmor %vm1009_vm8, %vm1010_vm10  ;;  %v5546_v51 = vpack.c.bf16 %v392_v38, %v392_v38 }
  0x1b   : > { %v1452_v21 = vrot.slane %v957_v18, 5  ;;  %v1013_v22 = vshrl.u32 %v955_v16, 16  ;;  %v1016_v24 = vshll.u32 %v955_v16, 16  ;;  %v1022_v25 = vshll.u32 %v956_v17, 16  ;;  %s5813_s30 = smov 16   ;;  %v395_v62 = vld [vmem:[%s5921_s29 + $0x20] sm:$0xff]  ;;  %vm5953_vm14 = vmor %vm291_vm2, %vm519_vm11 }
  0x1c   : > { %v1026_v26 = vshrl.u32 %v956_v17, 16  ;;  %v1032_v27 = vshll.u32 %v957_v18, 16  ;;  %v1450_v29 = vsel %vm5912_vm9, %v5319_v19, %v1449_v20  ;;  %v1451_v30 = vrot.slane %v1449_v20, 4  ;;  %v850_v55 = vld [vmem:[#allocation2 + $0x18] sm:$0xf]  ;;  %v396_v7 = vld [vmem:[%s5921_s29 + $0x28] sm:$0xff] }
  0x1d   : > { %v1015_v31 = vrot.slane %v1013_v22, 4  ;;  %v1018_v34 = vrot.slane %v1016_v24, 5  ;;  %v1024_v35 = vrot.slane %v1022_v25, 5  ;;  %v539_v41 = vshrl.u32 %v5547_v32, 16  ;;  %v302_v63 = vld [vmem:[#allocation2 + $0x30] sm:$0x1] }
  0x1e   : > { %v1028_v36 = vrot.slane %v1026_v26, 4  ;;  %v1034_v37 = vrot.slane %v1032_v27, 5  ;;  %v1453_v39 = vsel %vm5912_vm9, %v1451_v30, %v1452_v21  ;;  %v542_v42 = vshll.u32 %v5547_v32, 16  ;;  %v843_v13 = vld [vmem:[#allocation2 + $0xc] sm:$0xf]  ;;  %v397_v19 = vld [vmem:[%s5921_s29 + $0x30] sm:$0xff] }
  0x1f   : > { %v5369_v43 = vcombine.low %v1450_v29, %v1453_v39  ;;  %v1019_v44 = vor.u32 %v1018_v34, %v1015_v31  ;;  %v541_v48 = vrot.slane %v539_v41, 7  ;;  %v547_v49 = vshrl.u32 %v5548_v40, 16  ;;  %v854_v8 = vld [vmem:[#allocation2 + $0x20] sm:$0x1]  ;;  %s5814_s8 = smov 8   ;;  %v398_v25 = vld [vmem:[%s5921_s29 + $0x38] sm:$0xff] }
  0x20   : > { %v1029_v45 = vor.u32 %v1028_v36, %v1024_v35  ;;  %v550_v50 = vshll.u32 %v5548_v40, 16  ;;  %v522_v56 = vshrl.u32 %v5545_v46, 16  ;;  %v525_v57 = vshll.u32 %v5545_v46, 16  ;;  %v847_v22 = vld [vmem:[#allocation2 + $0x14] sm:$0x1]  ;;  %s5815_s9 = smov 24  }
  0x21   : > { %1803 = vrot.lane.b32.xlu1 %v5369_v43, %s5813_s30  ;;  %v1020_v52 = vrot.slane %v1019_v44, 4  ;;  %v544_v58 = vor.u32 %v542_v42, %v541_v48  ;;  %v545_v59 = vrot.slane %v541_v48, 4  ;;  %v549_v60 = vrot.slane %v547_v49, 7  ;;  %v352_v30 = vld [vmem:[#allocation2 + $0x38] sm:$0x1]  ;;  %s5816_s10 = smov 48  }
  0x22   : > { %v1030_v53 = vrot.slane %v1029_v45, 4  ;;  %v530_v61 = vshrl.u32 %v5546_v51, 16  ;;  %v524_v5 = vrot.slane %v522_v56, 7  ;;  %v533_v6 = vshll.u32 %v5546_v51, 16  ;;  %v857_v34 = vld [vmem:[#allocation2 + $0x24] sm:$0xf] }
  0x23   : > { %v1025_v0 = vsel %vm5935_vm12, %v1020_v52, %v1024_v35  ;;  %v552_v10 = vor.u32 %v550_v50, %v549_v60  ;;  %v554_v11 = vrot.slane %v549_v60, 4  ;;  %v851_v12 = vsel %vm5942_vm13, %v544_v58, %v850_v55  ;;  %v305_v40 = vld [vmem:[#allocation2 + $0x3c] sm:$0x1]  ;;  %v861_v48 = vld [vmem:[#allocation2 + $0x2c] sm:$0x1]  ;;  %s5817_s13 = smov 40  }
  0x24   : > { %v1035_v3 = vsel %vm5935_vm12, %v1030_v53, %v1034_v37  ;;  %852 = vst [vmem:[#allocation2 + $0x18] sm:$0xf] %v851_v12  ;;  %v527_v15 = vor.u32 %v525_v57, %v524_v5  ;;  %v528_v16 = vrot.slane %v524_v5, 4  ;;  %v532_v17 = vrot.slane %v530_v61, 7  ;;  %s5818_s16 = smov 64   ;;  %s5819_s19 = smov 32  }
  0x25   : > { %v5353_v9 = vcombine.low %v1025_v0, %v1035_v3  ;;  %v5549_v18 = vpack.c.bf16 %v395_v62, %v395_v62  ;;  %v553_v20 = vsel %vm5953_vm14, %v545_v59, %v552_v10  ;;  %v5550_v21 = vpack.c.bf16 %v396_v7, %v396_v7  ;;  %s5820_s22 = smov 56  }
  0x26   : > { %v855_v23 = vsel %vm5874_vm3, %v554_v11, %v854_v8  ;;  %v303_v24 = vsel %vm5874_vm3, 0, %v302_v63  ;;  %853 = vst.msk [vmem:[#allocation2 + $0x1c] sm:$0xf] %vm280_vm0, %v553_v20  ;;  %v535_v26 = vor.u32 %v533_v6, %v532_v17  ;;  %v537_v27 = vrot.slane %v532_v17, 4 }
  0x27   : > { %1723 = vrot.lane.b32.xlu0 %v5353_v9, %s5814_s8  ;;  %v844_v28 = vsel %vm5942_vm13, %v527_v15, %v843_v13  ;;  %v556_v29 = vshrl.u32 %v5549_v18, 16  ;;  %856 = vst [vmem:[#allocation2 + $0x20] sm:$0x1] %v855_v23  ;;  %304 = vst [vmem:[#allocation2 + $0x30] sm:$0x1] %v303_v24  ;;  %v559_v31 = vshll.u32 %v5549_v18, 16  ;;  %v5551_v35 = vpack.c.bf16 %v397_v19, %v397_v19 }
  0x28   : > { %845 = vst [vmem:[#allocation2 + $0xc] sm:$0xf] %v844_v28  ;;  %v564_v32 = vshrl.u32 %v5550_v21, 16  ;;  %v567_v33 = vshll.u32 %v5550_v21, 16  ;;  %v536_v36 = vsel %vm5953_vm14, %v528_v16, %v535_v26  ;;  %v848_v38 = vsel %vm5874_vm3, %v537_v27, %v847_v22 }
  0x29   : > { %v558_v37 = vrot.slane %v556_v29, 7  ;;  %v5976_v39 = vpack.c.bf16 %v398_v25, %v398_v25  ;;  %846 = vst.msk [vmem:[#allocation2 + $0x10] sm:$0xf] %vm280_vm0, %v536_v36  ;;  %849 = vst [vmem:[#allocation2 + $0x14] sm:$0x1] %v848_v38  ;;  %v573_v42 = vshrl.u32 %v5551_v35, 16 }
  0x2a   : > { %v566_v41 = vrot.slane %v564_v32, 7  ;;  %v576_v43 = vshll.u32 %v5551_v35, 16  ;;  %v353_v44 = vsel %vm5889_vm5, 0, %v352_v30  ;;  %v306_v53 = vsel %vm5874_vm3, 0, %v305_v40 }
  0x2b   : > { %v561_v45 = vor.u32 %v559_v31, %v558_v37  ;;  %v562_v46 = vrot.slane %v558_v37, 4  ;;  %354 = vst [vmem:[#allocation2 + $0x38] sm:$0x1] %v353_v44  ;;  %v961_v49 = vld [vmem:[#allocation2 + $0x18] sm:$0xf]  ;;  %v5981_v52 = vrot.slane %v573_v42, 7 }
  0x2c   : > { %v569_v50 = vor.u32 %v567_v33, %v566_v41  ;;  %v571_v51 = vrot.slane %v566_v41, 4  ;;  %v1061_v55 = vshrl.u32 %v961_v49, 16  ;;  %v1064_v56 = vshll.u32 %v961_v49, 16  ;;  %307 = vst [vmem:[#allocation2 + $0x3c] sm:$0x1] %v306_v53 }
  0x2d   : > { %v858_v57 = vsel %vm5942_vm13, %v561_v45, %v857_v34  ;;  %v581_v58 = vshrl.u32 %v5976_v39, 16  ;;  %v962_v59 = vld [vmem:[#allocation2 + $0x1c] sm:$0xf]  ;;  %v578_v63 = vor.u32 %v576_v43, %v5981_v52  ;;  %v584_v0 = vshll.u32 %v5976_v39, 16 }
  0x2e   : > { %v570_v60 = vsel %vm5953_vm14, %v562_v46, %v569_v50  ;;  %859 = vst [vmem:[#allocation2 + $0x24] sm:$0xf] %v858_v57  ;;  %v963_v61 = vld [vmem:[#allocation2 + $0x20] sm:$0x1]  ;;  %v862_v62 = vsel %vm5874_vm3, %v571_v51, %v861_v48  ;;  %v5994_v3 = vcombine.low %v961_v49, %v962_v59  ;;  %v5321_v6 = vrot.slane %v961_v49, 9 }
  0x2f   : > { %v958_v5 = vld [vmem:[#allocation2 + $0xc] sm:$0xf]  ;;  %860 = vst.msk [vmem:[#allocation2 + $0x28] sm:$0xf] %vm280_vm0, %v570_v60  ;;  %v1463_v7 = vrot.slane %v962_v59, 5  ;;  %v579_v8 = vrot.slane %v5981_v52, 4 }
  0x30   : > { %863 = vst [vmem:[#allocation2 + $0x2c] sm:$0x1] %v862_v62  ;;  %v1074_v9 = vshrl.u32 %v962_v59, 16  ;;  %v5320_v10 = vrot.slane %v958_v5, 9  ;;  %v1466_v11 = vrot.slane %v963_v61, 5  ;;  %v1063_v12 = vrot.slane %v1061_v55, 4  ;;  %1840 = vrot.lane.b32.xlu1 %v5994_v3, %s5815_s9 }
  0x31   : > { %v864_v13 = vld [vmem:[#allocation2 + $0x30] sm:$0xf]  ;;  %v1037_v16 = vshrl.u32 %v958_v5, 16  ;;  %v6002_v17 = vld [vmem:[#allocation2 + $0x14] sm:$0x1]  ;;  %v1066_v18 = vrot.slane %v1064_v56, 5  ;;  %v1464_v25 = vsel %vm5912_vm9, %v5321_v6, %v1463_v7 }
  0x32   : > { %v6000_v15 = vld [vmem:[#allocation2 + $0x10] sm:$0xf]  ;;  %v865_v19 = vsel %vm5942_vm13, %v578_v63, %v864_v13  ;;  %v1459_v22 = vrot.slane %v6002_v17, 5  ;;  %v1465_v23 = vrot.slane %v1463_v7, 4  ;;  %v1040_v24 = vshll.u32 %v958_v5, 16  ;;  %v399_v6 = vld [vmem:[%s5921_s29 + $0x40] sm:$0xff] }
  0x33   : > { %v6007_v20 = vcombine.low %v958_v5, %v6000_v15  ;;  %v1456_v21 = vrot.slane %v6000_v15, 5  ;;  %866 = vst [vmem:[#allocation2 + $0x30] sm:$0xf] %v865_v19  ;;  %v1067_v26 = vor.u32 %v1066_v18, %v1063_v12  ;;  %v1070_v27 = vshll.u32 %v962_v59, 16  ;;  %v5764_v7 = vld [vmem:[%s8714_s1] sm:$0xff]  }
  0x34   : > { %v1050_v28 = vshrl.u32 %v6000_v15, 16  ;;  %v1076_v31 = vrot.slane %v1074_v9, 4  ;;  %v1080_v35 = vshll.u32 %v963_v61, 16  ;;  %v1039_v36 = vrot.slane %v1037_v16, 4  ;;  %5651 = vmatprep.subr.bf16.mxu0 %v5764_v7 }
  0x35   : > { %1838 = vrot.lane.b32.xlu0 %v6007_v20, %s5815_s9  ;;  %v1457_v29 = vsel %vm5912_vm9, %v5320_v10, %v1456_v21  ;;  %v1458_v30 = vrot.slane %v1456_v21, 4  ;;  %v964_v32 = vld [vmem:[#allocation2 + $0x24] sm:$0xf]  ;;  %v6018_v33 = vrot.slane %v1067_v26, 4  ;;  %v1072_v34 = vrot.slane %v1070_v27, 5  ;;  %5652 = vmatpush3.bf16.msra.mxu0 %v5764_v7 }
  0x36   : > { %v965_v37 = vld [vmem:[#allocation2 + $0x28] sm:$0xf]  ;;  %v1085_v38 = vshrl.u32 %v964_v32, 16  ;;  %v1088_v40 = vshll.u32 %v964_v32, 16  ;;  %v1467_v42 = vsel %vm5912_vm9, %v1465_v23, %v1466_v11  ;;  %v1042_v48 = vrot.slane %v1040_v24, 5 }
  0x37   : > { %v1460_v41 = vsel %vm5912_vm9, %v1458_v30, %v1459_v22  ;;  %v966_v43 = vld [vmem:[#allocation2 + $0x2c] sm:$0x1]  ;;  %v1098_v44 = vshrl.u32 %v965_v37, 16  ;;  %v6024_v45 = vcombine.low %v964_v32, %v965_v37  ;;  %v5322_v49 = vrot.slane %v964_v32, 9 }
  0x38   : > { %v5370_v46 = vcombine.low %v1457_v29, %v1460_v41  ;;  %v1470_v50 = vrot.slane %v965_v37, 5  ;;  %v1473_v51 = vrot.slane %v966_v43, 5  ;;  %v1077_v53 = vor.u32 %v1076_v31, %v1072_v34 }
  0x39   : > { %1943 = vrot.lane.b32.xlu0 %v5994_v3, %s5816_s10  ;;  %1945 = vrot.lane.b32.xlu1 %v6024_v45, %s5816_s10  ;;  %v1082_v55 = vrot.slane %v1080_v35, 5  ;;  %v1087_v56 = vrot.slane %v1085_v38, 4  ;;  %v1090_v57 = vrot.slane %v1088_v40, 5  ;;  %v1094_v59 = vshll.u32 %v965_v37, 16  ;;  %v868_v37 = vld [vmem:[#allocation2 + $0x38] sm:$0x1] }
  0x3a   : > { %v6030_v60 = vcombine.low %v1464_v25, %v1467_v42  ;;  %v1472_v61 = vrot.slane %v1470_v50, 4  ;;  %v1078_v62 = vrot.slane %v1077_v53, 4  ;;  %v1100_v63 = vrot.slane %v1098_v44, 4  ;;  %v6032_v5 = vld [vmem:[#allocation2 + $0x30] sm:$0xf]  ;;  %v5765_v25 = vld [vmem:[%s8714_s1 + $0x8] sm:$0xff]  }
  0x3b   : > { %v1091_v9 = vor.u32 %v1090_v57, %v1087_v56  ;;  %v1096_v10 = vrot.slane %v1094_v59, 5  ;;  %v1104_v11 = vshll.u32 %v966_v43, 16  ;;  %v1043_v12 = vor.u32 %v1042_v48, %v1039_v36  ;;  %5653 = vmatprep.subr.bf16.mxu0 %v5765_v25  ;;  %v355_v42 = vld [vmem:[#allocation2 + $0x44] sm:$0x1]  ;;  %v5766_v43 = vld [vmem:[%s8714_s1 + $0x10] sm:$0xff]   ;;  %v402_v56 = vld [vmem:[%s5921_s29 + $0x58] sm:$0xff] }
  0x3c   : > { %v1471_v13 = vsel %vm5912_vm9, %v5322_v49, %v1470_v50  ;;  %v1073_v16 = vsel %vm5935_vm12, %v6018_v33, %v1072_v34  ;;  %v1046_v18 = vshll.u32 %v6000_v15, 16  ;;  %v1052_v19 = vrot.slane %v1050_v28, 4  ;;  %5654 = vmatpush3.bf16.msra.mxu0 %v5765_v25  ;;  %v308_v53 = vld [vmem:[#allocation2 + $0x48] sm:$0x1] }
  0x3d   : > { %1908 = vrot.lane.b32.xlu0 %v5370_v46, %s5817_s13  ;;  %1805 = vrot.lane.b32.xlu1 %v5370_v46, %s5813_s30  ;;  %v1474_v21 = vsel %vm5912_vm9, %v1472_v61, %v1473_v51  ;;  %v1083_v22 = vsel %vm5935_vm12, %v1078_v62, %v1082_v55  ;;  %v1092_v23 = vrot.slane %v1091_v9, 4  ;;  %v1101_v24 = vor.u32 %v1100_v63, %v1096_v10  ;;  %v401_v55 = vld [vmem:[%s5921_s29 + $0x50] sm:$0xff]  ;;  %v5768_v9 = vld [vmem:[%s8714_s1 + $0x18] sm:$0xff]  }
  0x3e   : > { %v1106_v26 = vrot.slane %v1104_v11, 5  ;;  %v1044_v15 = vrot.slane %v1043_v12, 4  ;;  %v1048_v27 = vrot.slane %v1046_v18, 5  ;;  %v1056_v28 = vshll.u32 %v6002_v17, 16  ;;  %v400_v17 = vld [vmem:[%s5921_s29 + $0x48] sm:$0xff]  ;;  %5655 = vmatprep.subr.bf16.mxu0 %v5766_v43 }
  0x3f   : > { %v1102_v29 = vrot.slane %v1101_v24, 4  ;;  %v583_v30 = vrot.slane %v581_v58, 7  ;;  %v1109_v31 = vshrl.u32 %v6032_v5, 16  ;;  %v5553_v32 = vpack.c.bf16 %v399_v6, %v399_v6  ;;  %v358_v61 = vld [vmem:[#allocation2 + $0x50] sm:$0x1] }
  0x40   : > { %v6059_v33 = vcombine.low %v1471_v13, %v1474_v21  ;;  %v6061_v34 = vcombine.low %v1073_v16, %v1083_v22  ;;  %v1053_v35 = vor.u32 %v1052_v19, %v1048_v27  ;;  %v1058_v36 = vrot.slane %v1056_v28, 5  ;;  %5656 = vmatpush3.bf16.msra.mxu0 %v5766_v43  ;;  %v871_v11 = vld [vmem:[#allocation2 + $0x3c] sm:$0xf]  ;;  %v311_v18 = vld [vmem:[#allocation2 + $0x54] sm:$0x1] }
  0x41   : > { %2013 = vrot.lane.b32.xlu0 %v6030_v60, %s5818_s16  ;;  %1910 = vrot.lane.b32.xlu1 %v6030_v60, %s5817_s13  ;;  %v1097_v58 = vsel %vm5935_vm12, %v1092_v23, %v1096_v10  ;;  %v1107_v38 = vsel %vm5935_vm12, %v1102_v29, %v1106_v26  ;;  %v586_v40 = vor.u32 %v584_v0, %v583_v30  ;;  %v588_v41 = vrot.slane %v583_v30, 4  ;;  %v361_v24 = vld [vmem:[#allocation2 + $0x5c] sm:$0x1] }
  0x42   : > { %v1049_v44 = vsel %vm5935_vm12, %v1044_v15, %v1048_v27  ;;  %v1054_v46 = vrot.slane %v1053_v35, 4  ;;  %v1112_v48 = vshll.u32 %v6032_v5, 16  ;;  %v6078_v49 = vrot.slane %v1109_v31, 4  ;;  %5657 = vmatprep.subr.bf16.mxu0 %v5768_v9  ;;  %v314_v27 = vld [vmem:[#allocation2 + $0x60] sm:$0x1] }
  0x43   : > { %v587_v39 = vsel %vm5953_vm14, %v579_v8, %v586_v40  ;;  %v869_v0 = vsel %vm5874_vm3, %v588_v41, %v868_v37  ;;  %v5554_v50 = vpack.c.bf16 %v400_v17, %v400_v17  ;;  %v590_v51 = vshrl.u32 %v5553_v32, 16 }
  0x44   : > { %v6090_v57 = vcombine.low %v1097_v58, %v1107_v38  ;;  %v1059_v52 = vsel %vm5935_vm12, %v1054_v46, %v1058_v36  ;;  %867 = vst.msk [vmem:[#allocation2 + $0x34] sm:$0xf] %vm280_vm0, %v587_v39  ;;  %870 = vst [vmem:[#allocation2 + $0x38] sm:$0x1] %v869_v0  ;;  %v593_v8 = vshll.u32 %v5553_v32, 16  ;;  %v356_v59 = vsel %vm5889_vm5, 0, %v355_v42  ;;  %5658 = vmatpush3.bf16.msra.mxu0 %v5768_v9 }
  0x45   : > { %2015 = vrot.lane.b32.xlu0 %v6059_v33, %s5818_s16  ;;  %1875 = vrot.lane.b32.xlu1 %v6061_v34, %s5819_s19  ;;  %v5354_v62 = vcombine.low %v1049_v44, %v1059_v52  ;;  %v592_v63 = vrot.slane %v590_v51, 7  ;;  %v598_v6 = vshrl.u32 %v5554_v50, 16  ;;  %v601_v7 = vshll.u32 %v5554_v50, 16  ;;  %357 = vst [vmem:[#allocation2 + $0x44] sm:$0x1] %v356_v59  ;;  %v403_v32 = vld [vmem:[%s5921_s29 + $0x60] sm:$0xff] }
  0x46   : > { %v1114_v10 = vrot.slane %v1112_v48, 5  ;;  %v309_v12 = vsel %vm5874_vm3, 0, %v308_v53  ;;  %v5555_v13 = vpack.c.bf16 %v401_v55, %v401_v55  ;;  %v5556_v16 = vpack.c.bf16 %v402_v56, %v402_v56  ;;  %v404_v56 = vld [vmem:[%s5921_s29 + $0x68] sm:$0xff] }
  0x47   : > { %v595_v19 = vor.u32 %v593_v8, %v592_v63  ;;  %v596_v21 = vrot.slane %v592_v63, 4  ;;  %v600_v22 = vrot.slane %v598_v6, 7  ;;  %310 = vst [vmem:[#allocation2 + $0x48] sm:$0x1] %v309_v12  ;;  %v359_v23 = vsel %vm5889_vm5, 0, %v358_v61 }
  0x48   : > { %v607_v25 = vshrl.u32 %v5555_v13, 16  ;;  %v610_v26 = vshll.u32 %v5555_v13, 16  ;;  %v615_v15 = vshrl.u32 %v5556_v16, 16  ;;  %360 = vst [vmem:[#allocation2 + $0x50] sm:$0x1] %v359_v23  ;;  %v312_v31 = vsel %vm5874_vm3, 0, %v311_v18 }
  0x49   : > { %1725 = vrot.lane.b32.xlu0 %v5354_v62, %s5814_s8  ;;  %1980 = vrot.lane.b32.xlu1 %v6090_v57, %s5820_s22  ;;  %v603_v28 = vor.u32 %v601_v7, %v600_v22  ;;  %v605_v29 = vrot.slane %v600_v22, 4  ;;  %v872_v30 = vsel %vm5942_vm13, %v595_v19, %v871_v11  ;;  %v618_v37 = vshll.u32 %v5556_v16, 16  ;;  %313 = vst [vmem:[#allocation2 + $0x54] sm:$0x1] %v312_v31 }
  0x4a   : > { %873 = vst [vmem:[#allocation2 + $0x3c] sm:$0xf] %v872_v30  ;;  %v609_v35 = vrot.slane %v607_v25, 7  ;;  %v617_v36 = vrot.slane %v615_v15, 7  ;;  %v1115_v38 = vor.u32 %v1114_v10, %v6078_v49  ;;  %v362_v41 = vsel %vm5889_vm5, 0, %v361_v24 }
  0x4b   : > { %v6114_v17 = vld [vmem:[#allocation2 + $0x34] sm:$0xf]  ;;  %v6116_v58 = vld [vmem:[#allocation2 + $0x38] sm:$0x1]  ;;  %v604_v40 = vsel %vm5953_vm14, %v596_v21, %v603_v28  ;;  %v315_v42 = vsel %vm5874_vm3, 0, %v314_v27  ;;  %v5557_v48 = vpack.c.bf16 %v403_v32, %v403_v32  ;;  %v5558_v12 = vpack.c.bf16 %v404_v56, %v404_v56 }
  0x4c   : > { %v1122_v43 = vshrl.u32 %v6114_v17, 16  ;;  %v1118_v44 = vshll.u32 %v6114_v17, 16  ;;  %874 = vst.msk [vmem:[#allocation2 + $0x40] sm:$0xf] %vm280_vm0, %v604_v40  ;;  %v875_v46 = vld [vmem:[#allocation2 + $0x44] sm:$0x1]  ;;  %v612_v0 = vor.u32 %v610_v26, %v609_v35  ;;  %v620_v8 = vor.u32 %v618_v37, %v617_v36 }
  0x4d   : > { %1873 = vrot.lane.b32.xlu0 %v5354_v62, %s5819_s19  ;;  %363 = vst [vmem:[#allocation2 + $0x5c] sm:$0x1] %v362_v41  ;;  %316 = vst [vmem:[#allocation2 + $0x60] sm:$0x1] %v315_v42  ;;  %1727 = vrot.lane.b32.xlu1 %v6061_v34, %s5814_s8  ;;  %v1128_v49 = vshll.u32 %v6116_v58, 16  ;;  %v876_v39 = vsel %vm5874_vm3, %v605_v29, %v875_v46  ;;  %v613_v53 = vrot.slane %v609_v35, 4 }
  0x4e   : > { %v1120_v50 = vrot.slane %v1118_v44, 5  ;;  %v1124_v51 = vrot.slane %v1122_v43, 4  ;;  %877 = vst [vmem:[#allocation2 + $0x44] sm:$0x1] %v876_v39  ;;  %v878_v55 = vld [vmem:[#allocation2 + $0x48] sm:$0xf]  ;;  %v6158_v24 = vcombine.low %v6032_v5, %v6114_v17 }
  0x4f   : > { %v1116_v52 = vrot.slane %v1115_v38, 4  ;;  %v622_v59 = vrot.slane %v617_v36, 4  ;;  %v882_v61 = vld [vmem:[#allocation2 + $0x50] sm:$0x1]  ;;  %v1477_v63 = vrot.slane %v6114_v17, 5  ;;  %v879_v6 = vsel %vm5942_vm13, %v612_v0, %v878_v55 }
  0x50   : > { %v1125_v62 = vor.u32 %v1124_v51, %v1120_v50  ;;  %v624_v7 = vshrl.u32 %v5557_v48, 16  ;;  %v1130_v9 = vrot.slane %v1128_v49, 5  ;;  %v621_v11 = vsel %vm5953_vm14, %v613_v53, %v620_v8  ;;  %880 = vst [vmem:[#allocation2 + $0x48] sm:$0xf] %v879_v6  ;;  %v405_v42 = vld [vmem:[%s5921_s29 + $0x70] sm:$0xff] }
  0x51   : > { %1978 = vrot.lane.b32.xlu0 %v6061_v34, %s5820_s22  ;;  %1729 = vrot.lane.b32.xlu1 %v6090_v57, %s5814_s8  ;;  %v6142_v10 = vld [vmem:[#allocation2 + $0x3c] sm:$0xf]  ;;  %v883_v34 = vsel %vm5874_vm3, %v622_v59, %v882_v61  ;;  %881 = vst.msk [vmem:[#allocation2 + $0x4c] sm:$0xf] %vm280_vm0, %v621_v11  ;;  %v627_v19 = vshll.u32 %v5557_v48, 16  ;;  %v5323_v21 = vrot.slane %v6032_v5, 9  ;;  %v1121_v27 = vsel %vm5935_vm12, %v1116_v52, %v1120_v50 }
  0x52   : > { %v1126_v13 = vrot.slane %v1125_v62, 4  ;;  %v1133_v16 = vshrl.u32 %v6142_v10, 16  ;;  %v1136_v18 = vshll.u32 %v6142_v10, 16  ;;  %884 = vst [vmem:[#allocation2 + $0x50] sm:$0x1] %v883_v34  ;;  %v626_v23 = vrot.slane %v624_v7, 7 }
  0x53   : > { %v6152_v22 = vld [vmem:[#allocation2 + $0x40] sm:$0xf]  ;;  %v1479_v25 = vrot.slane %v1477_v63, 4  ;;  %v1480_v26 = vrot.slane %v6116_v58, 5  ;;  %v632_v29 = vshrl.u32 %v5558_v12, 16  ;;  %v1478_v38 = vsel %vm5912_vm9, %v5323_v21, %v1477_v63  ;;  %v406_v50 = vld [vmem:[%s5921_s29 + $0x78] sm:$0xff] }
  0x54   : > { %v1146_v15 = vshrl.u32 %v6152_v22, 16  ;;  %v1131_v28 = vsel %vm5935_vm12, %v1126_v13, %v1130_v9  ;;  %v885_v5 = vld [vmem:[#allocation2 + $0x54] sm:$0xf]  ;;  %v1135_v30 = vrot.slane %v1133_v16, 4  ;;  %v1138_v31 = vrot.slane %v1136_v18, 5 }
  0x55   : > { %1807 = vrot.lane.b32.xlu0 %v6030_v60, %s5813_s30  ;;  %1809 = vrot.lane.b32.xlu1 %v6059_v33, %s5813_s30  ;;  %v1142_v60 = vshll.u32 %v6152_v22, 16  ;;  %v629_v35 = vor.u32 %v627_v19, %v626_v23  ;;  %v6169_v36 = vld [vmem:[#allocation2 + $0x44] sm:$0x1]  ;;  %v6177_v58 = vcombine.low %v1121_v27, %v1131_v28  ;;  %v1481_v40 = vsel %vm5912_vm9, %v1479_v25, %v1480_v26  ;;  %v889_v59 = vld [vmem:[#allocation2 + $0x5c] sm:$0x1] }
  0x56   : > { %v1148_v32 = vrot.slane %v1146_v15, 4  ;;  %v635_v41 = vshll.u32 %v5558_v12, 16  ;;  %v1139_v43 = vor.u32 %v1138_v31, %v1135_v30  ;;  %v1152_v46 = vshll.u32 %v6169_v36, 16  ;;  %v364_v12 = vld [vmem:[#allocation2 + $0x68] sm:$0x1]  ;;  %v407_v26 = vld [vmem:[%s5921_s29 + $0x80] sm:$0xff] }
  0x57   : > { %v1144_v37 = vrot.slane %v1142_v60, 5  ;;  %v886_v17 = vsel %vm5942_vm13, %v629_v35, %v885_v5  ;;  %v634_v48 = vrot.slane %v632_v29, 7  ;;  %v630_v49 = vrot.slane %v626_v23, 4  ;;  %v317_v21 = vld [vmem:[#allocation2 + $0x6c] sm:$0x1] }
  0x58   : > { %887 = vst [vmem:[#allocation2 + $0x54] sm:$0xf] %v886_v17  ;;  %v5559_v39 = vpack.c.bf16 %v405_v42, %v405_v42  ;;  %v6189_v0 = vcombine.low %v1478_v38, %v1481_v40  ;;  %v1140_v51 = vrot.slane %v1139_v43, 4  ;;  %v1154_v55 = vrot.slane %v1152_v46, 5  ;;  %v6211_v11 = vld [vmem:[#allocation2 + $0x4c] sm:$0xf] }
  0x59   : > { %1842 = vrot.lane.b32.xlu0 %v6024_v45, %s5815_s9  ;;  %1844 = vrot.lane.b32.xlu1 %v6158_v24, %s5815_s9  ;;  %v1149_v44 = vor.u32 %v1148_v32, %v1144_v37  ;;  %v637_v56 = vor.u32 %v635_v41, %v634_v48  ;;  %v1484_v52 = vrot.slane %v6152_v22, 5  ;;  %v639_v8 = vrot.slane %v634_v48, 4  ;;  %v408_v15 = vld [vmem:[%s5921_s29 + $0x88] sm:$0xff]  ;;  %v892_v29 = vld [vmem:[#allocation2 + $0x60] sm:$0xf] }
  0x5a   : > { %v5560_v62 = vpack.c.bf16 %v406_v50, %v406_v50  ;;  %v641_v63 = vshrl.u32 %v5559_v39, 16  ;;  %v6203_v6 = vcombine.low %v6142_v10, %v6152_v22  ;;  %v1145_v7 = vsel %vm5935_vm12, %v1140_v51, %v1144_v37  ;;  %v6238_v40 = vld [vmem:[#allocation2 + $0x50] sm:$0x1] }
  0x5b   : > { %v1150_v53 = vrot.slane %v1149_v44, 4  ;;  %v638_v61 = vsel %vm5953_vm14, %v630_v49, %v637_v56  ;;  %v5324_v9 = vrot.slane %v6142_v10, 9  ;;  %v890_v34 = vsel %vm5874_vm3, %v639_v8, %v889_v59  ;;  %v367_v59 = vld [vmem:[#allocation2 + $0x74] sm:$0x1] }
  0x5c   : > { %888 = vst.msk [vmem:[#allocation2 + $0x58] sm:$0xf] %vm280_vm0, %v638_v61  ;;  %v1486_v13 = vrot.slane %v1484_v52, 4  ;;  %v1487_v16 = vrot.slane %v6169_v36, 5  ;;  %891 = vst [vmem:[#allocation2 + $0x5c] sm:$0x1] %v890_v34  ;;  %v5561_v37 = vpack.c.bf16 %v407_v26, %v407_v26  ;;  %v5562_v17 = vpack.c.bf16 %v408_v15, %v408_v15 }
  0x5d   : > { %1877 = vrot.lane.b32.xlu0 %v6090_v57, %s5819_s19  ;;  %1879 = vrot.lane.b32.xlu1 %v6177_v58, %s5819_s19  ;;  %v6195_v57 = vld [vmem:[#allocation2 + $0x48] sm:$0xf]  ;;  %v643_v19 = vrot.slane %v641_v63, 7  ;;  %v644_v22 = vshll.u32 %v5559_v39, 16  ;;  %v649_v23 = vshrl.u32 %v5560_v62, 16  ;;  %v652_v25 = vshll.u32 %v5560_v62, 16 }
  0x5e   : > { %v1157_v18 = vshrl.u32 %v6195_v57, 16  ;;  %v1160_v10 = vshll.u32 %v6195_v57, 16  ;;  %v1170_v28 = vshrl.u32 %v6211_v11, 16  ;;  %v1166_v60 = vshll.u32 %v6211_v11, 16 }
  0x5f   : > { %v365_v5 = vsel %vm5889_vm5, 0, %v364_v12  ;;  %v646_v30 = vor.u32 %v644_v22, %v643_v19  ;;  %v647_v31 = vrot.slane %v643_v19, 4  ;;  %v651_v32 = vrot.slane %v649_v23, 7  ;;  %v6260_v34 = vld [vmem:[#allocation2 + $0x54] sm:$0xf]  ;;  %v410_v22 = vld [vmem:[%s5921_s29 + $0x98] sm:$0xff] }
  0x60   : > { %366 = vst [vmem:[#allocation2 + $0x68] sm:$0x1] %v365_v5  ;;  %v318_v35 = vsel %vm5874_vm3, 0, %v317_v21  ;;  %v1485_v36 = vsel %vm5912_vm9, %v5324_v9, %v1484_v52  ;;  %v1488_v38 = vsel %vm5912_vm9, %v1486_v13, %v1487_v16  ;;  %v1159_v41 = vrot.slane %v1157_v18, 4  ;;  %v409_v9 = vld [vmem:[%s5921_s29 + $0x90] sm:$0xff] }
  0x61   : > { %1912 = vrot.lane.b32.xlu0 %v6059_v33, %s5817_s13  ;;  %1914 = vrot.lane.b32.xlu1 %v6189_v0, %s5817_s13  ;;  %v1155_v33 = vsel %vm5935_vm12, %v1150_v53, %v1154_v55  ;;  %319 = vst [vmem:[#allocation2 + $0x6c] sm:$0x1] %v318_v35  ;;  %v654_v42 = vor.u32 %v652_v25, %v651_v32  ;;  %v1162_v44 = vrot.slane %v1160_v10, 5  ;;  %v6244_v46 = vrot.slane %v1166_v60, 5 }
  0x62   : > { %v6224_v27 = vcombine.low %v1145_v7, %v1155_v33  ;;  %v893_v43 = vsel %vm5942_vm13, %v646_v30, %v892_v29  ;;  %v1172_v48 = vrot.slane %v1170_v28, 4  ;;  %v656_v49 = vrot.slane %v651_v32, 4  ;;  %v320_v33 = vld [vmem:[#allocation2 + $0x78] sm:$0x1] }
  0x63   : > { %894 = vst [vmem:[#allocation2 + $0x60] sm:$0xf] %v893_v43  ;;  %v655_v39 = vsel %vm5953_vm14, %v647_v31, %v654_v42  ;;  %v658_v50 = vshrl.u32 %v5561_v37, 16  ;;  %v661_v51 = vshll.u32 %v5561_v37, 16  ;;  %v666_v53 = vshrl.u32 %v5562_v17, 16 }
  0x64   : > { %v1176_v55 = vshll.u32 %v6238_v40, 16  ;;  %895 = vst.msk [vmem:[#allocation2 + $0x64] sm:$0xf] %vm280_vm0, %v655_v39  ;;  %v6252_v56 = vcombine.low %v1485_v36, %v1488_v38  ;;  %v1163_v61 = vor.u32 %v1162_v44, %v1159_v41  ;;  %v1173_v62 = vor.u32 %v1172_v48, %v6244_v46  ;;  %v6304_v39 = vld [vmem:[#allocation2 + $0x5c] sm:$0x1] }
  0x65   : > { %1947 = vrot.lane.b32.xlu0 %v6158_v24, %s5816_s10  ;;  %1949 = vrot.lane.b32.xlu1 %v6203_v6, %s5816_s10  ;;  %v660_v52 = vrot.slane %v658_v50, 7  ;;  %v6254_v8 = vrot.slane %v666_v53, 7  ;;  %v669_v7 = vshll.u32 %v5562_v17, 16  ;;  %v1491_v21 = vrot.slane %v6211_v11, 5 }
  0x66   : > { %v1178_v19 = vrot.slane %v1176_v55, 5  ;;  %v368_v25 = vsel %vm5889_vm5, 0, %v367_v59  ;;  %v321_v26 = vsel %vm5874_vm3, 0, %v320_v33  ;;  %v5563_v15 = vpack.c.bf16 %v409_v9, %v409_v9  ;;  %v411_v9 = vld [vmem:[%s5921_s29 + $0xa0] sm:$0xff] }
  0x67   : > { %v896_v63 = vld [vmem:[#allocation2 + $0x68] sm:$0x1]  ;;  %v663_v13 = vor.u32 %v661_v51, %v660_v52  ;;  %v664_v16 = vrot.slane %v660_v52, 4  ;;  %v671_v10 = vor.u32 %v669_v7, %v6254_v8  ;;  %v1164_v28 = vrot.slane %v1163_v61, 4  ;;  %369 = vst [vmem:[#allocation2 + $0x74] sm:$0x1] %v368_v25 }
  0x68   : > { %v897_v12 = vsel %vm5874_vm3, %v656_v49, %v896_v63  ;;  %v899_v18 = vld [vmem:[#allocation2 + $0x6c] sm:$0xf]  ;;  %v1174_v60 = vrot.slane %v1173_v62, 4  ;;  %v1181_v29 = vshrl.u32 %v6260_v34, 16  ;;  %v1184_v5 = vshll.u32 %v6260_v34, 16 }
  0x69   : > { %1982 = vrot.lane.b32.xlu0 %v6177_v58, %s5820_s22  ;;  %1984 = vrot.lane.b32.xlu1 %v6224_v27, %s5820_s22  ;;  %898 = vst [vmem:[#allocation2 + $0x68] sm:$0x1] %v897_v12  ;;  %v900_v23 = vsel %vm5942_vm13, %v663_v13, %v899_v18  ;;  %322 = vst [vmem:[#allocation2 + $0x78] sm:$0x1] %v321_v26  ;;  %v672_v32 = vsel %vm5953_vm14, %v664_v16, %v671_v10  ;;  %v675_v36 = vshrl.u32 %v5563_v15, 16  ;;  %vm8721_vm15 = vcmask 1043456  }
  0x6a   : > { %901 = vst [vmem:[#allocation2 + $0x6c] sm:$0xf] %v900_v23  ;;  %v5564_v35 = vpack.c.bf16 %v410_v22, %v410_v22  ;;  %902 = vst.msk [vmem:[#allocation2 + $0x70] sm:$0xf] %vm280_vm0, %v672_v32  ;;  %v6290_v37 = vcombine.low %v6195_v57, %v6211_v11  ;;  %v5325_v17 = vrot.slane %v6195_v57, 9  ;;  %v1493_v38 = vrot.slane %v1491_v21, 4 }
  0x6b   : > { %v1494_v41 = vrot.slane %v6238_v40, 5  ;;  %v1169_v42 = vsel %vm5935_vm12, %v1164_v28, %v6244_v46  ;;  %v1179_v43 = vsel %vm5935_vm12, %v1174_v60, %v1178_v19  ;;  %v1186_v48 = vrot.slane %v1184_v5, 5  ;;  %v370_v19 = vld [vmem:[#allocation2 + $0x80] sm:$0x1]  ;;  %v323_v23 = vld [vmem:[#allocation2 + $0x84] sm:$0x1] }
  0x6c   : > { %v683_v44 = vshrl.u32 %v5564_v35, 16  ;;  %v673_v57 = vrot.slane %v6254_v8, 4  ;;  %v677_v40 = vrot.slane %v675_v36, 7  ;;  %v678_v50 = vshll.u32 %v5563_v15, 16  ;;  %v412_v15 = vld [vmem:[%s5921_s29 + $0xa8] sm:$0xff] }
  0x6d   : > { %2017 = vrot.lane.b32.xlu0 %v6189_v0, %s5818_s16  ;;  %1731 = vrot.lane.b32.xlu1 %v6177_v58, %s5814_s8  ;;  %v6265_v58 = vld [vmem:[#allocation2 + $0x58] sm:$0xf]  ;;  %v1492_v46 = vsel %vm5912_vm9, %v5325_v17, %v1491_v21  ;;  %v6312_v53 = vcombine.low %v1169_v42, %v1179_v43  ;;  %v1495_v55 = vsel %vm5912_vm9, %v1493_v38, %v1494_v41  ;;  %v686_v8 = vshll.u32 %v5564_v35, 16  ;;  %v373_v28 = vld [vmem:[#allocation2 + $0x8c] sm:$0x1] }
  0x6e   : > { %v1194_v30 = vshrl.u32 %v6265_v58, 16  ;;  %v1190_v31 = vshll.u32 %v6265_v58, 16  ;;  %v903_v51 = vld [vmem:[#allocation2 + $0x74] sm:$0x1]  ;;  %v6316_v52 = vrot.slane %v683_v44, 7  ;;  %v1200_v62 = vshll.u32 %v6304_v39, 16 }
  0x6f   : > { %v904_v63 = vsel %vm5874_vm3, %v673_v57, %v903_v51  ;;  %v680_v7 = vor.u32 %v678_v50, %v677_v40  ;;  %v681_v33 = vrot.slane %v677_v40, 4  ;;  %v6327_v13 = vcombine.low %v1492_v46, %v1495_v55  ;;  %v5769_v5 = vld [vmem:[%s8714_s1 + $0x20] ss:$0 sps:$4 sm:$0xff]   ;;  %v6362_v42 = vld [vmem:[#allocation2 + $0x64] sm:$0xf] }
  0x70   : > { %v6301_v11 = vrot.slane %v1190_v31, 5  ;;  %v1196_v49 = vrot.slane %v1194_v30, 4  ;;  %905 = vst [vmem:[#allocation2 + $0x74] sm:$0x1] %v904_v63  ;;  %v906_v12 = vld [vmem:[#allocation2 + $0x78] sm:$0xf]  ;;  %v688_v18 = vor.u32 %v686_v8, %v6316_v52  ;;  %v5565_v25 = vpack.c.bf16 %v411_v9, %v411_v9  ;;  %5735 = vmatprep.subr.msk.bf16.mxu0 %vm8721_vm15, %v5769_v5 }
  0x71   : > { %2019 = vrot.lane.b32.xlu0 %v6252_v56, %s5818_s16  ;;  %1733 = vrot.lane.b32.xlu1 %v6224_v27, %s5814_s8  ;;  %v1498_v16 = vrot.slane %v6265_v58, 5  ;;  %v1202_v22 = vrot.slane %v1200_v62, 5  ;;  %v5326_v60 = vrot.slane %v6260_v34, 9  ;;  %v6349_v30 = vcombine.low %v6260_v34, %v6265_v58  ;;  %v326_v34 = vld [vmem:[#allocation2 + $0x90] sm:$0x1]  ;;  %v414_v8 = vld [vmem:[%s5921_s29 + $0xb8] sm:$0xff] }
  0x72   : > { %v1197_v61 = vor.u32 %v1196_v49, %v6301_v11  ;;  %v689_v26 = vsel %vm5953_vm14, %v681_v33, %v688_v18  ;;  %v371_v31 = vsel %vm5889_vm5, 0, %v370_v19  ;;  %v324_v32 = vsel %vm5874_vm3, 0, %v323_v23  ;;  %v413_v58 = vld [vmem:[%s5921_s29 + $0xb0] sm:$0xff] }
  0x73   : > { %909 = vst.msk [vmem:[#allocation2 + $0x7c] sm:$0xf] %vm280_vm0, %v689_v26  ;;  %372 = vst [vmem:[#allocation2 + $0x80] sm:$0x1] %v371_v31  ;;  %v5566_v17 = vpack.c.bf16 %v412_v15, %v412_v15  ;;  %v692_v38 = vshrl.u32 %v5565_v25, 16  ;;  %v1501_v41 = vrot.slane %v6304_v39, 5  ;;  %v5567_v50 = vpack.c.bf16 %v413_v58, %v413_v58 }
  0x74   : > { %v1198_v10 = vrot.slane %v1197_v61, 4  ;;  %325 = vst [vmem:[#allocation2 + $0x84] sm:$0x1] %v324_v32  ;;  %v2460_v49 = vsel %vm8721_vm15, %v5769_v5, 0  ;;  %v327_v40 = vsel %vm5874_vm3, 0, %v326_v34  ;;  %v1218_v46 = vshrl.u32 %v6362_v42, 16 }
  0x75   : > { %1811 = vrot.lane.b32.xlu0 %v6189_v0, %s5813_s30  ;;  %1813 = vrot.lane.b32.xlu1 %v6252_v56, %s5813_s30  ;;  %v1183_v0 = vrot.slane %v1181_v29, 4  ;;  %v6339_v29 = vld [vmem:[#allocation2 + $0x60] sm:$0xf]  ;;  %v694_v44 = vrot.slane %v692_v38, 7  ;;  %v1214_v51 = vshll.u32 %v6362_v42, 16  ;;  %v690_v55 = vrot.slane %v6316_v52, 4 }
  0x76   : > { %v1203_v36 = vsel %vm5935_vm12, %v1198_v10, %v1202_v22  ;;  %v1205_v43 = vshrl.u32 %v6339_v29, 16  ;;  %v1208_v39 = vshll.u32 %v6339_v29, 16  ;;  %5660 = vmatpush3.bf16.msra.mxu0 %v2460_v49  ;;  %328 = vst [vmem:[#allocation2 + $0x90] sm:$0x1] %v327_v40  ;;  %v703_v61 = vshll.u32 %v5566_v17, 16 }
  0x77   : > { %v1187_v59 = vor.u32 %v1186_v48, %v1183_v0  ;;  %v374_v0 = vsel %vm5889_vm5, 0, %v373_v28  ;;  %v695_v48 = vshll.u32 %v5565_v25, 16  ;;  %v1499_v62 = vsel %vm5912_vm9, %v5326_v60, %v1498_v16  ;;  %v6394_v25 = vld [vmem:[#allocation2 + $0x68] sm:$0x1]  ;;  %v376_v15 = vld [vmem:[#allocation2 + $0x98] sm:$0x1] }
  0x78   : > { %375 = vst [vmem:[#allocation2 + $0x8c] sm:$0x1] %v374_v0  ;;  %v709_v33 = vshrl.u32 %v5567_v50, 16  ;;  %v1207_v9 = vrot.slane %v1205_v43, 4  ;;  %v1210_v52 = vrot.slane %v1208_v39, 5  ;;  %v698_v18 = vrot.slane %v694_v44, 4 }
  0x79   : > { %1846 = vrot.lane.b32.xlu0 %v6203_v6, %s5815_s9  ;;  %1848 = vrot.lane.b32.xlu1 %v6290_v37, %s5815_s9  ;;  %v1188_v21 = vrot.slane %v1187_v59, 4  ;;  %v5568_v19 = vpack.c.bf16 %v414_v8, %v414_v8  ;;  %v1220_v10 = vrot.slane %v1218_v46, 4  ;;  %v712_v23 = vshll.u32 %v5567_v50, 16  ;;  %v6400_v60 = vld [vmem:[#allocation2 + $0x6c] sm:$0xf]  ;;  %v415_v8 = vld [vmem:[%s5921_s29 + $0xc0] sm:$0xff] }
  0x7a   : > { %v711_v31 = vrot.slane %v709_v33, 7  ;;  %v329_v32 = vld [vmem:[#allocation2 + $0x9c] sm:$0x1]  ;;  %v1224_v43 = vshll.u32 %v6394_v25, 16  ;;  %v377_v39 = vsel %vm5889_vm5, 0, %v376_v15  ;;  %v1229_v50 = vshrl.u32 %v6400_v60, 16 }
  0x7b   : > { %v1193_v35 = vsel %vm5935_vm12, %v1188_v21, %v6301_v11  ;;  %v700_v11 = vshrl.u32 %v5566_v17, 16  ;;  %v6390_v21 = vrot.slane %v1214_v51, 5  ;;  %v717_v38 = vshrl.u32 %v5568_v19, 16  ;;  %378 = vst [vmem:[#allocation2 + $0x98] sm:$0x1] %v377_v39 }
  0x7c   : > { %v6373_v57 = vcombine.low %v1193_v35, %v1203_v36  ;;  %v1211_v35 = vor.u32 %v1210_v52, %v1207_v9  ;;  %v6406_v36 = vld [vmem:[#allocation2 + $0x70] sm:$0xf]  ;;  %v720_v34 = vshll.u32 %v5568_v19, 16  ;;  %v330_v40 = vsel %vm5874_vm3, 0, %v329_v32  ;;  %v6458_v32 = vld [vmem:[#allocation2 + $0x74] sm:$0x1] }
  0x7d   : > { %1881 = vrot.lane.b32.xlu0 %v6224_v27, %s5819_s19  ;;  %1883 = vrot.lane.b32.xlu1 %v6312_v53, %s5819_s19  ;;  %v907_v27 = vsel %vm5942_vm13, %v680_v7, %v906_v12  ;;  %v702_v59 = vrot.slane %v700_v11, 7  ;;  %v697_v7 = vor.u32 %v695_v48, %v694_v44  ;;  %v910_v12 = vld [vmem:[#allocation2 + $0x80] sm:$0x1]  ;;  %v920_v58 = vld [vmem:[#allocation2 + $0x90] sm:$0xf]  ;;  %v715_v11 = vrot.slane %v711_v31, 4 }
  0x7e   : > { %908 = vst [vmem:[#allocation2 + $0x78] sm:$0xf] %v907_v27  ;;  %v911_v22 = vsel %vm5874_vm3, %v690_v55, %v910_v12  ;;  %v379_v44 = vld [vmem:[#allocation2 + $0xa4] sm:$0x1]  ;;  %v332_v48 = vld [vmem:[#allocation2 + $0xa8] sm:$0x1] }
  0x7f   : > { %912 = vst [vmem:[#allocation2 + $0x80] sm:$0x1] %v911_v22  ;;  %v705_v26 = vor.u32 %v703_v61, %v702_v59  ;;  %v917_v27 = vld [vmem:[#allocation2 + $0x8c] sm:$0x1]  ;;  %v707_v5 = vrot.slane %v702_v59, 4  ;;  %v719_v49 = vrot.slane %v717_v38, 7  ;;  %v6443_v22 = vcombine.low %v6339_v29, %v6362_v42 }
  0x80   : > { %v1232_v46 = vshll.u32 %v6400_v60, 16  ;;  %v1242_v51 = vshrl.u32 %v6406_v36, 16  ;;  %331 = vst [vmem:[#allocation2 + $0x9c] sm:$0x1] %v330_v40  ;;  %v1238_v59 = vshll.u32 %v6406_v36, 16  ;;  %v1212_v9 = vrot.slane %v1211_v35, 4 }
  0x81   : > { %1916 = vrot.lane.b32.xlu0 %v6252_v56, %s5817_s13  ;;  %1918 = vrot.lane.b32.xlu1 %v6327_v13, %s5817_s13  ;;  %v1500_v56 = vrot.slane %v1498_v16, 4  ;;  %v913_v16 = vld [vmem:[#allocation2 + $0x84] sm:$0xf]  ;;  %v706_v17 = vsel %vm5953_vm14, %v698_v18, %v705_v26  ;;  %v918_v0 = vsel %vm5874_vm3, %v707_v5, %v917_v27  ;;  %v722_v61 = vor.u32 %v720_v34, %v719_v49  ;;  %v382_v33 = vld [vmem:[#allocation2 + $0xb0] sm:$0x1]  ;;  %v418_v40 = vld [vmem:[%s5921_s29 + $0xd8] sm:$0xff] }
  0x82   : > { %916 = vst.msk [vmem:[#allocation2 + $0x88] sm:$0xf] %vm280_vm0, %v706_v17  ;;  %919 = vst [vmem:[#allocation2 + $0x8c] sm:$0x1] %v918_v0  ;;  %v1226_v12 = vrot.slane %v1224_v43, 5  ;;  %v1505_v18 = vrot.slane %v6362_v42, 5 }
  0x83   : > { %v1502_v63 = vsel %vm5912_vm9, %v1500_v56, %v1501_v41  ;;  %v914_v56 = vsel %vm5942_vm13, %v697_v7, %v913_v16  ;;  %v1221_v41 = vor.u32 %v1220_v10, %v6390_v21  ;;  %v333_v7 = vsel %vm5874_vm3, 0, %v332_v48 }
  0x84   : > { %v6398_v28 = vcombine.low %v1499_v62, %v1502_v63  ;;  %915 = vst [vmem:[#allocation2 + $0x84] sm:$0xf] %v914_v56  ;;  %v416_v62 = vld [vmem:[%s5921_s29 + $0xc8] sm:$0xff]  ;;  %v380_v63 = vsel %vm5889_vm5, 0, %v379_v44  ;;  %334 = vst [vmem:[#allocation2 + $0xa8] sm:$0x1] %v333_v7  ;;  %v723_v10 = vsel %vm5953_vm14, %v715_v11, %v722_v61  ;;  %v5569_v16 = vpack.c.bf16 %v415_v8, %v415_v8 }
  0x85   : > { %1951 = vrot.lane.b32.xlu0 %v6290_v37, %s5816_s10  ;;  %1953 = vrot.lane.b32.xlu1 %v6349_v30, %s5816_s10  ;;  %v1222_v52 = vrot.slane %v1221_v41, 4  ;;  %381 = vst [vmem:[#allocation2 + $0xa4] sm:$0x1] %v380_v63  ;;  %v5327_v19 = vrot.slane %v6339_v29, 9  ;;  %923 = vst.msk [vmem:[#allocation2 + $0x94] sm:$0xf] %vm280_vm0, %v723_v10  ;;  %v6488_v61 = vcombine.low %v6400_v60, %v6406_v36 }
  0x86   : > { %v383_v26 = vsel %vm5889_vm5, 0, %v382_v33  ;;  %v1231_v27 = vrot.slane %v1229_v50, 4  ;;  %v1234_v15 = vrot.slane %v1232_v46, 5  ;;  %v6450_v5 = vrot.slane %v1238_v59, 5  ;;  %v417_v44 = vld [vmem:[%s5921_s29 + $0xd0] sm:$0xff] }
  0x87   : > { %v1244_v56 = vrot.slane %v1242_v51, 4  ;;  %384 = vst [vmem:[#allocation2 + $0xb0] sm:$0x1] %v383_v26  ;;  %v1227_v29 = vsel %vm5935_vm12, %v1222_v52, %v1226_v12  ;;  %v1507_v42 = vrot.slane %v1505_v18, 4  ;;  %v724_v35 = vrot.slane %v719_v49, 4 }
  0x88   : > { %v726_v17 = vshrl.u32 %v5569_v16, 16  ;;  %v1235_v34 = vor.u32 %v1234_v15, %v1231_v27  ;;  %v1248_v41 = vshll.u32 %v6458_v32, 16  ;;  %v1506_v43 = vsel %vm5912_vm9, %v5327_v19, %v1505_v18  ;;  %v6482_v8 = vld [vmem:[#allocation2 + $0x78] sm:$0xf]  ;;  %v927_v63 = vld [vmem:[#allocation2 + $0x9c] sm:$0xf] }
  0x89   : > { %1986 = vrot.lane.b32.xlu0 %v6312_v53, %s5820_s22  ;;  %1988 = vrot.lane.b32.xlu1 %v6373_v57, %s5820_s22  ;;  %v5571_v59 = vpack.c.bf16 %v417_v44, %v417_v44  ;;  %v5572_v7 = vpack.c.bf16 %v418_v40, %v418_v40  ;;  %v6496_v52 = vld [vmem:[#allocation2 + $0x7c] sm:$0xf]  ;;  %v1256_v26 = vshll.u32 %v6482_v8, 16  ;;  %vm2045_vm1 = vcmask 64512  }
  0x8a   : > { %v728_v11 = vrot.slane %v726_v17, 7  ;;  %v1236_v46 = vrot.slane %v1235_v34, 4  ;;  %vm2094_vm2 = vcmask 130048   ;;  %vm2127_vm4 = vcmask 195584  }
  0x8b   : > { %v934_v44 = vld [vmem:[#allocation2 + $0xa8] sm:$0xf]  ;;  %vm2160_vm6 = vcmask 261120   ;;  %vm2193_vm7 = vcmask 326656   ;;  %vm2226_vm8 = vcmask 392192   ;;  %vm2259_vm10 = vcmask 457728  }
  0x8c   : > { %v732_v18 = vrot.slane %v728_v11, 4  ;;  %v931_v10 = vld [vmem:[#allocation2 + $0xa4] sm:$0x1]  ;;  %vm2292_vm11 = vcmask 523264   ;;  %vm8722_vm15 = vcmask 588800  }
  0x8d   : > { %2021 = vrot.lane.b32.xlu0 %v6327_v13, %s5818_s16  ;;  %1735 = vrot.lane.b32.xlu1 %v6312_v53, %s5814_s8  ;;  %v714_v53 = vor.u32 %v712_v23, %v711_v31  ;;  %v5570_v23 = vpack.c.bf16 %v416_v62, %v416_v62  ;;  %v1508_v31 = vrot.slane %v6394_v25, 5  ;;  %v924_v25 = vld [vmem:[#allocation2 + $0x98] sm:$0x1]  ;;  %v5328_v62 = vrot.slane %v6400_v60, 9 }
  0x8e   : > { %v925_v48 = vsel %vm5874_vm3, %v724_v35, %v924_v25  ;;  %v1241_v60 = vsel %vm5935_vm12, %v1236_v46, %v6450_v5  ;;  %v1262_v35 = vshll.u32 %v6496_v52, 16  ;;  %v1258_v46 = vrot.slane %v1256_v26, 5 }
  0x8f   : > { %v921_v55 = vsel %vm5942_vm13, %v714_v53, %v920_v58  ;;  %v734_v38 = vshrl.u32 %v5570_v23, 16  ;;  %v1245_v58 = vor.u32 %v1244_v56, %v6450_v5  ;;  %v1509_v0 = vsel %vm5912_vm9, %v1507_v42, %v1508_v31  ;;  %926 = vst [vmem:[#allocation2 + $0x98] sm:$0x1] %v925_v48  ;;  %v385_v31 = vld [vmem:[#allocation2 + $0xbc] sm:$0x1] }
  0x90   : > { %922 = vst [vmem:[#allocation2 + $0x90] sm:$0xf] %v921_v55  ;;  %v729_v53 = vshll.u32 %v5569_v16, 16  ;;  %v737_v39 = vshll.u32 %v5570_v23, 16  ;;  %v6480_v50 = vcombine.low %v1506_v43, %v1509_v0  ;;  %v1250_v55 = vrot.slane %v1248_v41, 5 }
  0x91   : > { %2023 = vrot.lane.b32.xlu0 %v6398_v28, %s5818_s16  ;;  %1737 = vrot.lane.b32.xlu1 %v6373_v57, %s5814_s8  ;;  %v736_v49 = vrot.slane %v734_v38, 7  ;;  %v1246_v51 = vrot.slane %v1245_v58, 4  ;;  %v1253_v16 = vshrl.u32 %v6482_v8, 16  ;;  %v743_v56 = vshrl.u32 %v5571_v59, 16  ;;  %v419_v58 = vld [vmem:[%s5921_s29 + $0xe0] sm:$0xff] }
  0x92   : > { %v731_v12 = vor.u32 %v729_v53, %v728_v11  ;;  %v751_v42 = vshrl.u32 %v5572_v7, 16  ;;  %v754_v38 = vshll.u32 %v5572_v7, 16  ;;  %v1515_v0 = vrot.slane %v6458_v32, 5 }
  0x93   : > { %v739_v19 = vor.u32 %v737_v39, %v736_v49  ;;  %v741_v23 = vrot.slane %v736_v49, 4  ;;  %v745_v17 = vrot.slane %v743_v56, 7  ;;  %v386_v39 = vsel %vm5889_vm5, 0, %v385_v31 }
  0x94   : > { %v928_v15 = vsel %vm5942_vm13, %v731_v12, %v927_v63  ;;  %v753_v53 = vrot.slane %v751_v42, 7  ;;  %v1255_v40 = vrot.slane %v1253_v16, 4  ;;  %v5573_v63 = vpack.c.bf16 %v419_v58, %v419_v58  ;;  %387 = vst [vmem:[#allocation2 + $0xbc] sm:$0x1] %v386_v39  ;;  %v5799_v42 = vld [vmem:[#allocation2 + $0x4] sm:$0xf] }
  0x95   : > { %1815 = vrot.lane.b32.xlu0 %v6327_v13, %s5813_s30  ;;  %1817 = vrot.lane.b32.xlu1 %v6398_v28, %s5813_s30  ;;  %v1217_v13 = vsel %vm5935_vm12, %v1212_v9, %v6390_v21  ;;  %v1512_v9 = vrot.slane %v6406_v36, 5  ;;  %v335_v36 = vld [vmem:[#allocation2 + $0xb4] sm:$0x1]  ;;  %v740_v27 = vsel %vm5953_vm14, %v732_v18, %v739_v19  ;;  %929 = vst [vmem:[#allocation2 + $0x9c] sm:$0xf] %v928_v15  ;;  %v749_v49 = vrot.slane %v745_v17, 4 }
  0x96   : > { %v6464_v21 = vcombine.low %v1217_v13, %v1227_v29  ;;  %v1266_v13 = vshrl.u32 %v6496_v52, 16  ;;  %930 = vst.msk [vmem:[#allocation2 + $0xa0] sm:$0xf] %vm280_vm0, %v740_v27  ;;  %v932_v5 = vsel %vm5874_vm3, %v741_v23, %v931_v10  ;;  %v746_v29 = vshll.u32 %v5571_v59, 16  ;;  %v420_v59 = vld [vmem:[%s5921_s29 + $0xe8] sm:$0xff] }
  0x97   : > { %933 = vst [vmem:[#allocation2 + $0xa4] sm:$0x1] %v932_v5  ;;  %v336_v34 = vsel %vm5874_vm3, 0, %v335_v36  ;;  %v1514_v43 = vrot.slane %v1512_v9, 4  ;;  %v6535_v32 = vrot.slane %v1262_v35, 5  ;;  %v758_v12 = vrot.slane %v753_v53, 4 }
  0x98   : > { %337 = vst [vmem:[#allocation2 + $0xb4] sm:$0x1] %v336_v34  ;;  %v748_v11 = vor.u32 %v746_v29, %v745_v17  ;;  %v1268_v7 = vrot.slane %v1266_v13, 4  ;;  %v1513_v19 = vsel %vm5912_vm9, %v5328_v62, %v1512_v9  ;;  %v6554_v36 = vpack.c.bf16 %v420_v59, %v420_v59  ;;  %v6566_v13 = vld [vmem:[#allocation2 + $0x84] sm:$0xf] }
  0x99   : > { %1850 = vrot.lane.b32.xlu0 %v6349_v30, %s5815_s9  ;;  %1852 = vrot.lane.b32.xlu1 %v6443_v22, %s5815_s9  ;;  %v6493_v33 = vpop.permute.xlu0 %1723  ;;  %v1516_v10 = vsel %vm5912_vm9, %v1514_v43, %v1515_v0  ;;  %v1259_v62 = vor.u32 %v1258_v46, %v1255_v40  ;;  %v760_v9 = vshrl.u32 %v5573_v63, 16  ;;  %v338_v5 = vld [vmem:[#allocation2 + $0xc0] sm:$0x1]  ;;  %v6570_v17 = vld [vmem:[#allocation2 + $0x88] sm:$0xf]  ;;  %v1519_v43 = vrot.slane %v6496_v52, 5 }
  0x9a   : > { %v935_v18 = vsel %vm5942_vm13, %v748_v11, %v934_v44  ;;  %v6560_v27 = vcombine.low %v1513_v19, %v1516_v10  ;;  %v1269_v15 = vor.u32 %v1268_v7, %v6535_v32  ;;  %v5798_v29 = vld [vmem:[#allocation2] sm:$0xf]  ;;  %v1277_v11 = vshrl.u32 %v6566_v13, 16  ;;  %v421_v7 = vld [vmem:[%s5921_s29 + $0xf0] sm:$0xff] }
  0x9b   : > { %936 = vst [vmem:[#allocation2 + $0xa8] sm:$0xf] %v935_v18  ;;  %v5337_v31 = vcombine.low %v5798_v29, %v5799_v42  ;;  %v1260_v58 = vrot.slane %v1259_v62, 4  ;;  %v762_v0 = vrot.slane %v760_v9, 7  ;;  %v1280_v39 = vshll.u32 %v6566_v13, 16 }
  0x9c   : > { %v1290_v40 = vshrl.u32 %v6570_v17, 16  ;;  %v1286_v46 = vshll.u32 %v6570_v17, 16  ;;  %v6595_v18 = vcombine.low %v6482_v8, %v6496_v52  ;;  %v1521_v19 = vrot.slane %v1519_v43, 4  ;;  %v6605_v62 = vld [vmem:[#allocation2 + $0x8c] sm:$0x1] }
  0x9d   : > { %1885 = vrot.lane.b32.xlu0 %v6373_v57, %s5819_s19  ;;  %1887 = vrot.lane.b32.xlu1 %v6464_v21, %s5819_s19  ;;  %v6484_v57 = vpop.permute.xlu1 %1803  ;;  %v1279_v9 = vrot.slane %v1277_v11, 4  ;;  %v5575_v29 = vpack.c.bf16 %v421_v7, %v421_v7 }
  0x9f   : > { %v941_v52 = vld [vmem:[#allocation2 + $0xb4] sm:$0xf] }
  0xa1   : > { %1920 = vrot.lane.b32.xlu0 %v6398_v28, %s5817_s13  ;;  %1922 = vrot.lane.b32.xlu1 %v6480_v50, %s5817_s13  ;;  %v1251_v28 = vsel %vm5935_vm12, %v1246_v51, %v1250_v55  ;;  %v756_v51 = vor.u32 %v754_v38, %v753_v53  ;;  %v938_v55 = vld [vmem:[#allocation2 + $0xb0] sm:$0x1]  ;;  %v768_v38 = vshrl.u32 %v6554_v36, 16  ;;  %v763_v53 = vshll.u32 %v5573_v63, 16 }
  0xa2   : > { %v6523_v41 = vpop.permute.xlu1 %1840  ;;  %v6525_v25 = vcombine.low %v1241_v60, %v1251_v28  ;;  %v6545_v60 = vld [vmem:[#allocation2 + $0x80] sm:$0x1]  ;;  %v939_v23 = vsel %vm5874_vm3, %v758_v12, %v938_v55  ;;  %v5329_v55 = vrot.slane %v6482_v8, 9  ;;  %v771_v63 = vshll.u32 %v6554_v36, 16 }
  0xa3   : > { %v757_v28 = vsel %vm5953_vm14, %v749_v49, %v756_v51  ;;  %940 = vst [vmem:[#allocation2 + $0xb0] sm:$0x1] %v939_v23  ;;  %v1272_v56 = vshll.u32 %v6545_v60, 16  ;;  %v339_v49 = vsel %vm5874_vm3, 0, %v338_v5  ;;  %v770_v59 = vrot.slane %v768_v38, 7  ;;  %v422_v5 = vld [vmem:[%s5921_s29 + $0xf8] sm:$0xff] }
  0xa4   : > { %937 = vst.msk [vmem:[#allocation2 + $0xac] sm:$0xf] %vm280_vm0, %v757_v28  ;;  %340 = vst [vmem:[#allocation2 + $0xc0] sm:$0x1] %v339_v49  ;;  %v1522_v10 = vrot.slane %v6545_v60, 5  ;;  %v765_v28 = vor.u32 %v763_v53, %v762_v0  ;;  %v1265_v23 = vsel %vm5935_vm12, %v1260_v58, %v6535_v32  ;;  %v766_v8 = vrot.slane %v762_v0, 4 }
  0xa5   : > { %1955 = vrot.lane.b32.xlu0 %v6443_v22, %s5816_s10  ;;  %1957 = vrot.lane.b32.xlu1 %v6488_v61, %s5816_s10  ;;  %v1274_v44 = vrot.slane %v1272_v56, 5  ;;  %v1282_v60 = vrot.slane %v1280_v39, 5  ;;  %v1292_v56 = vrot.slane %v1290_v40, 4  ;;  %v1520_v32 = vsel %vm5912_vm9, %v5329_v55, %v1519_v43 }
  0xa6   : > { %v773_v38 = vor.u32 %v771_v63, %v770_v59  ;;  %v775_v58 = vrot.slane %v770_v59, 4  ;;  %v942_v11 = vsel %vm5942_vm13, %v765_v28, %v941_v52  ;;  %v2048_v49 = vsel %vm2045_vm1, %v5337_v31, %v6493_v33 }
  0xa7   : > { %v6528_v48 = vpop.permute.xlu0 %1838  ;;  %943 = vst [vmem:[#allocation2 + $0xb4] sm:$0xf] %v942_v11  ;;  %v5576_v40 = vpack.c.bf16 %v422_v5, %v422_v5  ;;  %v1283_v55 = vor.u32 %v1282_v60, %v1279_v9  ;;  %v777_v33 = vshrl.u32 %v5575_v29, 16  ;;  %v780_v31 = vshll.u32 %v5575_v29, 16 }
  0xa8   : > { %v774_v43 = vsel %vm5953_vm14, %v766_v8, %v773_v38 }
  0xa9   : > { %1990 = vrot.lane.b32.xlu0 %v6464_v21, %s5820_s22  ;;  %1992 = vrot.lane.b32.xlu1 %v6525_v25, %s5820_s22  ;;  %944 = vst.msk [vmem:[#allocation2 + $0xb8] sm:$0xf] %vm280_vm0, %v774_v43  ;;  %v785_v7 = vshrl.u32 %v5576_v40, 16  ;;  %v779_v28 = vrot.slane %v777_v33, 7 }
  0xab   : > { %v6549_v16 = vpop.permute.xlu0 %1943  ;;  %v6556_v26 = vpop.permute.xlu1 %1945  ;;  %v948_v60 = vld [vmem:[#allocation2 + $0xc0] sm:$0xf]  ;;  %v787_v29 = vrot.slane %v785_v7, 7 }
  0xad   : > { %2025 = vrot.lane.b32.xlu0 %v6480_v50, %s5818_s16  ;;  %1739 = vrot.lane.b32.xlu1 %v6464_v21, %s5814_s8  ;;  %v1270_v21 = vrot.slane %v1269_v15, 4  ;;  %v6609_v15 = vrot.slane %v1286_v46, 5  ;;  %v388_v46 = vld [vmem:[#allocation2 + $0xc8] sm:$0x1] }
  0xaf   : > { %v6568_v35 = vpop.permute.xlu0 %1908  ;;  %v6573_v34 = vpop.permute.xlu1 %1805  ;;  %v1275_v36 = vsel %vm5935_vm12, %v1270_v21, %v1274_v44  ;;  %v1523_v21 = vsel %vm5912_vm9, %v1521_v19, %v1522_v10  ;;  %v1296_v44 = vshll.u32 %v6605_v62, 16  ;;  %v1293_v59 = vor.u32 %v1292_v56, %v6609_v15 }
  0xb0   : > { %v6616_v53 = vcombine.low %v1265_v23, %v1275_v36  ;;  %v389_v23 = vsel %vm5889_vm5, 0, %v388_v46  ;;  %v2096_v36 = vsel %vm2094_vm2, %v2048_v49, %v6484_v57  ;;  %v6645_v8 = vcombine.low %v1520_v32, %v1523_v21  ;;  %v6682_v49 = vld [vmem:[#allocation2 + $0x90] sm:$0xf] }
  0xb1   : > { %2027 = vrot.lane.b32.xlu0 %v6560_v27, %s5818_s16  ;;  %1741 = vrot.lane.b32.xlu1 %v6525_v25, %s5814_s8  ;;  %v1298_v52 = vrot.slane %v1296_v44, 5  ;;  %390 = vst [vmem:[#allocation2 + $0xc8] sm:$0x1] %v389_v23  ;;  %v1284_v56 = vrot.slane %v1283_v55, 4  ;;  %v782_v57 = vor.u32 %v780_v31, %v779_v28  ;;  %v788_v32 = vshll.u32 %v5576_v40, 16 }
  0xb2   : > { %v783_v40 = vrot.slane %v779_v28, 4  ;;  %v792_v55 = vrot.slane %v787_v29, 4  ;;  %v1301_v7 = vshrl.u32 %v6682_v49, 16 }
  0xb3   : > { %v6586_v51 = vpop.permute.xlu0 %2013  ;;  %v6591_v12 = vpop.permute.xlu1 %1910  ;;  %v949_v21 = vsel %vm5942_vm13, %v782_v57, %v948_v60  ;;  %v790_v46 = vor.u32 %v788_v32, %v787_v29 }
  0xb4   : > { %950 = vst [vmem:[#allocation2 + $0xc0] sm:$0xf] %v949_v21  ;;  %v1303_v60 = vrot.slane %v1301_v7, 4 }
  0xb5   : > { %1819 = vrot.lane.b32.xlu0 %v6480_v50, %s5813_s30  ;;  %1821 = vrot.lane.b32.xlu1 %v6560_v27, %s5813_s30  ;;  %v945_v50 = vld [vmem:[#allocation2 + $0xbc] sm:$0x1]  ;;  %v791_v23 = vsel %vm5953_vm14, %v783_v40, %v790_v46 }
  0xb6   : > { %v946_v39 = vsel %vm5874_vm3, %v775_v58, %v945_v50  ;;  %v1294_v50 = vrot.slane %v1293_v59, 4  ;;  %v5330_v59 = vrot.slane %v6566_v13, 9  ;;  %951 = vst.msk [vmem:[#allocation2 + $0xc4] sm:$0xf] %vm280_vm0, %v791_v23 }
  0xb7   : > { %v6612_v42 = vpop.permute.xlu0 %2015  ;;  %v1876_v0 = vpop.permute.xlu1 %1875  ;;  %947 = vst [vmem:[#allocation2 + $0xbc] sm:$0x1] %v946_v39  ;;  %v6686_v39 = vld [vmem:[#allocation2 + $0x94] sm:$0xf] }
  0xb8   : > { %v952_v33 = vld [vmem:[#allocation2 + $0xc8] sm:$0x1] }
  0xb9   : > { %1854 = vrot.lane.b32.xlu0 %v6488_v61, %s5815_s9  ;;  %1856 = vrot.lane.b32.xlu1 %v6595_v18, %s5815_s9 }
  0xbb   : > { %v1726_v63 = vpop.permute.xlu0 %1725  ;;  %v1981_v19 = vpop.permute.xlu1 %1980 }
  0xbc   : > { %v2051_v10 = vsel %vm2045_vm1, %v6007_v20, %v1726_v63  ;;  %v1529_v63 = vrot.slane %v6605_v62, 5  ;;  %v953_v62 = vsel %vm5874_vm3, %v792_v55, %v952_v33  ;;  %v5331_v33 = vrot.slane %v6682_v49, 9 }
  0xbd   : > { %v2098_v9 = vsel %vm2094_vm2, %v2051_v10, %v6573_v34  ;;  %1889 = vrot.lane.b32.xlu0 %v6525_v25, %s5819_s19  ;;  %1891 = vrot.lane.b32.xlu1 %v6616_v53, %s5819_s19  ;;  %v2129_v34 = vsel %vm2127_vm4, %v2096_v36, %v6528_v48  ;;  %v1314_v10 = vshrl.u32 %v6686_v39, 16  ;;  %954 = vst [vmem:[#allocation2 + $0xc8] sm:$0x1] %v953_v62 }
  0xbe   : > { %v2131_v20 = vsel %vm2127_vm4, %v2098_v9, %v6523_v41 }
  0xbf   : > { %v2164_v5 = vsel %vm2160_vm6, %v2131_v20, %v1876_v0  ;;  %v1874_v25 = vpop.permute.xlu0 %1873  ;;  %v6656_v58 = vpop.permute.xlu1 %1727  ;;  %v6669_v0 = vcombine.low %v6566_v13, %v6570_v17  ;;  %v1304_v13 = vshll.u32 %v6682_v49, 16 }
  0xc0   : > { %v2197_v38 = vsel %vm2193_vm7, %v2164_v5, %v6591_v12  ;;  %v2162_v41 = vsel %vm2160_vm6, %v2129_v34, %v1874_v25  ;;  %v1526_v12 = vrot.slane %v6570_v17, 5  ;;  %v993_v34 = vld [vmem:[#allocation2 + $0x98] sm:$0x1] }
  0xc1   : > { %v2230_v44 = vsel %vm2226_vm8, %v2197_v38, %v6556_v26  ;;  %v2195_v48 = vsel %vm2193_vm7, %v2162_v41, %v6568_v35  ;;  %1924 = vrot.lane.b32.xlu0 %v6560_v27, %s5817_s13  ;;  %1926 = vrot.lane.b32.xlu1 %v6645_v8, %s5817_s13  ;;  %v1289_v35 = vsel %vm5935_vm12, %v1284_v56, %v6609_v15  ;;  %v1306_v20 = vrot.slane %v1304_v13, 5 }
  0xc2   : > { %v2263_v11 = vsel %vm2259_vm10, %v2230_v44, %v1981_v19  ;;  %v2228_v26 = vsel %vm2226_vm8, %v2195_v48, %v6549_v16  ;;  %v1299_v27 = vsel %vm5935_vm12, %v1294_v50, %v1298_v52  ;;  %v1527_v9 = vsel %vm5912_vm9, %v5330_v59, %v1526_v12  ;;  %v6732_v48 = vld [vmem:[#allocation2 + $0x9c] sm:$0xf] }
  0xc3   : > { %v2297_v17 = vsel %vm2292_vm11, %v2263_v11, %v6612_v42  ;;  %v1979_v43 = vpop.permute.xlu0 %1978  ;;  %v6689_v16 = vpop.permute.xlu1 %1729  ;;  %v1528_v42 = vrot.slane %v1526_v12, 4  ;;  %v6702_v19 = vcombine.low %v1289_v35, %v1299_v27  ;;  %v1316_v50 = vrot.slane %v1314_v10, 4  ;;  %v6734_v11 = vld [vmem:[#allocation2 + $0xa0] sm:$0xf]  ;;  %v6761_v10 = vld [vmem:[#allocation2 + $0xa4] sm:$0x1] }
  0xc4   : > { %2343 = vst.msk [vmem:[#allocation4 + $0x8] sm:$0xff] %vm8722_vm15, %v2297_v17  ;;  %v2261_v15 = vsel %vm2259_vm10, %v2228_v26, %v1979_v43  ;;  %v1307_v38 = vor.u32 %v1306_v20, %v1303_v60  ;;  %v1320_v21 = vshll.u32 %v993_v34, 16  ;;  %v1533_v26 = vrot.slane %v6686_v39, 5 }
  0xc5   : > { %v2294_v31 = vsel %vm2292_vm11, %v2261_v15, %v6586_v51  ;;  %1959 = vrot.lane.b32.xlu0 %v6595_v18, %s5816_s10  ;;  %1961 = vrot.lane.b32.xlu1 %v6669_v0, %s5816_s10  ;;  %v1310_v51 = vshll.u32 %v6686_v39, 16  ;;  %v1530_v52 = vsel %vm5912_vm9, %v1528_v42, %v1529_v63  ;;  %v1325_v17 = vshrl.u32 %v6732_v48, 16 }
  0xc6   : > { %2342 = vst.msk [vmem:[#allocation4] sm:$0xff] %vm8722_vm15, %v2294_v31  ;;  %v6726_v29 = vcombine.low %v1527_v9, %v1530_v52  ;;  %v1322_v27 = vrot.slane %v1320_v21, 5  ;;  %v1328_v40 = vshll.u32 %v6732_v48, 16  ;;  %v1338_v46 = vshrl.u32 %v6734_v11, 16 }
  0xc7   : > { %v1808_v28 = vpop.permute.xlu0 %1807  ;;  %v6711_v36 = vpop.permute.xlu1 %1809  ;;  %v1312_v56 = vrot.slane %v1310_v51, 5  ;;  %v1334_v55 = vshll.u32 %v6734_v11, 16  ;;  %v6749_v59 = vcombine.low %v6682_v49, %v6686_v39  ;;  %v1535_v31 = vrot.slane %v1533_v26, 4 }
  0xc8   : > { %v1536_v7 = vrot.slane %v993_v34, 5  ;;  %v1327_v13 = vrot.slane %v1325_v17, 4  ;;  %v1330_v49 = vrot.slane %v1328_v40, 5  ;;  %v1340_v23 = vrot.slane %v1338_v46, 4  ;;  %v6809_v40 = vld [vmem:[#allocation2 + $0xa8] sm:$0xf] }
  0xc9   : > { %1994 = vrot.lane.b32.xlu0 %v6616_v53, %s5820_s22  ;;  %1996 = vrot.lane.b32.xlu1 %v6702_v19, %s5820_s22  ;;  %v1317_v41 = vor.u32 %v1316_v50, %v1312_v56  ;;  %v1336_v51 = vrot.slane %v1334_v55, 5  ;;  %v2057_v9 = vsel %vm2045_vm1, %v6024_v45, %v6689_v16  ;;  %v1344_v60 = vshll.u32 %v6761_v10, 16 }
  0xca   : > { %v1537_v45 = vsel %vm5912_vm9, %v1535_v31, %v1536_v7  ;;  %v1331_v16 = vor.u32 %v1330_v49, %v1327_v13  ;;  %v1543_v7 = vrot.slane %v6761_v10, 5  ;;  %v1349_v13 = vshrl.u32 %v6809_v40, 16 }
  0xcb   : > { %v1843_v57 = vpop.permute.xlu0 %1842  ;;  %v6722_v5 = vpop.permute.xlu1 %1844  ;;  %v2359_v32 = vld [vmem:[#allocation4 + $0x8] sm:$0xff]  ;;  %v1318_v35 = vrot.slane %v1317_v41, 4  ;;  %v1341_v50 = vor.u32 %v1340_v23, %v1336_v51  ;;  %v1346_v41 = vrot.slane %v1344_v60, 5 }
  0xcd   : > { %2029 = vrot.lane.b32.xlu0 %v6645_v8, %s5818_s16  ;;  %v2358_v25 = vld [vmem:[#allocation4] sm:$0xff]  ;;  %1743 = vrot.lane.b32.xlu1 %v6616_v53, %s5814_s8  ;;  %v1308_v53 = vrot.slane %v1307_v38, 4  ;;  %v1323_v63 = vsel %vm5935_vm12, %v1318_v35, %v1322_v27 }
  0xce   : > { %5661 = vmatprep.mubr.msk.bf16.mxu0 %vm8722_vm15, %v2358_v25 }
  0xcf   : > { %5662 = vmatmul.mubr.msk.bf16.vlgmr.msra.gmra.mrb[0].mxu0 %vm8722_vm15, %v2359_v32  ;;  %v1878_v44 = vpop.permute.xlu0 %1877  ;;  %v1880_v12 = vpop.permute.xlu1 %1879  ;;  %v1313_v42 = vsel %vm5935_vm12, %v1308_v53, %v1312_v56  ;;  %v1342_v53 = vrot.slane %v1341_v50, 4 }
  0xd1   : > { %2031 = vrot.lane.b32.xlu0 %v6726_v29, %s5818_s16  ;;  %1745 = vrot.lane.b32.xlu1 %v6702_v19, %s5814_s8 }
  0xd3   : > { %v1913_v43 = vpop.permute.xlu0 %1912  ;;  %v1915_v15 = vpop.permute.xlu1 %1914 }
  0xd5   : > { %1823 = vrot.lane.b32.xlu0 %v6645_v8, %s5813_s30  ;;  %1825 = vrot.lane.b32.xlu1 %v6726_v29, %s5813_s30  ;;  %v2054_v8 = vsel %vm2045_vm1, %v5994_v3, %v6656_v58  ;;  %v6771_v3 = vcombine.low %v1313_v42, %v1323_v63  ;;  %v1534_v58 = vsel %vm5912_vm9, %v5331_v33, %v1533_v26  ;;  %v1332_v26 = vrot.slane %v1331_v16, 4  ;;  %v6816_v33 = vld [vmem:[#allocation2 + $0xac] sm:$0xf] }
  0xd6   : > { %v2100_v52 = vsel %vm2094_vm2, %v2054_v8, %v1808_v28  ;;  %v2102_v28 = vsel %vm2094_vm2, %v2057_v9, %v6711_v36  ;;  %v1362_v49 = vshrl.u32 %v6816_v33, 16 }
  0xd7   : > { %v1948_v39 = vpop.permute.xlu0 %1947  ;;  %v1950_v62 = vpop.permute.xlu1 %1949  ;;  %v2133_v20 = vsel %vm2127_vm4, %v2100_v52, %v1843_v57  ;;  %v6788_v57 = vcombine.low %v1534_v58, %v1537_v45  ;;  %v2135_v21 = vsel %vm2127_vm4, %v2102_v28, %v6722_v5  ;;  %v1540_v5 = vrot.slane %v6734_v11, 5  ;;  %v999_v52 = vld [vmem:[#allocation2 + $0xb0] sm:$0x1] }
  0xd8   : > { %v2166_v34 = vsel %vm2160_vm6, %v2133_v20, %v1878_v44  ;;  %v2168_v35 = vsel %vm2160_vm6, %v2135_v21, %v1880_v12  ;;  %v6807_v12 = vcombine.low %v6732_v48, %v6734_v11  ;;  %v5332_v11 = vrot.slane %v6732_v48, 9 }
  0xd9   : > { %1858 = vrot.lane.b32.xlu0 %v6669_v0, %s5815_s9  ;;  %1860 = vrot.lane.b32.xlu1 %v6749_v59, %s5815_s9  ;;  %v2199_v32 = vsel %vm2193_vm7, %v2166_v34, %v1913_v43  ;;  %v2201_v17 = vsel %vm2193_vm7, %v2168_v35, %v1915_v15  ;;  %v1337_v15 = vsel %vm5935_vm12, %v1332_v26, %v1336_v51  ;;  %v1542_v63 = vrot.slane %v1540_v5, 4 }
  0xda   : > { %v2232_v38 = vsel %vm2226_vm8, %v2199_v32, %v1948_v39  ;;  %v2234_v43 = vsel %vm2226_vm8, %v2201_v17, %v1950_v62  ;;  %v1352_v39 = vshll.u32 %v6809_v40, 16  ;;  %v1358_v51 = vshll.u32 %v6816_v33, 16 }
  0xdb   : > { %v1983_v56 = vpop.permute.xlu0 %1982  ;;  %v1985_v25 = vpop.permute.xlu1 %1984  ;;  %v1541_v10 = vsel %vm5912_vm9, %v5332_v11, %v1540_v5  ;;  %v1544_v9 = vsel %vm5912_vm9, %v1542_v63, %v1543_v7  ;;  %v1351_v58 = vrot.slane %v1349_v13, 4  ;;  %v1368_v34 = vshll.u32 %v999_v52, 16  ;;  %v6883_v13 = vld [vmem:[#allocation2 + $0xbc] sm:$0x1] }
  0xdc   : > { %v2265_v36 = vsel %vm2259_vm10, %v2232_v38, %v1983_v56  ;;  %v2267_v46 = vsel %vm2259_vm10, %v2234_v43, %v1985_v25  ;;  %v1354_v60 = vrot.slane %v1352_v39, 5  ;;  %v1360_v20 = vrot.slane %v1358_v51, 5 }
  0xdd   : > { %1893 = vrot.lane.b32.xlu0 %v6702_v19, %s5819_s19  ;;  %1895 = vrot.lane.b32.xlu1 %v6771_v3, %s5819_s19  ;;  %v1364_v56 = vrot.slane %v1362_v49, 4  ;;  %v6850_v28 = vcombine.low %v1541_v10, %v1544_v9  ;;  %v1547_v35 = vrot.slane %v6816_v33, 5  ;;  %v1392_v9 = vshll.u32 %v6883_v13, 16 }
  0xde   : > { %v1355_v25 = vor.u32 %v1354_v60, %v1351_v58 }
  0xdf   : > { %v2018_v44 = vpop.permute.xlu0 %2017  ;;  %v6794_v27 = vpop.permute.xlu1 %1731  ;;  %v1365_v32 = vor.u32 %v1364_v56, %v1360_v20  ;;  %v1549_v63 = vrot.slane %v1547_v35, 4 }
  0xe0   : > { %v2300_v19 = vsel %vm2292_vm11, %v2265_v36, %v2018_v44  ;;  %v6856_v36 = vld [vmem:[#allocation2 + $0xb8] sm:$0xf]  ;;  %v1370_v44 = vrot.slane %v1368_v34, 5  ;;  %v1356_v26 = vrot.slane %v1355_v25, 4  ;;  %v1394_v25 = vrot.slane %v1392_v9, 5 }
  0xe1   : > { %2344 = vst.msk [vmem:[#allocation4 + $0x10] sm:$0xff] %vm8722_vm15, %v2300_v19  ;;  %1928 = vrot.lane.b32.xlu0 %v6726_v29, %s5817_s13  ;;  %1930 = vrot.lane.b32.xlu1 %v6788_v57, %s5817_s13  ;;  %v1347_v29 = vsel %vm5935_vm12, %v1342_v53, %v1346_v41  ;;  %v6854_v41 = vld [vmem:[#allocation2 + $0xb4] sm:$0xf]  ;;  %v1366_v53 = vrot.slane %v1365_v32, 4  ;;  %v1386_v5 = vshrl.u32 %v6856_v36, 16  ;;  %v1382_v43 = vshll.u32 %v6856_v36, 16 }
  0xe2   : > { %v6829_v8 = vcombine.low %v1337_v15, %v1347_v29  ;;  %v1376_v17 = vshll.u32 %v6854_v41, 16  ;;  %v5333_v15 = vrot.slane %v6809_v40, 9  ;;  %v1550_v29 = vrot.slane %v999_v52, 5 }
  0xe3   : > { %v2020_v55 = vpop.permute.xlu0 %2019  ;;  %v6818_v31 = vpop.permute.xlu1 %1733  ;;  %v1371_v11 = vsel %vm5935_vm12, %v1366_v53, %v1370_v44  ;;  %v1384_v39 = vrot.slane %v1382_v43, 5  ;;  %v1388_v49 = vrot.slane %v1386_v5, 4 }
  0xe4   : > { %v2303_v42 = vsel %vm2292_vm11, %v2267_v46, %v2020_v55  ;;  %v6871_v55 = vcombine.low %v6809_v40, %v6816_v33  ;;  %v1378_v40 = vrot.slane %v1376_v17, 5 }
  0xe5   : > { %2345 = vst.msk [vmem:[#allocation4 + $0x18] sm:$0xff] %vm8722_vm15, %v2303_v42  ;;  %1963 = vrot.lane.b32.xlu0 %v6749_v59, %s5816_s10  ;;  %1965 = vrot.lane.b32.xlu1 %v6807_v12, %s5816_s10  ;;  %v1361_v42 = vsel %vm5935_vm12, %v1356_v26, %v1360_v20  ;;  %v1389_v60 = vor.u32 %v1388_v49, %v1384_v39 }
  0xe7   : > { %v1812_v23 = vpop.permute.xlu0 %1811  ;;  %v6834_v62 = vpop.permute.xlu1 %1813  ;;  %v1390_v26 = vrot.slane %v1389_v60, 4  ;;  %v1005_v60 = vld [vmem:[#allocation2 + $0xc8] sm:$0x1] }
  0xe8   : > { %v2360_v48 = vld [vmem:[#allocation4 + $0x10] sm:$0xff] }
  0xe9   : > { %1998 = vrot.lane.b32.xlu0 %v6771_v3, %s5820_s22  ;;  %5665 = vmatprep.mubr.msk.bf16.mxu0 %vm8722_vm15, %v2360_v48  ;;  %v2063_v48 = vsel %vm2045_vm1, %v6203_v6, %v6818_v31  ;;  %v1551_v6 = vsel %vm5912_vm9, %v1549_v63, %v1550_v29  ;;  %v6939_v29 = vld [vmem:[#allocation2 + $0xc0] sm:$0xf] }
  0xea   : > { %2000 = vrot.lane.b32.xlu1 %v6829_v8, %s5820_s22 }
  0xeb   : > { %v1847_v45 = vpop.permute.xlu0 %1846  ;;  %v6845_v16 = vpop.permute.xlu1 %1848 }
  0xec   : > { %v2361_v50 = vld [vmem:[#allocation4 + $0x18] sm:$0xff] }
  0xed   : > { %2033 = vrot.lane.b32.xlu0 %v6788_v57, %s5818_s16  ;;  %5666 = vmatmul.mubr.msk.bf16.gmra.mrb[4].mxu0 %vm8722_vm15, %v2361_v50 }
  0xee   : > { %1747 = vrot.lane.b32.xlu1 %v6771_v3, %s5814_s8  ;;  %v1373_v3 = vshrl.u32 %v6854_v41, 16 }
  0xef   : > { %v1882_v38 = vpop.permute.xlu0 %1881  ;;  %v1884_v21 = vpop.permute.xlu1 %1883 }
  0xf0   : > { %v1375_v7 = vrot.slane %v1373_v3, 4 }
  0xf1   : > { %2035 = vrot.lane.b32.xlu0 %v6850_v28, %s5818_s16 }
  0xf2   : > { %1749 = vrot.lane.b32.xlu1 %v6829_v8, %s5814_s8  ;;  %v1379_v31 = vor.u32 %v1378_v40, %v1375_v7  ;;  %v1557_v7 = vrot.slane %v6883_v13, 5  ;;  %v1563_v40 = vshll.u32 %v6939_v29, 16 }
  0xf3   : > { %v1917_v19 = vpop.permute.xlu0 %1916  ;;  %v1919_v46 = vpop.permute.xlu1 %1918 }
  0xf4   : > { %v1380_v44 = vrot.slane %v1379_v31, 4  ;;  %v1565_v9 = vrot.slane %v1563_v40, 5 }
  0xf5   : > { %1827 = vrot.lane.b32.xlu0 %v6788_v57, %s5813_s30  ;;  %v2060_v57 = vsel %vm2045_vm1, %v6158_v24, %v6794_v27  ;;  %v6893_v24 = vcombine.low %v1361_v42, %v1371_v11  ;;  %v1548_v27 = vsel %vm5912_vm9, %v5333_v15, %v1547_v35  ;;  %v6941_v42 = vld [vmem:[#allocation2 + $0xc4] sm:$0xf]  ;;  %v5334_v11 = vrot.slane %v6854_v41, 9 }
  0xf6   : > { %1829 = vrot.lane.b32.xlu1 %v6850_v28, %s5813_s30  ;;  %v2104_v10 = vsel %vm2094_vm2, %v2060_v57, %v1812_v23  ;;  %v2106_v23 = vsel %vm2094_vm2, %v2063_v48, %v6834_v62  ;;  %v1385_v43 = vsel %vm5935_vm12, %v1380_v44, %v1384_v39  ;;  %v1573_v39 = vshrl.u32 %v6941_v42, 16 }
  0xf7   : > { %v1952_v33 = vpop.permute.xlu0 %1951  ;;  %v1954_v51 = vpop.permute.xlu1 %1953  ;;  %v2137_v52 = vsel %vm2127_vm4, %v2104_v10, %v1847_v45  ;;  %v6910_v45 = vcombine.low %v1548_v27, %v1551_v6  ;;  %v2139_v32 = vsel %vm2127_vm4, %v2106_v23, %v6845_v16  ;;  %v1569_v49 = vshll.u32 %v6941_v42, 16 }
  0xf8   : > { %v2170_v20 = vsel %vm2160_vm6, %v2137_v52, %v1882_v38  ;;  %v2172_v53 = vsel %vm2160_vm6, %v2139_v32, %v1884_v21  ;;  %v1554_v21 = vrot.slane %v6856_v36, 5  ;;  %v6978_v32 = vld [vmem:[#allocation2 + $0xd0] sm:$0xf] }
  0xf9   : > { %1862 = vrot.lane.b32.xlu0 %v6807_v12, %s5815_s9  ;;  %v2203_v50 = vsel %vm2193_vm7, %v2170_v20, %v1917_v19  ;;  %v2205_v3 = vsel %vm2193_vm7, %v2172_v53, %v1919_v46  ;;  %v6928_v19 = vcombine.low %v6854_v41, %v6856_v36  ;;  %v1571_v52 = vrot.slane %v1569_v49, 5  ;;  %v6976_v20 = vld [vmem:[#allocation2 + $0xcc] sm:$0xf] }
  0xfa   : > { %1864 = vrot.lane.b32.xlu1 %v6871_v55, %s5815_s9  ;;  %v2236_v34 = vsel %vm2226_vm8, %v2203_v50, %v1952_v33  ;;  %v2238_v16 = vsel %vm2226_vm8, %v2205_v3, %v1954_v51  ;;  %v1556_v63 = vrot.slane %v1554_v21, 4  ;;  %v1560_v33 = vshrl.u32 %v6939_v29, 16 }
  0xfb   : > { %v1987_v58 = vpop.permute.xlu0 %1986  ;;  %v1989_v56 = vpop.permute.xlu1 %1988  ;;  %v1555_v41 = vsel %vm5912_vm9, %v5334_v11, %v1554_v21  ;;  %v1597_v44 = vshll.u32 %v6976_v20, 16  ;;  %v1588_v21 = vrot.slane %v6941_v42, 5  ;;  %v1591_v11 = vrot.slane %v1005_v60, 5 }
  0xfc   : > { %v2269_v62 = vsel %vm2259_vm10, %v2236_v34, %v1987_v58  ;;  %v2271_v17 = vsel %vm2259_vm10, %v2238_v16, %v1989_v56  ;;  %v1558_v13 = vsel %vm5912_vm9, %v1556_v63, %v1557_v7  ;;  %v1562_v27 = vrot.slane %v1560_v33, 4 }
  0xfd   : > { %1897 = vrot.lane.b32.xlu0 %v6829_v8, %s5819_s19  ;;  %v1575_v58 = vrot.slane %v1573_v39, 4  ;;  %v6972_v23 = vcombine.low %v1555_v41, %v1558_v13  ;;  %v1590_v49 = vrot.slane %v1588_v21, 4 }
  0xfe   : > { %1899 = vrot.lane.b32.xlu1 %v6893_v24, %s5819_s19  ;;  %v1566_v50 = vor.u32 %v1565_v9, %v1562_v27 }
  0xff   : > { %v2022_v38 = vpop.permute.xlu0 %2021  ;;  %v6916_v35 = vpop.permute.xlu1 %1735  ;;  %v1576_v34 = vor.u32 %v1575_v58, %v1571_v52  ;;  %v1592_v58 = vsel %vm5912_vm9, %v1590_v49, %v1591_v11 }
 0x100   : > { %v2306_v8 = vsel %vm2292_vm11, %v2269_v62, %v2022_v38  ;;  %v1594_v38 = vshrl.u32 %v6976_v20, 16  ;;  %v2066_v33 = vsel %vm2045_vm1, %v6290_v37, %v6916_v35 }
 0x101   : > { %2346 = vst.msk [vmem:[#allocation4 + $0x20] sm:$0xff] %vm8722_vm15, %v2306_v8  ;;  %1932 = vrot.lane.b32.xlu0 %v6850_v28, %s5817_s13  ;;  %v1395_v28 = vsel %vm5935_vm12, %v1390_v26, %v1394_v25  ;;  %v1579_v25 = vshll.u32 %v1005_v60, 16  ;;  %v1603_v26 = vshll.u32 %v6978_v32, 16  ;;  %v1567_v8 = vrot.slane %v1566_v50, 4 }
 0x102   : > { %1934 = vrot.lane.b32.xlu1 %v6910_v45, %s5817_s13  ;;  %v6948_v36 = vcombine.low %v1385_v43, %v1395_v28  ;;  %v1577_v3 = vrot.slane %v1576_v34, 4  ;;  %v1596_v43 = vrot.slane %v1594_v38, 4  ;;  %v1599_v28 = vrot.slane %v1597_v44, 5 }
 0x103   : > { %v2024_v5 = vpop.permute.xlu0 %2023  ;;  %v6936_v46 = vpop.permute.xlu1 %1737  ;;  %v1581_v16 = vrot.slane %v1579_v25, 5  ;;  %v1605_v63 = vrot.slane %v1603_v26, 5  ;;  %v1622_v25 = vrot.slane %v6978_v32, 5 }
 0x104   : > { %v2309_v15 = vsel %vm2292_vm11, %v2271_v17, %v2024_v5  ;;  %v5335_v5 = vrot.slane %v6939_v29, 9  ;;  %v1600_v35 = vor.u32 %v1599_v28, %v1596_v43 }
 0x105   : > { %2347 = vst.msk [vmem:[#allocation4 + $0x28] sm:$0xff] %vm8722_vm15, %v2309_v15  ;;  %1967 = vrot.lane.b32.xlu0 %v6871_v55, %s5816_s10  ;;  %v5385_v15 = vcombine.low %v6939_v29, %v6941_v42  ;;  %v1582_v39 = vsel %vm5935_vm12, %v1577_v3, %v1581_v16  ;;  %v2069_v29 = vsel %vm2045_vm1, %v6349_v30, %v6936_v46 }
 0x106   : > { %1969 = vrot.lane.b32.xlu1 %v6928_v19, %s5816_s10  ;;  %v1601_v34 = vrot.slane %v1600_v35, 4  ;;  %v5388_v3 = vcombine.low %v6976_v20, %v6978_v32  ;;  %v2821_v35 = vld [vmem:[#allocation3 + $0x14] sm:$0x1] }
 0x107   : > { %v1816_v57 = vpop.permute.xlu0 %1815  ;;  %v6956_v51 = vpop.permute.xlu1 %1817 }
 0x108   : > { %v2362_v48 = vld [vmem:[#allocation4 + $0x20] sm:$0xff]  ;;  %v2108_v42 = vsel %vm2094_vm2, %v2066_v33, %v1816_v57  ;;  %v2110_v46 = vsel %vm2094_vm2, %v2069_v29, %v6956_v51 }
 0x109   : > { %2002 = vrot.lane.b32.xlu0 %v6893_v24, %s5820_s22  ;;  %5669 = vmatprep.mubr.msk.bf16.mxu0 %vm8722_vm15, %v2362_v48  ;;  %v1008_v48 = vld [vmem:[#allocation2 + $0xd4] sm:$0x1]  ;;  %v2776_v33 = vld [vmem:[#allocation3 + $0x18] sm:$0x1] }
 0x10a   : > { %2004 = vrot.lane.b32.xlu1 %v6948_v36, %s5820_s22  ;;  %v1613_v13 = vshll.u32 %v1008_v48, 16  ;;  %v1625_v16 = vrot.slane %v1008_v48, 5 }
 0x10b   : > { %v1851_v10 = vpop.permute.xlu0 %1850  ;;  %v6967_v6 = vpop.permute.xlu1 %1852 }
 0x10c   : > { %v2363_v31 = vld [vmem:[#allocation4 + $0x28] sm:$0xff]  ;;  %v2141_v27 = vsel %vm2127_vm4, %v2108_v42, %v1851_v10  ;;  %v2143_v38 = vsel %vm2127_vm4, %v2110_v46, %v6967_v6 }
 0x10d   : > { %2037 = vrot.lane.b32.xlu0 %v6910_v45, %s5818_s16  ;;  %5670 = vmatmul.mubr.msk.bf16.gmra.mrb[8].mxu0 %vm8722_vm15, %v2363_v31 }
 0x10e   : > { %1751 = vrot.lane.b32.xlu1 %v6893_v24, %s5814_s8  ;;  %v1607_v24 = vshrl.u32 %v6978_v32, 16 }
 0x10f   : > { %v1886_v56 = vpop.permute.xlu0 %1885  ;;  %v1888_v62 = vpop.permute.xlu1 %1887 }
 0x110   : > { %v1609_v7 = vrot.slane %v1607_v24, 4  ;;  %v2174_v57 = vsel %vm2160_vm6, %v2141_v27, %v1886_v56  ;;  %v1615_v24 = vrot.slane %v1613_v13, 5  ;;  %v2176_v26 = vsel %vm2160_vm6, %v2143_v38, %v1888_v62  ;;  %v3397_v13 = vld [vmem:[#allocation3] sm:$0xf] }
 0x111   : > { %2039 = vrot.lane.b32.xlu0 %v6972_v23, %s5818_s16  ;;  %v5336_v62 = vrot.slane %v6976_v20, 9 }
 0x112   : > { %1753 = vrot.lane.b32.xlu1 %v6948_v36, %s5814_s8  ;;  %v1610_v30 = vor.u32 %v1609_v7, %v1605_v63 }
 0x113   : > { %v1921_v53 = vpop.permute.xlu0 %1920  ;;  %v1923_v17 = vpop.permute.xlu1 %1922 }
 0x114   : > { %v2207_v60 = vsel %vm2193_vm7, %v2174_v57, %v1921_v53  ;;  %v1611_v44 = vrot.slane %v1610_v30, 4  ;;  %v3455_v30 = vshll.u32 %v3397_v13, 16 }
 0x115   : > { %1831 = vrot.lane.b32.xlu0 %v6910_v45, %s5813_s30  ;;  %v1572_v45 = vsel %vm5935_vm12, %v1567_v8, %v1571_v52  ;;  %v1589_v52 = vsel %vm5912_vm9, %v5335_v5, %v1588_v21  ;;  %v2209_v8 = vsel %vm2193_vm7, %v2176_v26, %v1923_v17  ;;  %v1606_v17 = vsel %vm5935_vm12, %v1601_v34, %v1605_v63  ;;  %v3399_v34 = vld [vmem:[#allocation3 + $0x8] sm:$0x1] }
 0x116   : > { %1833 = vrot.lane.b32.xlu1 %v6972_v23, %s5813_s30  ;;  %v5386_v37 = vcombine.low %v1572_v45, %v1582_v39  ;;  %v5387_v50 = vcombine.low %v1589_v52, %v1592_v58  ;;  %v1616_v43 = vsel %vm5935_vm12, %v1611_v44, %v1615_v24  ;;  %v1623_v63 = vsel %vm5912_vm9, %v5336_v62, %v1622_v25  ;;  %v3398_v52 = vld [vmem:[#allocation3 + $0x4] sm:$0xf] }
 0x117   : > { %v1956_v40 = vpop.permute.xlu0 %1955  ;;  %v1958_v41 = vpop.permute.xlu1 %1957  ;;  %v5389_v20 = vcombine.low %v1606_v17, %v1616_v43  ;;  %v2777_v39 = vsel %vm5874_vm3, 0, %v2776_v33  ;;  %v3452_v58 = vshrl.u32 %v3397_v13, 16  ;;  %v3461_v46 = vshll.u32 %v3398_v52, 16 }
 0x118   : > { %v2240_v10 = vsel %vm2226_vm8, %v2207_v60, %v1956_v40  ;;  %v2242_v6 = vsel %vm2226_vm8, %v2209_v8, %v1958_v41  ;;  %2778 = vst [vmem:[#allocation3 + $0x18] sm:$0x1] %v2777_v39  ;;  %v2824_v41 = vld [vmem:[#allocation3 + $0x20] sm:$0x1]  ;;  %v3465_v57 = vshrl.u32 %v3398_v52, 16  ;;  %v3457_v60 = vrot.slane %v3455_v30, 5 }
 0x119   : > { %1866 = vrot.lane.b32.xlu0 %v6928_v19, %s5815_s9  ;;  %v2825_v42 = vsel %vm5889_vm5, 0, %v2824_v41  ;;  %v3471_v44 = vshll.u32 %v3399_v34, 16  ;;  %v3885_v62 = vrot.slane %v3398_v52, 5  ;;  %v2782_v30 = vld [vmem:[#allocation3 + $0x30] sm:$0x1] }
 0x11a   : > { %1868 = vrot.lane.b32.xlu1 %v5385_v15, %s5815_s9  ;;  %2826 = vst [vmem:[#allocation3 + $0x20] sm:$0x1] %v2825_v42  ;;  %v3467_v38 = vrot.slane %v3465_v57, 4 }
 0x11b   : > { %v1991_v9 = vpop.permute.xlu0 %1990  ;;  %v1993_v31 = vpop.permute.xlu1 %1992  ;;  %v3887_v43 = vrot.slane %v3885_v62, 4 }
 0x11c   : > { %v2273_v51 = vsel %vm2259_vm10, %v2240_v10, %v1991_v9  ;;  %v2275_v21 = vsel %vm2259_vm10, %v2242_v6, %v1993_v31  ;;  %v2822_v9 = vsel %vm5889_vm5, 0, %v2821_v35  ;;  %v3454_v31 = vrot.slane %v3452_v58, 4 }
 0x11d   : > { %1901 = vrot.lane.b32.xlu0 %v6948_v36, %s5819_s19  ;;  %2823 = vst [vmem:[#allocation3 + $0x14] sm:$0x1] %v2822_v9 }
 0x11e   : > { %1903 = vrot.lane.b32.xlu1 %v5386_v37, %s5819_s19 }
 0x11f   : > { %v2026_v56 = vpop.permute.xlu0 %2025  ;;  %v7028_v53 = vpop.permute.xlu1 %1739 }
 0x120   : > { %v2312_v36 = vsel %vm2292_vm11, %v2273_v51, %v2026_v56  ;;  %v3458_v56 = vor.u32 %v3457_v60, %v3454_v31  ;;  %v2779_v31 = vld [vmem:[#allocation3 + $0x24] sm:$0x1] }
 0x121   : > { %2348 = vst.msk [vmem:[#allocation4 + $0x30] sm:$0xff] %vm8722_vm15, %v2312_v36  ;;  %1936 = vrot.lane.b32.xlu0 %v6972_v23, %s5817_s13  ;;  %v1624_v23 = vrot.slane %v1622_v25, 4  ;;  %v3463_v25 = vrot.slane %v3461_v46, 5  ;;  %v3473_v36 = vrot.slane %v3471_v44, 5  ;;  %v2783_v46 = vsel %vm5874_vm3, 0, %v2782_v30 }
 0x122   : > { %1938 = vrot.lane.b32.xlu1 %v5387_v50, %s5817_s13  ;;  %v3459_v26 = vrot.slane %v3458_v56, 4  ;;  %2784 = vst [vmem:[#allocation3 + $0x30] sm:$0x1] %v2783_v46  ;;  %v2833_v30 = vld [vmem:[#allocation3 + $0x44] sm:$0x1] }
 0x123   : > { %v2028_v5 = vpop.permute.xlu0 %2027  ;;  %v7045_v28 = vpop.permute.xlu1 %1741  ;;  %v1626_v7 = vsel %vm5912_vm9, %v1624_v23, %v1625_v16  ;;  %v3468_v24 = vor.u32 %v3467_v38, %v3463_v25  ;;  %v2072_v23 = vsel %vm2045_vm1, %v6443_v22, %v7028_v53  ;;  %v2834_v46 = vsel %vm5889_vm5, 0, %v2833_v30 }
 0x124   : > { %v2315_v11 = vsel %vm2292_vm11, %v2275_v21, %v2028_v5  ;;  %v5390_v49 = vcombine.low %v1623_v63, %v1626_v7  ;;  %v5446_v21 = vrot.slane %v3397_v13, 9  ;;  %v3888_v5 = vrot.slane %v3399_v34, 5  ;;  %2835 = vst [vmem:[#allocation3 + $0x44] sm:$0x1] %v2834_v46 }
 0x125   : > { %2349 = vst.msk [vmem:[#allocation4 + $0x38] sm:$0xff] %vm8722_vm15, %v2315_v11  ;;  %1971 = vrot.lane.b32.xlu0 %v5385_v15, %s5816_s10  ;;  %v2773_v15 = vld [vmem:[#allocation3 + $0xc] sm:$0x1]  ;;  %v3469_v8 = vrot.slane %v3468_v24, 4  ;;  %v2075_v33 = vsel %vm2045_vm1, %v6488_v61, %v7045_v28  ;;  %v2780_v34 = vsel %vm5874_vm3, 0, %v2779_v31 }
 0x126   : > { %1973 = vrot.lane.b32.xlu1 %v5388_v3, %s5816_s10  ;;  %v2774_v48 = vsel %vm5874_vm3, 0, %v2773_v15  ;;  %v3464_v3 = vsel %vm5935_vm12, %v3459_v26, %v3463_v25  ;;  %v3889_v7 = vsel %vm5912_vm9, %v3887_v43, %v3888_v5  ;;  %v2830_v25 = vld [vmem:[#allocation3 + $0x38] sm:$0x1]  ;;  %2781 = vst [vmem:[#allocation3 + $0x24] sm:$0x1] %v2780_v34 }
 0x127   : > { %v7051_v32 = vpop.permute.xlu0 %1819  ;;  %v7057_v40 = vpop.permute.xlu1 %1821  ;;  %2775 = vst [vmem:[#allocation3 + $0xc] sm:$0x1] %v2774_v48  ;;  %v3474_v16 = vsel %vm5935_vm12, %v3469_v8, %v3473_v36  ;;  %v2831_v38 = vsel %vm5889_vm5, 0, %v2830_v25 }
 0x128   : > { %v2364_v45 = vld [vmem:[#allocation4 + $0x30] sm:$0xff]  ;;  %v5480_v17 = vcombine.low %v3464_v3, %v3474_v16  ;;  %v2112_v39 = vsel %vm2094_vm2, %v2072_v23, %v7051_v32  ;;  %v2114_v15 = vsel %vm2094_vm2, %v2075_v33, %v7057_v40  ;;  %2832 = vst [vmem:[#allocation3 + $0x38] sm:$0x1] %v2831_v38 }
 0x129   : > { %2006 = vrot.lane.b32.xlu0 %v5386_v37, %s5820_s22  ;;  %5673 = vmatprep.mubr.msk.bf16.mxu0 %vm8722_vm15, %v2364_v45 }
 0x12a   : > { %2008 = vrot.lane.b32.xlu1 %v5389_v20, %s5820_s22  ;;  %v3886_v20 = vsel %vm5912_vm9, %v5446_v21, %v3885_v62 }
 0x12b   : > { %v1855_v29 = vpop.permute.xlu0 %1854  ;;  %v1857_v27 = vpop.permute.xlu1 %1856  ;;  %v5496_v45 = vcombine.low %v3886_v20, %v3889_v7 }
 0x12c   : > { %v2365_v37 = vld [vmem:[#allocation4 + $0x38] sm:$0xff]  ;;  %v2145_v22 = vsel %vm2127_vm4, %v2112_v39, %v1855_v29  ;;  %v2147_v61 = vsel %vm2127_vm4, %v2114_v15, %v1857_v27 }
 0x12d   : > { %2041 = vrot.lane.b32.xlu0 %v5387_v50, %s5818_s16  ;;  %5674 = vmatmul.mubr.msk.bf16.gmra.mrb[12].mxu0 %vm8722_vm15, %v2365_v37 }
 0x12e   : > { %2043 = vrot.lane.b32.xlu1 %v5390_v49, %s5818_s16 }
 0x12f   : > { %v1890_v10 = vpop.permute.xlu0 %1889  ;;  %v1892_v51 = vpop.permute.xlu1 %1891 }
 0x130   : > { %v2178_v49 = vsel %vm2160_vm6, %v2145_v22, %v1890_v10  ;;  %v2180_v29 = vsel %vm2160_vm6, %v2147_v61, %v1892_v51  ;;  %v2827_v51 = vld [vmem:[#allocation3 + $0x2c] sm:$0x1]  ;;  %v2788_v61 = vld [vmem:[#allocation3 + $0x48] sm:$0x1] }
 0x131   : > { %4159 = vrot.lane.b32.xlu0 %v5480_v17, %s5814_s8  ;;  %v2828_v56 = vsel %vm5889_vm5, 0, %v2827_v51 }
 0x132   : > { %2829 = vst [vmem:[#allocation3 + $0x2c] sm:$0x1] %v2828_v56 }
 0x133   : > { %v1925_v50 = vpop.permute.xlu0 %1924  ;;  %v1927_v6 = vpop.permute.xlu1 %1926 }
 0x134   : > { %v2211_v41 = vsel %vm2193_vm7, %v2178_v49, %v1925_v50  ;;  %v2213_v40 = vsel %vm2193_vm7, %v2180_v29, %v1927_v6 }
 0x135   : > { %4239 = vrot.lane.b32.xlu0 %v5496_v45, %s5813_s30 }
 0x137   : > { %v1960_v11 = vpop.permute.xlu0 %1959  ;;  %v1962_v63 = vpop.permute.xlu1 %1961 }
 0x138   : > { %v2244_v42 = vsel %vm2226_vm8, %v2211_v41, %v1960_v11  ;;  %v2246_v37 = vsel %vm2226_vm8, %v2213_v40, %v1962_v63 }
 0x13b   : > { %v1995_v53 = vpop.permute.xlu0 %1994  ;;  %v1997_v48 = vpop.permute.xlu1 %1996 }
 0x13c   : > { %v2277_v28 = vsel %vm2259_vm10, %v2244_v42, %v1995_v53  ;;  %v2279_v9 = vsel %vm2259_vm10, %v2246_v37, %v1997_v48 }
 0x13f   : > { %v2030_v32 = vpop.permute.xlu0 %2029  ;;  %v1744_v35 = vpop.permute.xlu1 %1743 }
 0x140   : > { %v2318_v13 = vsel %vm2292_vm11, %v2277_v28, %v2030_v32  ;;  %v2078_v3 = vsel %vm2045_vm1, %v6595_v18, %v1744_v35  ;;  %v2789_v28 = vsel %vm5874_vm3, 0, %v2788_v61  ;;  %v2839_v61 = vld [vmem:[#allocation3 + $0x5c] sm:$0x1] }
 0x141   : > { %2350 = vst.msk [vmem:[#allocation4 + $0x40] sm:$0xff] %vm8722_vm15, %v2318_v13  ;;  %2790 = vst [vmem:[#allocation3 + $0x48] sm:$0x1] %v2789_v28  ;;  %v2785_v13 = vld [vmem:[#allocation3 + $0x3c] sm:$0x1] }
 0x142   : > { %v2786_v37 = vsel %vm5874_vm3, 0, %v2785_v13 }
 0x143   : > { %v2032_v52 = vpop.permute.xlu0 %2031  ;;  %v1746_v58 = vpop.permute.xlu1 %1745  ;;  %2787 = vst [vmem:[#allocation3 + $0x3c] sm:$0x1] %v2786_v37 }
 0x144   : > { %v2321_v27 = vsel %vm2292_vm11, %v2279_v9, %v2032_v52  ;;  %v2081_v21 = vsel %vm2045_vm1, %v6669_v0, %v1746_v58  ;;  %v2836_v9 = vld [vmem:[#allocation3 + $0x50] sm:$0x1] }
 0x145   : > { %2351 = vst.msk [vmem:[#allocation4 + $0x48] sm:$0xff] %vm8722_vm15, %v2321_v27  ;;  %v2837_v27 = vsel %vm5889_vm5, 0, %v2836_v9 }
 0x146   : > { %2838 = vst [vmem:[#allocation3 + $0x50] sm:$0x1] %v2837_v27 }
 0x147   : > { %v1824_v57 = vpop.permute.xlu0 %1823  ;;  %v1826_v60 = vpop.permute.xlu1 %1825 }
 0x148   : > { %v2366_v10 = vld [vmem:[#allocation4 + $0x40] sm:$0xff]  ;;  %v2116_v5 = vsel %vm2094_vm2, %v2078_v3, %v1824_v57  ;;  %v2118_v23 = vsel %vm2094_vm2, %v2081_v21, %v1826_v60 }
 0x149   : > { %5677 = vmatprep.mubr.msk.bf16.mxu0 %vm8722_vm15, %v2366_v10 }
 0x14b   : > { %v1859_v44 = vpop.permute.xlu0 %1858  ;;  %v1861_v24 = vpop.permute.xlu1 %1860 }
 0x14c   : > { %v2367_v26 = vld [vmem:[#allocation4 + $0x48] sm:$0xff]  ;;  %v2149_v17 = vsel %vm2127_vm4, %v2116_v5, %v1859_v44  ;;  %v2151_v18 = vsel %vm2127_vm4, %v2118_v23, %v1861_v24 }
 0x14d   : > { %5678 = vmatmul.mubr.msk.bf16.gmra.mrb[16].mxu0 %vm8722_vm15, %v2367_v26 }
 0x14f   : > { %v1894_v36 = vpop.permute.xlu0 %1893  ;;  %v1896_v50 = vpop.permute.xlu1 %1895 }
 0x150   : > { %v2182_v11 = vsel %vm2160_vm6, %v2149_v17, %v1894_v36  ;;  %v2184_v0 = vsel %vm2160_vm6, %v2151_v18, %v1896_v50 }
 0x153   : > { %v1929_v8 = vpop.permute.xlu0 %1928  ;;  %v1931_v6 = vpop.permute.xlu1 %1930 }
 0x154   : > { %v2215_v63 = vsel %vm2193_vm7, %v2182_v11, %v1929_v8  ;;  %v2217_v53 = vsel %vm2193_vm7, %v2184_v0, %v1931_v6 }
 0x157   : > { %v1964_v62 = vpop.permute.xlu0 %1963  ;;  %v1966_v16 = vpop.permute.xlu1 %1965 }
 0x158   : > { %v2248_v7 = vsel %vm2226_vm8, %v2215_v63, %v1964_v62  ;;  %v2250_v15 = vsel %vm2226_vm8, %v2217_v53, %v1966_v16  ;;  %v2794_v63 = vld [vmem:[#allocation3 + $0x60] sm:$0x1] }
 0x15b   : > { %v1999_v43 = vpop.permute.xlu0 %1998 }
 0x15c   : > { %v2001_v20 = vpop.permute.xlu1 %2000  ;;  %v2281_v33 = vsel %vm2259_vm10, %v2248_v7, %v1999_v43  ;;  %v2795_v7 = vsel %vm5874_vm3, 0, %v2794_v63 }
 0x15d   : > { %v2283_v49 = vsel %vm2259_vm10, %v2250_v15, %v2001_v20  ;;  %2796 = vst [vmem:[#allocation3 + $0x60] sm:$0x1] %v2795_v7 }
 0x15f   : > { %v2034_v45 = vpop.permute.xlu0 %2033 }
 0x160   : > { %v1748_v39 = vpop.permute.xlu1 %1747  ;;  %v2324_v22 = vsel %vm2292_vm11, %v2281_v33, %v2034_v45 }
 0x161   : > { %2352 = vst.msk [vmem:[#allocation4 + $0x50] sm:$0xff] %vm8722_vm15, %v2324_v22  ;;  %v2084_v34 = vsel %vm2045_vm1, %v6749_v59, %v1748_v39 }
 0x163   : > { %v2036_v48 = vpop.permute.xlu0 %2035 }
 0x164   : > { %v1750_v41 = vpop.permute.xlu1 %1749  ;;  %v2327_v42 = vsel %vm2292_vm11, %v2283_v49, %v2036_v48  ;;  %v2791_v49 = vld [vmem:[#allocation3 + $0x54] sm:$0x1] }
 0x165   : > { %2353 = vst.msk [vmem:[#allocation4 + $0x58] sm:$0xff] %vm8722_vm15, %v2327_v42  ;;  %v2087_v51 = vsel %vm2045_vm1, %v6807_v12, %v1750_v41  ;;  %v2792_v48 = vsel %vm5874_vm3, 0, %v2791_v49  ;;  %v2842_v41 = vld [vmem:[#allocation3 + $0x68] sm:$0x1] }
 0x166   : > { %2793 = vst [vmem:[#allocation3 + $0x54] sm:$0x1] %v2792_v48  ;;  %v2843_v42 = vsel %vm5889_vm5, 0, %v2842_v41  ;;  %v3292_v41 = vld [vmem:[#allocation3 + $0x18] sm:$0xf] }
 0x167   : > { %v1828_v32 = vpop.permute.xlu0 %1827  ;;  %2844 = vst [vmem:[#allocation3 + $0x68] sm:$0x1] %v2843_v42 }
 0x168   : > { %v1830_v29 = vpop.permute.xlu1 %1829  ;;  %v2368_v35 = vld [vmem:[#allocation4 + $0x50] sm:$0xff]  ;;  %v2120_v56 = vsel %vm2094_vm2, %v2084_v34, %v1828_v32  ;;  %v2840_v32 = vsel %vm5889_vm5, 0, %v2839_v61 }
 0x169   : > { %5681 = vmatprep.mubr.msk.bf16.mxu0 %vm8722_vm15, %v2368_v35  ;;  %v2122_v26 = vsel %vm2094_vm2, %v2087_v51, %v1830_v29  ;;  %2841 = vst [vmem:[#allocation3 + $0x5c] sm:$0x1] %v2840_v32  ;;  %v3285_v32 = vld [vmem:[#allocation3 + $0xc] sm:$0xf] }
 0x16b   : > { %v1863_v40 = vpop.permute.xlu0 %1862 }
 0x16c   : > { %v1865_v52 = vpop.permute.xlu1 %1864  ;;  %v2369_v58 = vld [vmem:[#allocation4 + $0x58] sm:$0xff]  ;;  %v2153_v44 = vsel %vm2127_vm4, %v2120_v56, %v1863_v40 }
 0x16d   : > { %5682 = vmatmul.mubr.msk.bf16.gmra.mrb[20].mxu0 %vm8722_vm15, %v2369_v58  ;;  %v2155_v59 = vsel %vm2127_vm4, %v2122_v26, %v1865_v52 }
 0x16f   : > { %v1898_v57 = vpop.permute.xlu0 %1897 }
 0x170   : > { %v1900_v31 = vpop.permute.xlu1 %1899  ;;  %v2186_v36 = vsel %vm2160_vm6, %v2153_v44, %v1898_v57  ;;  %v7197_v44 = vld [vmem:[%s8715_s2] ss:$0 sm:$0xff] }
 0x171   : > { %v2188_v12 = vsel %vm2160_vm6, %v2155_v59, %v1900_v31 }
 0x173   : > { %v1933_v60 = vpop.permute.xlu0 %1932 }
 0x174   : > { %v1935_v10 = vpop.permute.xlu1 %1934  ;;  %v2219_v8 = vsel %vm2193_vm7, %v2186_v36, %v1933_v60  ;;  %v7205_v36 = vld [vmem:[%s8716_s3] ss:$0 sm:$0xff] }
 0x175   : > { %v2221_v5 = vsel %vm2193_vm7, %v2188_v12, %v1935_v10 }
 0x177   : > { %v1968_v25 = vpop.permute.xlu0 %1967 }
 0x178   : > { %v1970_v38 = vpop.permute.xlu1 %1969  ;;  %v2252_v6 = vsel %vm2226_vm8, %v2219_v8, %v1968_v25 }
 0x179   : > { %v2254_v17 = vsel %vm2226_vm8, %v2221_v5, %v1970_v38 }
 0x17b   : > { %v2003_v24 = vpop.permute.xlu0 %2002 }
 0x17c   : > { %v2005_v50 = vpop.permute.xlu1 %2004  ;;  %v2285_v3 = vsel %vm2259_vm10, %v2252_v6, %v2003_v24 }
 0x17d   : > { %v2287_v43 = vsel %vm2259_vm10, %v2254_v17, %v2005_v50 }
 0x17f   : > { %v2038_v62 = vpop.permute.xlu0 %2037 }
 0x180   : > { %v1752_v16 = vpop.permute.xlu1 %1751  ;;  %v2330_v21 = vsel %vm2292_vm11, %v2285_v3, %v2038_v62 }
 0x181   : > { %2354 = vst.msk [vmem:[#allocation4 + $0x60] sm:$0xff] %vm8722_vm15, %v2330_v21  ;;  %v2090_v13 = vsel %vm2045_vm1, %v6871_v55, %v1752_v16  ;;  %v2800_v16 = vld [vmem:[#allocation3 + $0x78] sm:$0x1] }
 0x182   : > { %v2801_v17 = vsel %vm5874_vm3, 0, %v2800_v16 }
 0x183   : > { %v2040_v23 = vpop.permute.xlu0 %2039  ;;  %2802 = vst [vmem:[#allocation3 + $0x78] sm:$0x1] %v2801_v17 }
 0x184   : > { %v1754_v11 = vpop.permute.xlu1 %1753  ;;  %v2333_v20 = vsel %vm2292_vm11, %v2287_v43, %v2040_v23 }
 0x185   : > { %2355 = vst.msk [vmem:[#allocation4 + $0x68] sm:$0xff] %vm8722_vm15, %v2333_v20  ;;  %v2093_v29 = vsel %vm2045_vm1, %v6928_v19, %v1754_v11 }
 0x187   : > { %v1832_v18 = vpop.permute.xlu0 %1831 }
 0x188   : > { %v1834_v33 = vpop.permute.xlu1 %1833  ;;  %v2370_v45 = vld [vmem:[#allocation4 + $0x60] sm:$0xff]  ;;  %v2124_v9 = vsel %vm2094_vm2, %v2090_v13, %v1832_v18 }
 0x189   : > { %5685 = vmatprep.mubr.msk.bf16.mxu0 %vm8722_vm15, %v2370_v45  ;;  %v2126_v40 = vsel %vm2094_vm2, %v2093_v29, %v1834_v33 }
 0x18b   : > { %v1867_v0 = vpop.permute.xlu0 %1866 }
 0x18c   : > { %v1869_v39 = vpop.permute.xlu1 %1868  ;;  %v2371_v22 = vld [vmem:[#allocation4 + $0x68] sm:$0xff]  ;;  %v2157_v27 = vsel %vm2127_vm4, %v2124_v9, %v1867_v0 }
 0x18d   : > { %5686 = vmatmul.mubr.msk.bf16.gmra.mrb[24].mxu0 %vm8722_vm15, %v2371_v22  ;;  %v2159_v58 = vsel %vm2127_vm4, %v2126_v40, %v1869_v39 }
 0x18f   : > { %v1902_v53 = vpop.permute.xlu0 %1901 }
 0x190   : > { %v1904_v15 = vpop.permute.xlu1 %1903  ;;  %v2190_v46 = vsel %vm2160_vm6, %v2157_v27, %v1902_v53 }
 0x191   : > { %v2192_v19 = vsel %vm2160_vm6, %v2159_v58, %v1904_v15 }
 0x193   : > { %v1937_v28 = vpop.permute.xlu0 %1936 }
 0x194   : > { %v1939_v35 = vpop.permute.xlu1 %1938  ;;  %v2223_v31 = vsel %vm2193_vm7, %v2190_v46, %v1937_v28  ;;  %v2797_v46 = vld [vmem:[#allocation3 + $0x6c] sm:$0x1] }
 0x195   : > { %v2225_v55 = vsel %vm2193_vm7, %v2192_v19, %v1939_v35 }
 0x197   : > { %v1972_v37 = vpop.permute.xlu0 %1971 }
 0x198   : > { %v1974_v52 = vpop.permute.xlu1 %1973  ;;  %v2256_v60 = vsel %vm2226_vm8, %v2223_v31, %v1972_v37  ;;  %v3296_v37 = vld [vmem:[#allocation3 + $0x20] sm:$0x1] }
 0x199   : > { %v2258_v10 = vsel %vm2226_vm8, %v2225_v55, %v1974_v52  ;;  %v3289_v55 = vld [vmem:[#allocation3 + $0x14] sm:$0x1] }
 0x19b   : > { %v2007_v30 = vpop.permute.xlu0 %2006 }
 0x19c   : > { %v2009_v57 = vpop.permute.xlu1 %2008  ;;  %v2289_v34 = vsel %vm2259_vm10, %v2256_v60, %v2007_v30  ;;  %v2798_v60 = vsel %vm5874_vm3, 0, %v2797_v46 }
 0x19d   : > { %v2291_v38 = vsel %vm2259_vm10, %v2258_v10, %v2009_v57  ;;  %v2848_v10 = vld [vmem:[#allocation3 + $0x80] sm:$0x1]  ;;  %2799 = vst [vmem:[#allocation3 + $0x6c] sm:$0x1] %v2798_v60 }
 0x19f   : > { %v2042_v25 = vpop.permute.xlu0 %2041 }
 0x1a0   : > { %v2044_v51 = vpop.permute.xlu1 %2043  ;;  %v2336_v56 = vsel %vm2292_vm11, %v2289_v34, %v2042_v25 }
 0x1a1   : > { %v2339_v24 = vsel %vm2292_vm11, %v2291_v38, %v2044_v51  ;;  %2356 = vst.msk [vmem:[#allocation4 + $0x70] sm:$0xff] %vm8722_vm15, %v2336_v56  ;;  %v2849_v51 = vsel %vm5889_vm5, 0, %v2848_v10  ;;  %v2845_v56 = vld [vmem:[#allocation3 + $0x74] sm:$0x1] }
 0x1a2   : > { %2357 = vst.msk [vmem:[#allocation4 + $0x78] sm:$0xff] %vm8722_vm15, %v2339_v24  ;;  %v5663_v26 = vpop.f32.mrb[0].mxu0  ;;  %2850 = vst [vmem:[#allocation3 + $0x80] sm:$0x1] %v2849_v51 }
 0x1a3   : > { %v2632_v50 = vmul.f32 %v5663_v26, %v7197_v44  ;;  %v2496_v8 = vpop.f32.mrb[1].mxu0 }
 0x1a4   : > { %v2630_v6 = vmul.f32 %v7197_v44, %v2496_v8  ;;  %v5664_v59 = vpop.f32.mrb[2].mxu0 }
 0x1a5   : > { %v2671_v3 = vadd.f32 %v7205_v36, %v2632_v50  ;;  %v2633_v62 = vmul.f32 %v5664_v59, %v7197_v44  ;;  %v2499_v12 = vpop.f32.mrb[3].mxu0  ;;  %v2846_v50 = vsel %vm5889_vm5, 0, %v2845_v56 }
 0x1a6   : > { %v2669_v21 = vadd.f32 %v7205_v36, %v2630_v6  ;;  %v2631_v5 = vmul.f32 %v7197_v44, %v2499_v12  ;;  %2847 = vst [vmem:[#allocation3 + $0x74] sm:$0x1] %v2846_v50 }
 0x1a7   : > { %v2703_v43 = vmax.f32 %v2671_v3, 0.0  ;;  %v2672_v23 = vadd.f32 %v7205_v36, %v2633_v62 }
 0x1a8   : > { %v2701_v11 = vmax.f32 %v2669_v21, 0.0  ;;  %v2670_v20 = vadd.f32 %v7205_v36, %v2631_v5  ;;  %v2372_v63 = vld [vmem:[#allocation4 + $0x70] sm:$0xff] }
 0x1a9   : > { %v5579_v7 = vpack.c.bf16 %v2703_v43, %v2703_v43  ;;  %v2704_v18 = vmax.f32 %v2672_v23, 0.0  ;;  %5689 = vmatprep.mubr.msk.bf16.mxu0 %vm8722_vm15, %v2372_v63  ;;  %v2373_v33 = vld [vmem:[#allocation4 + $0x78] sm:$0xff] }
 0x1aa   : > { %v5577_v45 = vpack.c.bf16 %v2701_v11, %v2701_v11  ;;  %v2702_v0 = vmax.f32 %v2670_v20, 0.0  ;;  %5690 = vmatmul.mubr.msk.bf16.gmra.mrb[28].mxu0 %vm8722_vm15, %v2373_v33 }
 0x1ab   : > { %v2983_v39 = vshrl.u32 %v5579_v7, 16  ;;  %v5580_v22 = vpack.c.bf16 %v2704_v18, %v2704_v18  ;;  %v2986_v48 = vshll.u32 %v5579_v7, 16 }
 0x1ac   : > { %v2966_v53 = vshrl.u32 %v5577_v45, 16  ;;  %v5578_v15 = vpack.c.bf16 %v2702_v0, %v2702_v0  ;;  %v2969_v28 = vshll.u32 %v5577_v45, 16 }
 0x1ad   : > { %v2985_v49 = vrot.slane %v2983_v39, 7  ;;  %v2991_v42 = vshrl.u32 %v5580_v22, 16  ;;  %v2994_v40 = vshll.u32 %v5580_v22, 16 }
 0x1ae   : > { %v2968_v61 = vrot.slane %v2966_v53, 7  ;;  %v2974_v29 = vshrl.u32 %v5578_v15, 16  ;;  %v2977_v9 = vshll.u32 %v5578_v15, 16 }
 0x1af   : > { %v2988_v35 = vor.u32 %v2986_v48, %v2985_v49  ;;  %v2993_v13 = vrot.slane %v2991_v42, 7  ;;  %v2989_v52 = vrot.slane %v2985_v49, 4 }
 0x1b0   : > { %v2971_v58 = vor.u32 %v2969_v28, %v2968_v61  ;;  %v2972_v27 = vrot.slane %v2968_v61, 4  ;;  %v2976_v30 = vrot.slane %v2974_v29, 7 }
 0x1b1   : > { %v3293_v57 = vsel %vm5942_vm13, %v2988_v35, %v3292_v41  ;;  %v2996_v19 = vor.u32 %v2994_v40, %v2993_v13  ;;  %v2998_v31 = vrot.slane %v2993_v13, 4 }
 0x1b2   : > { %3294 = vst [vmem:[#allocation3 + $0x18] sm:$0xf] %v3293_v57  ;;  %v3286_v34 = vsel %vm5942_vm13, %v2971_v58, %v3285_v32  ;;  %v2979_v25 = vor.u32 %v2977_v9, %v2976_v30  ;;  %v2981_v38 = vrot.slane %v2976_v30, 4 }
 0x1b3   : > { %3287 = vst [vmem:[#allocation3 + $0xc] sm:$0xf] %v3286_v34  ;;  %v2997_v24 = vsel %vm5953_vm14, %v2989_v52, %v2996_v19  ;;  %v3297_v26 = vsel %vm5874_vm3, %v2998_v31, %v3296_v37 }
 0x1b4   : > { %3295 = vst.msk [vmem:[#allocation3 + $0x1c] sm:$0xf] %vm280_vm0, %v2997_v24  ;;  %3298 = vst [vmem:[#allocation3 + $0x20] sm:$0x1] %v3297_v26  ;;  %v2980_v8 = vsel %vm5953_vm14, %v2972_v27, %v2979_v25  ;;  %v3290_v6 = vsel %vm5874_vm3, %v2981_v38, %v3289_v55 }
 0x1b5   : > { %3288 = vst.msk [vmem:[#allocation3 + $0x10] sm:$0xf] %vm280_vm0, %v2980_v8  ;;  %3291 = vst [vmem:[#allocation3 + $0x14] sm:$0x1] %v3290_v6 }
 0x1b9   : > { %v3403_v59 = vld [vmem:[#allocation3 + $0x18] sm:$0xf] }
 0x1ba   : > { %v5448_v43 = vrot.slane %v3403_v59, 9  ;;  %v7257_v20 = vld [vmem:[#allocation3 + $0xc] sm:$0xf]  ;;  %v3500_v9 = vshrl.u32 %v3403_v59, 16  ;;  %v3503_v52 = vshll.u32 %v3403_v59, 16 }
 0x1bb   : > { %v7239_v3 = vld [vmem:[#allocation3 + $0x1c] sm:$0xf]  ;;  %v7241_v62 = vld [vmem:[#allocation3 + $0x20] sm:$0x1]  ;;  %v5447_v48 = vrot.slane %v7257_v20, 9  ;;  %v3476_v19 = vshrl.u32 %v7257_v20, 16 }
 0x1bc   : > { %v7244_v12 = vcombine.low %v3403_v59, %v7239_v3  ;;  %v7246_v16 = vld [vmem:[#allocation3 + $0x10] sm:$0xf]  ;;  %v3899_v21 = vrot.slane %v7239_v3, 5  ;;  %v7249_v5 = vld [vmem:[#allocation3 + $0x14] sm:$0x1]  ;;  %v3902_v11 = vrot.slane %v7241_v62, 5 }
 0x1bd   : > { %v3892_v17 = vrot.slane %v7246_v16, 5  ;;  %v7261_v18 = vcombine.low %v7257_v20, %v7246_v16  ;;  %v3895_v0 = vrot.slane %v7249_v5, 5  ;;  %v3513_v30 = vshrl.u32 %v7239_v3, 16 }
 0x1be   : > { %4276 = vrot.lane.b32.xlu1 %v7244_v12, %s5815_s9  ;;  %4379 = vrot.lane.b32.xlu0 %v7244_v12, %s5816_s10  ;;  %v3901_v23 = vrot.slane %v3899_v21, 4  ;;  %v3900_v33 = vsel %vm5912_vm9, %v5448_v43, %v3899_v21  ;;  %v3479_v55 = vshll.u32 %v7257_v20, 16  ;;  %v3509_v10 = vshll.u32 %v7239_v3, 16  ;;  %v3306_v3 = vld [vmem:[#allocation3 + $0x30] sm:$0xf] }
 0x1bf   : > { %v3894_v63 = vrot.slane %v3892_v17, 4  ;;  %v3893_v35 = vsel %vm5912_vm9, %v5447_v48, %v3892_v17  ;;  %v3489_v38 = vshrl.u32 %v7246_v16, 16  ;;  %v3485_v51 = vshll.u32 %v7246_v16, 16  ;;  %v2806_v17 = vld [vmem:[#allocation3 + $0x90] sm:$0x1] }
 0x1c0   : > { %v5667_v7 = vpop.f32.mrb[4].mxu0  ;;  %v3903_v45 = vsel %vm5912_vm9, %v3901_v23, %v3902_v11  ;;  %v7293_v26 = vrot.slane %v3500_v9, 4  ;;  %v7295_v50 = vrot.slane %v3503_v52, 5  ;;  %v3515_v21 = vrot.slane %v3513_v30, 4 }
 0x1c1   : > { %v2636_v39 = vmul.f32 %v5667_v7, %v7197_v44  ;;  %v2512_v22 = vpop.f32.mrb[5].mxu0  ;;  %v5498_v53 = vcombine.low %v3900_v33, %v3903_v45  ;;  %v3896_v41 = vsel %vm5912_vm9, %v3894_v63, %v3895_v0  ;;  %v7297_v63 = vrot.slane %v3509_v10, 5  ;;  %v3299_v7 = vld [vmem:[#allocation3 + $0x24] sm:$0xf] }
 0x1c2   : > { %v2634_v15 = vmul.f32 %v7197_v44, %v2512_v22  ;;  %v5668_v49 = vpop.f32.mrb[6].mxu0  ;;  %4274 = vrot.lane.b32.xlu0 %v7261_v18, %s5815_s9  ;;  %v5497_v37 = vcombine.low %v3893_v35, %v3896_v41  ;;  %v7299_v0 = vrot.slane %v3485_v51, 5  ;;  %v3310_v22 = vld [vmem:[#allocation3 + $0x38] sm:$0x1]  ;;  %v3491_v52 = vrot.slane %v3489_v38, 4 }
 0x1c3   : > { %v2675_v42 = vadd.f32 %v7205_v36, %v2636_v39  ;;  %v2637_v61 = vmul.f32 %v5668_v49, %v7197_v44  ;;  %4346 = vrot.lane.b32.xlu1 %v5498_v53, %s5817_s13  ;;  %v2515_v28 = vpop.f32.mrb[7].mxu0  ;;  %v2807_v49 = vsel %vm5874_vm3, 0, %v2806_v17  ;;  %v3478_v10 = vrot.slane %v3476_v19, 4 }
 0x1c4   : > { %v2673_v32 = vadd.f32 %v7205_v36, %v2634_v15  ;;  %v2635_v29 = vmul.f32 %v7197_v44, %v2515_v28  ;;  %v3303_v28 = vld [vmem:[#allocation3 + $0x2c] sm:$0x1]  ;;  %2808 = vst [vmem:[#allocation3 + $0x90] sm:$0x1] %v2807_v49  ;;  %v3519_v38 = vshll.u32 %v7241_v62, 16  ;;  %v3506_v51 = vor.u32 %v7295_v50, %v7293_v26 }
 0x1c5   : > { %v2707_v13 = vmax.f32 %v2675_v42, 0.0  ;;  %v2676_v40 = vadd.f32 %v7205_v36, %v2637_v61 }
 0x1c6   : > { %v2705_v58 = vmax.f32 %v2673_v32, 0.0  ;;  %v2674_v27 = vadd.f32 %v7205_v36, %v2635_v29  ;;  %4449 = vrot.lane.b32.xlu0 %v5498_v53, %s5818_s16 }
 0x1c7   : > { %v5583_v46 = vpack.c.bf16 %v2707_v13, %v2707_v13  ;;  %v2708_v57 = vmax.f32 %v2676_v40, 0.0  ;;  %4241 = vrot.lane.b32.xlu1 %v5497_v37, %s5813_s30  ;;  %v2803_v40 = vld [vmem:[#allocation3 + $0x84] sm:$0x1] }
 0x1c8   : > { %v5581_v31 = vpack.c.bf16 %v2705_v58, %v2705_v58  ;;  %v2706_v60 = vmax.f32 %v2674_v27, 0.0  ;;  %v2804_v58 = vsel %vm5874_vm3, 0, %v2803_v40  ;;  %v2854_v27 = vld [vmem:[#allocation3 + $0x98] sm:$0x1] }
 0x1c9   : > { %v3017_v34 = vshrl.u32 %v5583_v46, 16  ;;  %v5584_v25 = vpack.c.bf16 %v2708_v57, %v2708_v57  ;;  %v3020_v6 = vshll.u32 %v5583_v46, 16  ;;  %2805 = vst [vmem:[#allocation3 + $0x84] sm:$0x1] %v2804_v58  ;;  %v2855_v57 = vsel %vm5889_vm5, 0, %v2854_v27 }
 0x1ca   : > { %v3000_v56 = vshrl.u32 %v5581_v31, 16  ;;  %v5582_v24 = vpack.c.bf16 %v2706_v60, %v2706_v60  ;;  %4243 = vrot.lane.b32.xlu0 %v5498_v53, %s5813_s30  ;;  %v3003_v23 = vshll.u32 %v5581_v31, 16  ;;  %v2851_v31 = vld [vmem:[#allocation3 + $0x8c] sm:$0x1]  ;;  %v3516_v60 = vor.u32 %v3515_v21, %v7297_v63  ;;  %2856 = vst [vmem:[#allocation3 + $0x98] sm:$0x1] %v2855_v57 }
 0x1cb   : > { %v3019_v8 = vrot.slane %v3017_v34, 7  ;;  %v3025_v59 = vshrl.u32 %v5584_v25, 16  ;;  %v3028_v45 = vshll.u32 %v5584_v25, 16  ;;  %v3481_v34 = vrot.slane %v3479_v55, 5 }
 0x1cc   : > { %v3002_v43 = vrot.slane %v3000_v56, 7  ;;  %v3008_v11 = vshrl.u32 %v5582_v24, 16  ;;  %v3011_v15 = vshll.u32 %v5582_v24, 16  ;;  %v2852_v25 = vsel %vm5889_vm5, 0, %v2851_v31 }
 0x1cd   : > { %v3022_v16 = vor.u32 %v3020_v6, %v3019_v8  ;;  %v3027_v33 = vrot.slane %v3025_v59, 7  ;;  %v3023_v48 = vrot.slane %v3019_v8, 4  ;;  %2853 = vst [vmem:[#allocation3 + $0x8c] sm:$0x1] %v2852_v25  ;;  %v3492_v56 = vor.u32 %v3491_v52, %v7299_v0 }
 0x1ce   : > { %v3005_v39 = vor.u32 %v3003_v23, %v3002_v43  ;;  %v3010_v53 = vrot.slane %v3008_v11, 7  ;;  %4344 = vrot.lane.b32.xlu0 %v5497_v37, %s5817_s13  ;;  %v3006_v32 = vrot.slane %v3002_v43, 4  ;;  %v3517_v24 = vrot.slane %v3516_v60, 4  ;;  %v2812_v60 = vld [vmem:[#allocation3 + $0xa8] sm:$0x1] }
 0x1cf   : > { %v3307_v41 = vsel %vm5942_vm13, %v3022_v16, %v3306_v3  ;;  %v3030_v42 = vor.u32 %v3028_v45, %v3027_v33  ;;  %v3032_v61 = vrot.slane %v3027_v33, 4  ;;  %v3482_v8 = vor.u32 %v3481_v34, %v3478_v10 }
 0x1d0   : > { %3308 = vst [vmem:[#allocation3 + $0x30] sm:$0xf] %v3307_v41  ;;  %v3300_v29 = vsel %vm5942_vm13, %v3005_v39, %v3299_v7  ;;  %v3013_v35 = vor.u32 %v3011_v15, %v3010_v53  ;;  %v3015_v13 = vrot.slane %v3010_v53, 4  ;;  %v3495_v6 = vshll.u32 %v7249_v5, 16 }
 0x1d1   : > { %3301 = vst [vmem:[#allocation3 + $0x24] sm:$0xf] %v3300_v29  ;;  %v3031_v37 = vsel %vm5953_vm14, %v3023_v48, %v3030_v42  ;;  %v3311_v9 = vsel %vm5874_vm3, %v3032_v61, %v3310_v22  ;;  %v3521_v59 = vrot.slane %v3519_v38, 5  ;;  %v3507_v55 = vrot.slane %v3506_v51, 4 }
 0x1d2   : > { %3309 = vst.msk [vmem:[#allocation3 + $0x34] sm:$0xf] %vm280_vm0, %v3031_v37  ;;  %3312 = vst [vmem:[#allocation3 + $0x38] sm:$0x1] %v3311_v9  ;;  %v3014_v30 = vsel %vm5953_vm14, %v3006_v32, %v3013_v35  ;;  %v3304_v46 = vsel %vm5874_vm3, %v3015_v13, %v3303_v28  ;;  %v3493_v21 = vrot.slane %v3492_v56, 4  ;;  %v3483_v50 = vrot.slane %v3482_v8, 4 }
 0x1d3   : > { %3302 = vst.msk [vmem:[#allocation3 + $0x28] sm:$0xf] %vm280_vm0, %v3014_v30  ;;  %3305 = vst [vmem:[#allocation3 + $0x2c] sm:$0x1] %v3304_v46  ;;  %v3522_v26 = vsel %vm5935_vm12, %v3517_v24, %v3521_v59  ;;  %v3497_v17 = vrot.slane %v3495_v6, 5  ;;  %v3512_v5 = vsel %vm5935_vm12, %v3507_v55, %v7297_v63  ;;  %v2813_v8 = vsel %vm5874_vm3, 0, %v2812_v60 }
 0x1d4   : > { %v5482_v43 = vcombine.low %v3512_v5, %v3522_v26  ;;  %v3488_v16 = vsel %vm5935_vm12, %v3483_v50, %v7299_v0  ;;  %2814 = vst [vmem:[#allocation3 + $0xa8] sm:$0x1] %v2813_v8 }
 0x1d5   : > { %v3498_v3 = vsel %vm5935_vm12, %v3493_v21, %v3497_v17 }
 0x1d6   : > { %v5481_v45 = vcombine.low %v3488_v16, %v3498_v3 }
 0x1d7   : > { %v7332_v20 = vld [vmem:[#allocation3 + $0x30] sm:$0xf] }
 0x1d8   : > { %v7351_v23 = vld [vmem:[#allocation3 + $0x24] sm:$0xf]  ;;  %v3548_v33 = vshrl.u32 %v7332_v20, 16  ;;  %v3551_v39 = vshll.u32 %v7332_v20, 16  ;;  %v5450_v0 = vrot.slane %v7332_v20, 9 }
 0x1d9   : > { %v7334_v19 = vld [vmem:[#allocation3 + $0x34] sm:$0xf]  ;;  %v3524_v15 = vshrl.u32 %v7351_v23, 16  ;;  %v7365_v49 = vld [vmem:[#allocation3 + $0x38] sm:$0x1]  ;;  %v3527_v42 = vshll.u32 %v7351_v23, 16 }
 0x1da   : > { %v7338_v62 = vcombine.low %v7332_v20, %v7334_v19  ;;  %v7353_v11 = vld [vmem:[#allocation3 + $0x28] sm:$0xf]  ;;  %v3913_v7 = vrot.slane %v7334_v19, 5  ;;  %v3561_v32 = vshrl.u32 %v7334_v19, 16  ;;  %v7378_v37 = vld [vmem:[#allocation3 + $0x2c] sm:$0x1] }
 0x1db   : > { %v7372_v61 = vcombine.low %v7351_v23, %v7353_v11  ;;  %v3906_v28 = vrot.slane %v7353_v11, 5  ;;  %v3537_v58 = vshrl.u32 %v7353_v11, 16  ;;  %v3916_v27 = vrot.slane %v7365_v49, 5 }
 0x1dc   : > { %4280 = vrot.lane.b32.xlu1 %v7338_v62, %s5815_s9  ;;  %4383 = vrot.lane.b32.xlu0 %v7338_v62, %s5816_s10  ;;  %v3915_v40 = vrot.slane %v3913_v7, 4  ;;  %v3914_v57 = vsel %vm5912_vm9, %v5450_v0, %v3913_v7  ;;  %v5449_v31 = vrot.slane %v7351_v23, 9  ;;  %v3909_v38 = vrot.slane %v7378_v37, 5 }
 0x1dd   : > { %v3908_v25 = vrot.slane %v3906_v28, 4  ;;  %v7400_v20 = vrot.slane %v3548_v33, 4  ;;  %v3557_v55 = vshll.u32 %v7334_v19, 16  ;;  %v7405_v17 = vrot.slane %v3551_v39, 5  ;;  %v3320_v19 = vld [vmem:[#allocation3 + $0x48] sm:$0xf] }
 0x1de   : > { %v3917_v24 = vsel %vm5912_vm9, %v3915_v40, %v3916_v27  ;;  %v3907_v50 = vsel %vm5912_vm9, %v5449_v31, %v3906_v28  ;;  %v7407_v7 = vrot.slane %v3561_v32, 4  ;;  %v3313_v28 = vld [vmem:[#allocation3 + $0x3c] sm:$0xf]  ;;  %v3324_v40 = vld [vmem:[#allocation3 + $0x50] sm:$0x1]  ;;  %v3539_v27 = vrot.slane %v3537_v58, 4 }
 0x1df   : > { %v5500_v16 = vcombine.low %v3914_v57, %v3917_v24  ;;  %v3910_v33 = vsel %vm5912_vm9, %v3908_v25, %v3909_v38  ;;  %v7413_v39 = vrot.slane %v3557_v55, 5  ;;  %v3317_v31 = vld [vmem:[#allocation3 + $0x44] sm:$0x1]  ;;  %v2860_v24 = vld [vmem:[#allocation3 + $0xb0] sm:$0x1] }
 0x1e0   : > { %4311 = vrot.lane.b32.xlu1 %v5482_v43, %s5819_s19  ;;  %4414 = vrot.lane.b32.xlu0 %v5482_v43, %s5820_s22  ;;  %v5671_v63 = vpop.f32.mrb[8].mxu0  ;;  %v2861_v55 = vsel %vm5889_vm5, 0, %v2860_v24 }
 0x1e1   : > { %v2640_v22 = vmul.f32 %v5671_v63, %v7197_v44  ;;  %v2528_v53 = vpop.f32.mrb[9].mxu0  ;;  %2862 = vst [vmem:[#allocation3 + $0xb0] sm:$0x1] %v2861_v55 }
 0x1e2   : > { %v2638_v48 = vmul.f32 %v7197_v44, %v2528_v53  ;;  %v5672_v41 = vpop.f32.mrb[10].mxu0 }
 0x1e3   : > { %v2679_v29 = vadd.f32 %v7205_v36, %v2640_v22  ;;  %v2641_v35 = vmul.f32 %v5672_v41, %v7197_v44  ;;  %v2531_v13 = vpop.f32.mrb[11].mxu0 }
 0x1e4   : > { %v2677_v9 = vadd.f32 %v7205_v36, %v2638_v48  ;;  %v2639_v52 = vmul.f32 %v7197_v44, %v2531_v13  ;;  %4381 = vrot.lane.b32.xlu1 %v7372_v61, %s5816_s10  ;;  %4278 = vrot.lane.b32.xlu0 %v7372_v61, %s5815_s9 }
 0x1e5   : > { %v2711_v30 = vmax.f32 %v2679_v29, 0.0  ;;  %v2680_v46 = vadd.f32 %v7205_v36, %v2641_v35  ;;  %v3533_v35 = vshll.u32 %v7353_v11, 16  ;;  %v2809_v11 = vld [vmem:[#allocation3 + $0x9c] sm:$0x1] }
 0x1e6   : > { %v2709_v10 = vmax.f32 %v2677_v9, 0.0  ;;  %v2678_v34 = vadd.f32 %v7205_v36, %v2639_v52 }
 0x1e7   : > { %v5587_v51 = vpack.c.bf16 %v2711_v30, %v2711_v30  ;;  %v2712_v56 = vmax.f32 %v2680_v46, 0.0 }
 0x1e8   : > { %v5585_v6 = vpack.c.bf16 %v2709_v10, %v2709_v10  ;;  %v2710_v59 = vmax.f32 %v2678_v34, 0.0  ;;  %4163 = vrot.lane.b32.xlu1 %v5482_v43, %s5814_s8  ;;  %4309 = vrot.lane.b32.xlu0 %v5481_v45, %s5819_s19 }
 0x1e9   : > { %v3051_v21 = vshrl.u32 %v5587_v51, 16  ;;  %v5588_v26 = vpack.c.bf16 %v2712_v56, %v2712_v56  ;;  %v3054_v63 = vshll.u32 %v5587_v51, 16  ;;  %v3535_v51 = vrot.slane %v3533_v35, 5 }
 0x1ea   : > { %v3034_v5 = vshrl.u32 %v5585_v6, 16  ;;  %v5586_v3 = vpack.c.bf16 %v2710_v59, %v2710_v59  ;;  %v3037_v0 = vshll.u32 %v5585_v6, 16  ;;  %v2810_v56 = vsel %vm5874_vm3, 0, %v2809_v11 }
 0x1eb   : > { %v3053_v43 = vrot.slane %v3051_v21, 7  ;;  %v3059_v22 = vshrl.u32 %v5588_v26, 16  ;;  %v3062_v29 = vshll.u32 %v5588_v26, 16  ;;  %v5499_v59 = vcombine.low %v3907_v50, %v3910_v33  ;;  %2811 = vst [vmem:[#allocation3 + $0x9c] sm:$0x1] %v2810_v56 }
 0x1ec   : > { %v3036_v53 = vrot.slane %v3034_v5, 7  ;;  %v3042_v48 = vshrl.u32 %v5586_v3, 16  ;;  %4161 = vrot.lane.b32.xlu1 %v5481_v45, %s5814_s8  ;;  %4453 = vrot.lane.b32.xlu0 %v5500_v16, %s5818_s16  ;;  %v3045_v52 = vshll.u32 %v5586_v3, 16  ;;  %v2857_v21 = vld [vmem:[#allocation3 + $0xa4] sm:$0x1]  ;;  %v3564_v26 = vor.u32 %v7407_v7, %v7413_v39  ;;  %v5788_v7 = vld [vmem:[%s8717_s4] sm:$0xff]  }
 0x1ed   : > { %v3056_v41 = vor.u32 %v3054_v63, %v3053_v43  ;;  %v3061_v32 = vrot.slane %v3059_v22, 7  ;;  %v3057_v30 = vrot.slane %v3053_v43, 4  ;;  %v3526_v5 = vrot.slane %v3524_v15, 4  ;;  %5693 = vmatprep.subr.bf16.mxu1 %v5788_v7 }
 0x1ee   : > { %v3039_v13 = vor.u32 %v3037_v0, %v3036_v53  ;;  %v3044_v9 = vrot.slane %v3042_v48, 7  ;;  %v3040_v60 = vrot.slane %v3036_v53, 4  ;;  %v3529_v3 = vrot.slane %v3527_v42, 5  ;;  %5694 = vmatpush3.bf16.msra.mxu1 %v5788_v7 }
 0x1ef   : > { %v3321_v46 = vsel %vm5942_vm13, %v3056_v41, %v3320_v19  ;;  %v3064_v45 = vor.u32 %v3062_v29, %v3061_v32  ;;  %v3066_v57 = vrot.slane %v3061_v32, 4  ;;  %v2858_v50 = vsel %vm5889_vm5, 0, %v2857_v21 }
 0x1f0   : > { %3322 = vst [vmem:[#allocation3 + $0x48] sm:$0xf] %v3321_v46  ;;  %v3314_v10 = vsel %vm5942_vm13, %v3039_v13, %v3313_v28  ;;  %v3047_v34 = vor.u32 %v3045_v52, %v3044_v9  ;;  %v3049_v25 = vrot.slane %v3044_v9, 4  ;;  %4350 = vrot.lane.b32.xlu1 %v5500_v16, %s5817_s13  ;;  %4247 = vrot.lane.b32.xlu0 %v5500_v16, %s5813_s30  ;;  %v3567_v16 = vshll.u32 %v7365_v49, 16  ;;  %v5789_v49 = vld [vmem:[%s8717_s4 + $0x8] sm:$0xff]  }
 0x1f1   : > { %3315 = vst [vmem:[#allocation3 + $0x3c] sm:$0xf] %v3314_v10  ;;  %v3065_v58 = vsel %vm5953_vm14, %v3057_v30, %v3064_v45  ;;  %v3325_v38 = vsel %vm5874_vm3, %v3066_v57, %v3324_v40  ;;  %2859 = vst [vmem:[#allocation3 + $0xa4] sm:$0x1] %v2858_v50  ;;  %v3554_v15 = vor.u32 %v7405_v17, %v7400_v20  ;;  %v3565_v42 = vrot.slane %v3564_v26, 4 }
 0x1f2   : > { %3323 = vst.msk [vmem:[#allocation3 + $0x4c] sm:$0xf] %vm280_vm0, %v3065_v58  ;;  %3326 = vst [vmem:[#allocation3 + $0x50] sm:$0x1] %v3325_v38  ;;  %v3048_v8 = vsel %vm5953_vm14, %v3040_v60, %v3047_v34  ;;  %v3318_v6 = vsel %vm5874_vm3, %v3049_v25, %v3317_v31  ;;  %v3540_v23 = vor.u32 %v3539_v27, %v3535_v51  ;;  %v3543_v63 = vshll.u32 %v7378_v37, 16 }
 0x1f3   : > { %3316 = vst.msk [vmem:[#allocation3 + $0x40] sm:$0xf] %vm280_vm0, %v3048_v8  ;;  %3319 = vst [vmem:[#allocation3 + $0x44] sm:$0x1] %v3318_v6  ;;  %v3530_v43 = vor.u32 %v3529_v3, %v3526_v5  ;;  %v3569_v22 = vrot.slane %v3567_v16, 5  ;;  %v3555_v53 = vrot.slane %v3554_v15, 4  ;;  %5695 = vmatprep.subr.bf16.mxu1 %v5789_v49 }
 0x1f4   : > { %4245 = vrot.lane.b32.xlu1 %v5499_v59, %s5813_s30  ;;  %4451 = vrot.lane.b32.xlu0 %v5499_v59, %s5818_s16  ;;  %v3541_v20 = vrot.slane %v3540_v23, 4  ;;  %v3545_v48 = vrot.slane %v3543_v63, 5  ;;  %v2818_v3 = vld [vmem:[#allocation3 + $0xc0] sm:$0x1] }
 0x1f5   : > { %v3570_v37 = vsel %vm5935_vm12, %v3565_v42, %v3569_v22  ;;  %v3531_v0 = vrot.slane %v3530_v43, 4  ;;  %5696 = vmatpush3.bf16.msra.mxu1 %v5789_v49  ;;  %v3560_v41 = vsel %vm5935_vm12, %v3555_v53, %v7413_v39 }
 0x1f6   : > { %v3546_v28 = vsel %vm5935_vm12, %v3541_v20, %v3545_v48  ;;  %v5484_v32 = vcombine.low %v3560_v41, %v3570_v37 }
 0x1f7   : > { %v7457_v33 = vld [vmem:[#allocation3 + $0x48] sm:$0xf]  ;;  %v3536_v40 = vsel %vm5935_vm12, %v3531_v0, %v3535_v51 }
 0x1f8   : > { %4348 = vrot.lane.b32.xlu0 %v5499_v59, %s5817_s13  ;;  %v7476_v29 = vld [vmem:[#allocation3 + $0x3c] sm:$0xf]  ;;  %v3596_v9 = vshrl.u32 %v7457_v33, 16  ;;  %v3599_v52 = vshll.u32 %v7457_v33, 16  ;;  %v7487_v27 = vcombine.low %v3536_v40, %v3546_v28  ;;  %v5452_v46 = vrot.slane %v7457_v33, 9 }
 0x1f9   : > { %v7459_v19 = vld [vmem:[#allocation3 + $0x4c] sm:$0xf]  ;;  %v7489_v30 = vld [vmem:[#allocation3 + $0x50] sm:$0x1]  ;;  %v3572_v31 = vshrl.u32 %v7476_v29, 16  ;;  %v3575_v60 = vshll.u32 %v7476_v29, 16 }
 0x1fa   : > { %v7463_v17 = vcombine.low %v7457_v33, %v7459_v19  ;;  %v7478_v35 = vld [vmem:[#allocation3 + $0x40] sm:$0xf]  ;;  %v3927_v13 = vrot.slane %v7459_v19, 5  ;;  %v3609_v34 = vshrl.u32 %v7459_v19, 16  ;;  %v7502_v51 = vld [vmem:[#allocation3 + $0x44] sm:$0x1] }
 0x1fb   : > { %v3920_v10 = vrot.slane %v7478_v35, 5  ;;  %v7500_v58 = vcombine.low %v7476_v29, %v7478_v35  ;;  %v3585_v6 = vshrl.u32 %v7478_v35, 16  ;;  %v3930_v59 = vrot.slane %v7489_v30, 5 }
 0x1fc   : > { %8743 = vst [vmem:[#allocation6_spill] sm:$0xff] %v7463_v17  ;;  %4284 = vrot.lane.b32.xlu1 %v7463_v17, %s5815_s9  ;;  %4387 = vrot.lane.b32.xlu0 %v7463_v17, %s5816_s10  ;;  %v3929_v38 = vrot.slane %v3927_v13, 4  ;;  %v3928_v26 = vsel %vm5912_vm9, %v5452_v46, %v3927_v13  ;;  %v5451_v5 = vrot.slane %v7476_v29, 9  ;;  %v3923_v15 = vrot.slane %v7502_v51, 5 }
 0x1fd   : > { %8744 = vst [vmem:[#allocation7_spill] sm:$0xff] %v7500_v58  ;;  %v3922_v7 = vrot.slane %v3920_v10, 4  ;;  %v3605_v43 = vshll.u32 %v7459_v19, 16  ;;  %v7523_v49 = vrot.slane %v3596_v9, 4  ;;  %v2819_v33 = vsel %vm5874_vm3, 0, %v2818_v3  ;;  %v5791_v19 = vld [vmem:[%s8717_s4 + $0x10] sm:$0xff]  }
 0x1fe   : > { %v3931_v42 = vsel %vm5912_vm9, %v3929_v38, %v3930_v59  ;;  %v7532_v37 = vrot.slane %v3599_v52, 5  ;;  %2820 = vst [vmem:[#allocation3 + $0xc0] sm:$0x1] %v2819_v33  ;;  %v7539_v28 = vrot.slane %v3609_v34, 4  ;;  %5697 = vmatprep.subr.bf16.mxu1 %v5791_v19  ;;  %v3338_v38 = vld [vmem:[#allocation3 + $0x68] sm:$0x1] }
 0x1ff   : > { %v7537_v41 = vcombine.low %v3928_v26, %v3931_v42  ;;  %v3924_v9 = vsel %vm5912_vm9, %v3922_v7, %v3923_v15  ;;  %5698 = vmatpush3.bf16.msra.mxu1 %v5791_v19  ;;  %v2815_v26 = vld [vmem:[#allocation3 + $0xb4] sm:$0x1]  ;;  %v2866_v7 = vld [vmem:[#allocation3 + $0xc8] sm:$0x1]  ;;  %v3331_v42 = vld [vmem:[#allocation3 + $0x5c] sm:$0x1] }
 0x200   : > { %4315 = vrot.lane.b32.xlu1 %v5484_v32, %s5819_s19  ;;  %4418 = vrot.lane.b32.xlu0 %v5484_v32, %s5820_s22  ;;  %v5675_v39 = vpop.f32.mrb[12].mxu0  ;;  %v5794_v19 = vld [vmem:[%s8717_s4 + $0x20] ss:$0 sps:$4 sm:$0xff]  }
 0x201   : > { %v2644_v45 = vmul.f32 %v5675_v39, %v7197_v44  ;;  %v2544_v57 = vpop.f32.mrb[13].mxu0  ;;  %v7543_v39 = vrot.slane %v3605_v43, 5  ;;  %v2867_v43 = vsel %vm5889_vm5, 0, %v2866_v7 }
 0x202   : > { %v2642_v25 = vmul.f32 %v7197_v44, %v2544_v57  ;;  %v5676_v11 = vpop.f32.mrb[14].mxu0  ;;  %2868 = vst [vmem:[#allocation3 + $0xc8] sm:$0x1] %v2867_v43  ;;  %v7649_v43 = vld [vmem:[%s8716_s3] ss:$0 sm:$0xff] }
 0x203   : > { %v2683_v56 = vadd.f32 %v7205_v36, %v2644_v45  ;;  %v2645_v24 = vmul.f32 %v5676_v11, %v7197_v44  ;;  %v2547_v8 = vpop.f32.mrb[15].mxu0  ;;  %v3327_v45 = vld [vmem:[#allocation3 + $0x54] sm:$0xf] }
 0x204   : > { %v2681_v55 = vadd.f32 %v7205_v36, %v2642_v25  ;;  %v2643_v21 = vmul.f32 %v7197_v44, %v2547_v8  ;;  %4385 = vrot.lane.b32.xlu1 %v7500_v58, %s5816_s10  ;;  %4282 = vrot.lane.b32.xlu0 %v7500_v58, %s5815_s9  ;;  %v3373_v58 = vld [vmem:[#allocation3 + $0xa4] sm:$0x1] }
 0x205   : > { %v2715_v50 = vmax.f32 %v2683_v56, 0.0  ;;  %v2684_v16 = vadd.f32 %v7205_v36, %v2645_v24  ;;  %v5793_v24 = vld [vmem:[%s8717_s4 + $0x18] sm:$0xff]  }
 0x206   : > { %v2713_v23 = vmax.f32 %v2681_v55, 0.0  ;;  %v2682_v44 = vadd.f32 %v7205_v36, %v2643_v21  ;;  %v3921_v36 = vsel %vm5912_vm9, %v5451_v5, %v3920_v10  ;;  %v3581_v10 = vshll.u32 %v7478_v35, 16  ;;  %5699 = vmatprep.subr.bf16.mxu1 %v5793_v24 }
 0x207   : > { %v5591_v63 = vpack.c.bf16 %v2715_v50, %v2715_v50  ;;  %v2716_v22 = vmax.f32 %v2684_v16, 0.0  ;;  %v2816_v16 = vsel %vm5874_vm3, 0, %v2815_v26  ;;  %5700 = vmatpush3.bf16.msra.mxu1 %v5793_v24  ;;  %v3612_v35 = vor.u32 %v7539_v28, %v7543_v39  ;;  %v7632_v26 = vld [vmem:[%s8715_s2] ss:$0 sm:$0xff] }
 0x208   : > { %v5589_v53 = vpack.c.bf16 %v2713_v23, %v2713_v23  ;;  %v2714_v20 = vmax.f32 %v2682_v44, 0.0  ;;  %4167 = vrot.lane.b32.xlu1 %v5484_v32, %s5814_s8  ;;  %4313 = vrot.lane.b32.xlu0 %v7487_v27, %s5819_s19  ;;  %v3334_v32 = vld [vmem:[#allocation3 + $0x60] sm:$0xf]  ;;  %2817 = vst [vmem:[#allocation3 + $0xb4] sm:$0x1] %v2816_v16  ;;  %v3591_v28 = vshll.u32 %v7502_v51, 16 }
 0x209   : > { %v3085_v0 = vshrl.u32 %v5591_v63, 16  ;;  %v5592_v48 = vpack.c.bf16 %v2716_v22, %v2716_v22  ;;  %v3088_v46 = vshll.u32 %v5591_v63, 16  ;;  %v2863_v63 = vld [vmem:[#allocation3 + $0xbc] sm:$0x1] }
 0x20a   : > { %v3068_v13 = vshrl.u32 %v5589_v53, 16  ;;  %v5590_v40 = vpack.c.bf16 %v2714_v20, %v2714_v20  ;;  %v3071_v11 = vshll.u32 %v5589_v53, 16  ;;  %v2864_v20 = vsel %vm5889_vm5, 0, %v2863_v63 }
 0x20b   : > { %v3087_v52 = vrot.slane %v3085_v0, 7  ;;  %v3093_v57 = vshrl.u32 %v5592_v48, 16  ;;  %v3096_v34 = vshll.u32 %v5592_v48, 16  ;;  %2865 = vst [vmem:[#allocation3 + $0xbc] sm:$0x1] %v2864_v20  ;;  %vm8745_vm5 = vcmask 1043456  }
 0x20c   : > { %v3070_v25 = vrot.slane %v3068_v13, 7  ;;  %v3076_v56 = vshrl.u32 %v5590_v40, 16  ;;  %4416 = vrot.lane.b32.xlu1 %v7487_v27, %s5820_s22  ;;  %4457 = vrot.lane.b32.xlu0 %v7537_v41, %s5818_s16  ;;  %v3079_v21 = vshll.u32 %v5590_v40, 16  ;;  %v3583_v40 = vrot.slane %v3581_v10, 5  ;;  %vm8746_vm15 = vmmov %vm8745_vm5 }
 0x20d   : > { %v3090_v8 = vor.u32 %v3088_v46, %v3087_v52  ;;  %v3091_v59 = vrot.slane %v3087_v52, 4  ;;  %v3095_v55 = vrot.slane %v3093_v57, 7  ;;  %5736 = vmatprep.subr.msk.bf16.mxu1 %vm8745_vm5, %v5794_v19  ;;  %v4886_v52 = vsel %vm8746_vm15, %v5794_v19, 0 }
 0x20e   : > { %v3073_v5 = vor.u32 %v3071_v11, %v3070_v25  ;;  %v3074_v3 = vrot.slane %v3070_v25, 4  ;;  %v3078_v50 = vrot.slane %v3076_v56, 7  ;;  %5702 = vmatpush3.bf16.msra.mxu1 %v4886_v52  ;;  %v3615_v46 = vshll.u32 %v7489_v30, 16 }
 0x20f   : > { %v3335_v15 = vsel %vm5942_vm13, %v3090_v8, %v3334_v32  ;;  %v3098_v23 = vor.u32 %v3096_v34, %v3095_v55  ;;  %v3100_v44 = vrot.slane %v3095_v55, 4  ;;  %v5501_v32 = vcombine.low %v3921_v36, %v3924_v9 }
 0x210   : > { %3336 = vst [vmem:[#allocation3 + $0x60] sm:$0xf] %v3335_v15  ;;  %v3328_v22 = vsel %vm5942_vm13, %v3073_v5, %v3327_v45  ;;  %v3081_v33 = vor.u32 %v3079_v21, %v3078_v50  ;;  %v3083_v53 = vrot.slane %v3078_v50, 4  ;;  %4165 = vrot.lane.b32.xlu1 %v7487_v27, %s5814_s8  ;;  %4251 = vrot.lane.b32.xlu0 %v7537_v41, %s5813_s30  ;;  %v3587_v27 = vrot.slane %v3585_v6, 4 }
 0x211   : > { %3329 = vst [vmem:[#allocation3 + $0x54] sm:$0xf] %v3328_v22  ;;  %v3099_v0 = vsel %vm5953_vm14, %v3091_v59, %v3098_v23  ;;  %v3339_v48 = vsel %vm5874_vm3, %v3100_v44, %v3338_v38  ;;  %v3574_v6 = vrot.slane %v3572_v31, 4  ;;  %v3577_v36 = vrot.slane %v3575_v60, 5 }
 0x212   : > { %3337 = vst.msk [vmem:[#allocation3 + $0x64] sm:$0xf] %vm280_vm0, %v3099_v0  ;;  %3340 = vst [vmem:[#allocation3 + $0x68] sm:$0x1] %v3339_v48  ;;  %v3082_v2 = vsel %vm5953_vm14, %v3074_v3, %v3081_v33  ;;  %v3332_v13 = vsel %vm5874_vm3, %v3083_v53, %v3331_v42  ;;  %v3602_v9 = vor.u32 %v7532_v37, %v7523_v49  ;;  %v3613_v57 = vrot.slane %v3612_v35, 4 }
 0x213   : > { %3330 = vst.msk [vmem:[#allocation3 + $0x58] sm:$0xf] %vm280_vm0, %v3082_v2  ;;  %3333 = vst [vmem:[#allocation3 + $0x5c] sm:$0x1] %v3332_v13  ;;  %v3588_v45 = vor.u32 %v3587_v27, %v3583_v40  ;;  %v3617_v60 = vrot.slane %v3615_v46, 5  ;;  %v3593_v25 = vrot.slane %v3591_v28, 5 }
 0x214   : > { %4354 = vrot.lane.b32.xlu1 %v7537_v41, %s5817_s13  ;;  %4455 = vrot.lane.b32.xlu0 %v5501_v32, %s5818_s16  ;;  %v3578_v41 = vor.u32 %v3577_v36, %v3574_v6  ;;  %v3603_v29 = vrot.slane %v3602_v9, 4  ;;  %v7668_v36 = vpop.permute.xlu0 %4159  ;;  %vm8754_vm15 = vcmask 588800  }
 0x215   : > { %v3589_v30 = vrot.slane %v3588_v45, 4  ;;  %v3618_v37 = vsel %vm5935_vm12, %v3613_v57, %v3617_v60  ;;  %vm8756_vm5 = vmmov %vm8754_vm15 }
 0x216   : > { %v3579_v51 = vrot.slane %v3578_v41, 4  ;;  %v3608_v11 = vsel %vm5935_vm12, %v3603_v29, %v7543_v39 }
 0x217   : > { %v7599_v10 = vld [vmem:[#allocation3 + $0x60] sm:$0xf]  ;;  %v5486_v34 = vcombine.low %v3608_v11, %v3618_v37  ;;  %v3594_v38 = vsel %vm5935_vm12, %v3589_v30, %v3593_v25 }
 0x218   : > { %4249 = vrot.lane.b32.xlu1 %v5501_v32, %s5813_s30  ;;  %4352 = vrot.lane.b32.xlu0 %v5501_v32, %s5817_s13  ;;  %v7618_v56 = vld [vmem:[#allocation3 + $0x54] sm:$0xf]  ;;  %v3584_v55 = vsel %vm5935_vm12, %v3579_v51, %v3583_v40  ;;  %v3644_v39 = vshrl.u32 %v7599_v10, 16  ;;  %v3647_v21 = vshll.u32 %v7599_v10, 16  ;;  %v5454_v42 = vrot.slane %v7599_v10, 9 }
 0x219   : > { %v7601_v31 = vld [vmem:[#allocation3 + $0x64] sm:$0xf]  ;;  %v7635_v50 = vcombine.low %v3584_v55, %v3594_v38  ;;  %v3620_v15 = vshrl.u32 %v7618_v56, 16  ;;  %v7643_v44 = vld [vmem:[#allocation3 + $0x68] sm:$0x1]  ;;  %v3623_v53 = vshll.u32 %v7618_v56, 16 }
 0x21a   : > { %v7605_v49 = vcombine.low %v7599_v10, %v7601_v31  ;;  %v7620_v24 = vld [vmem:[#allocation3 + $0x58] sm:$0xf]  ;;  %v3941_v8 = vrot.slane %v7601_v31, 5  ;;  %v3657_v19 = vshrl.u32 %v7601_v31, 16  ;;  %v7661_v32 = vld [vmem:[#allocation3 + $0x5c] sm:$0x1] }
 0x21b   : > { %v7641_v23 = vcombine.low %v7618_v56, %v7620_v24  ;;  %v3934_v27 = vrot.slane %v7620_v24, 5  ;;  %v3633_v40 = vshrl.u32 %v7620_v24, 16  ;;  %v3944_v52 = vrot.slane %v7643_v44, 5 }
 0x21c   : > { %8747 = vst [vmem:[#allocation8_spill] sm:$0xff] %v7605_v49  ;;  %4288 = vrot.lane.b32.xlu1 %v7605_v49, %s5815_s9  ;;  %4391 = vrot.lane.b32.xlu0 %v7605_v49, %s5816_s10  ;;  %v3943_v20 = vrot.slane %v3941_v8, 4  ;;  %v3942_v9 = vsel %vm5912_vm9, %v5454_v42, %v3941_v8  ;;  %v5453_v46 = vrot.slane %v7618_v56, 9  ;;  %v3937_v28 = vrot.slane %v7661_v32, 5 }
 0x21d   : > { %8748 = vst [vmem:[#allocation9_spill] sm:$0xff] %v7641_v23  ;;  %v3936_v60 = vrot.slane %v3934_v27, 4  ;;  %v7679_v30 = vrot.slane %v3644_v39, 4  ;;  %v7683_v11 = vrot.slane %v3647_v21, 5  ;;  %v3653_v55 = vshll.u32 %v7601_v31, 16  ;;  %v7689_v21 = vpop.permute.xlu0 %4239 }
 0x21e   : > { %v3945_v41 = vsel %vm5912_vm9, %v3943_v20, %v3944_v52  ;;  %v3935_v25 = vsel %vm5912_vm9, %v5453_v46, %v3934_v27  ;;  %v3341_v31 = vld [vmem:[#allocation3 + $0x6c] sm:$0xf]  ;;  %v3352_v27 = vld [vmem:[#allocation3 + $0x80] sm:$0x1] }
 0x21f   : > { %v3655_v52 = vrot.slane %v3653_v55, 5 }
 0x220   : > { %4319 = vrot.lane.b32.xlu1 %v5486_v34, %s5819_s19  ;;  %4422 = vrot.lane.b32.xlu0 %v5486_v34, %s5820_s22  ;;  %v5679_v59 = vpop.f32.mrb[16].mxu0 }
 0x221   : > { %v2648_v5 = vmul.f32 %v7632_v26, %v5679_v59  ;;  %v2560_v3 = vpop.f32.mrb[17].mxu0  ;;  %v5504_v59 = vcombine.low %v3942_v9, %v3945_v41 }
 0x222   : > { %v2646_v16 = vmul.f32 %v7632_v26, %v2560_v3  ;;  %v5680_v7 = vpop.f32.mrb[18].mxu0 }
 0x223   : > { %v2687_v63 = vadd.f32 %v7649_v43, %v2648_v5  ;;  %v2649_v22 = vmul.f32 %v7632_v26, %v5680_v7  ;;  %v2563_v33 = vpop.f32.mrb[19].mxu0  ;;  %v3348_v7 = vld [vmem:[#allocation3 + $0x78] sm:$0xf] }
 0x224   : > { %v2685_v0 = vadd.f32 %v7649_v43, %v2646_v16  ;;  %v2647_v48 = vmul.f32 %v7632_v26, %v2563_v33  ;;  %4389 = vrot.lane.b32.xlu1 %v7641_v23, %s5816_s10  ;;  %4286 = vrot.lane.b32.xlu0 %v7641_v23, %s5815_s9  ;;  %v3659_v16 = vrot.slane %v3657_v19, 4  ;;  %v3629_v19 = vshll.u32 %v7620_v24, 16 }
 0x225   : > { %v2719_v2 = vmax.f32 %v2687_v63, 0.0  ;;  %v2688_v13 = vadd.f32 %v7649_v43, %v2649_v22  ;;  %v3938_v22 = vsel %vm5912_vm9, %v3936_v60, %v3937_v28  ;;  %v3622_v24 = vrot.slane %v3620_v15, 4 }
 0x226   : > { %v2717_v35 = vmax.f32 %v2685_v0, 0.0  ;;  %v2686_v6 = vadd.f32 %v7649_v43, %v2647_v48  ;;  %v5503_v55 = vcombine.low %v3935_v25, %v3938_v22 }
 0x227   : > { %v5595_v45 = vpack.c.bf16 %v2719_v2, %v2719_v2  ;;  %v2720_v57 = vmax.f32 %v2688_v13, 0.0 }
 0x228   : > { %v5593_v10 = vpack.c.bf16 %v2717_v35, %v2717_v35  ;;  %v2718_v29 = vmax.f32 %v2686_v6, 0.0  ;;  %4171 = vrot.lane.b32.xlu1 %v5486_v34, %s5814_s8  ;;  %4317 = vrot.lane.b32.xlu0 %v7635_v50, %s5819_s19 }
 0x229   : > { %v3119_v37 = vshrl.u32 %v5595_v45, 16  ;;  %v5596_v51 = vpack.c.bf16 %v2720_v57, %v2720_v57  ;;  %v3122_v34 = vshll.u32 %v5595_v45, 16  ;;  %v3345_v45 = vld [vmem:[#allocation3 + $0x74] sm:$0x1] }
 0x22a   : > { %v3102_v38 = vshrl.u32 %v5593_v10, 16  ;;  %v5594_v8 = vpack.c.bf16 %v2718_v29, %v2718_v29  ;;  %v3105_v39 = vshll.u32 %v5593_v10, 16 }
 0x22b   : > { %v3121_v5 = vrot.slane %v3119_v37, 7  ;;  %v3127_v3 = vshrl.u32 %v5596_v51, 16  ;;  %v3130_v0 = vshll.u32 %v5596_v51, 16  ;;  %v3631_v37 = vrot.slane %v3629_v19, 5 }
 0x22c   : > { %v3104_v42 = vrot.slane %v3102_v38, 7  ;;  %v3110_v63 = vshrl.u32 %v5594_v8, 16  ;;  %4420 = vrot.lane.b32.xlu1 %v7635_v50, %s5820_s22  ;;  %4461 = vrot.lane.b32.xlu0 %v5504_v59, %s5818_s16  ;;  %v3113_v13 = vshll.u32 %v5594_v8, 16  ;;  %v3635_v51 = vrot.slane %v3633_v40, 4 }
 0x22d   : > { %v3124_v33 = vor.u32 %v3122_v34, %v3121_v5  ;;  %v3129_v20 = vrot.slane %v3127_v3, 7  ;;  %v3125_v35 = vrot.slane %v3121_v5, 4  ;;  %v3660_v5 = vor.u32 %v3659_v16, %v3655_v52 }
 0x22e   : > { %v3107_v48 = vor.u32 %v3105_v39, %v3104_v42  ;;  %v3112_v2 = vrot.slane %v3110_v63, 7  ;;  %v3108_v57 = vrot.slane %v3104_v42, 4  ;;  %v3625_v40 = vrot.slane %v3623_v53, 5 }
 0x22f   : > { %v3349_v6 = vsel %vm5942_vm13, %v3124_v33, %v3348_v7  ;;  %v3132_v9 = vor.u32 %v3130_v0, %v3129_v20  ;;  %v3134_v46 = vrot.slane %v3129_v20, 4  ;;  %v3663_v34 = vshll.u32 %v7643_v44, 16 }
 0x230   : > { %3350 = vst [vmem:[#allocation3 + $0x78] sm:$0xf] %v3349_v6  ;;  %v3342_v41 = vsel %vm5942_vm13, %v3107_v48, %v3341_v31  ;;  %v3115_v28 = vor.u32 %v3113_v13, %v3112_v2  ;;  %v3117_v10 = vrot.slane %v3112_v2, 4  ;;  %4169 = vrot.lane.b32.xlu1 %v7635_v50, %s5814_s8  ;;  %4255 = vrot.lane.b32.xlu0 %v5504_v59, %s5813_s30  ;;  %v7712_v8 = vpop.permute.xlu0 %4379  ;;  %v3661_v7 = vrot.slane %v3660_v5, 4  ;;  %v7747_v31 = vpop.permute.xlu1 %4276  ;;  %v7758_v13 = vld [vmem:[#allocation3] sm:$0xf] }
 0x231   : > { %3343 = vst [vmem:[#allocation3 + $0x6c] sm:$0xf] %v3342_v41  ;;  %v3133_v29 = vsel %vm5953_vm14, %v3125_v35, %v3132_v9  ;;  %v3353_v60 = vsel %vm5874_vm3, %v3134_v46, %v3352_v27  ;;  %v3650_v3 = vor.u32 %v7683_v11, %v7679_v30  ;;  %v3636_v25 = vor.u32 %v3635_v51, %v3631_v37 }
 0x232   : > { %3351 = vst.msk [vmem:[#allocation3 + $0x7c] sm:$0xf] %vm280_vm0, %v3133_v29  ;;  %3354 = vst [vmem:[#allocation3 + $0x80] sm:$0x1] %v3353_v60  ;;  %v3116_v38 = vsel %vm5953_vm14, %v3108_v57, %v3115_v28  ;;  %v3346_v50 = vsel %vm5874_vm3, %v3117_v10, %v3345_v45  ;;  %v3626_v42 = vor.u32 %v3625_v40, %v3622_v24  ;;  %v3639_v16 = vshll.u32 %v7661_v32, 16 }
 0x233   : > { %3344 = vst.msk [vmem:[#allocation3 + $0x70] sm:$0xf] %vm280_vm0, %v3116_v38  ;;  %3347 = vst [vmem:[#allocation3 + $0x74] sm:$0x1] %v3346_v50  ;;  %v3665_v56 = vrot.slane %v3663_v34, 5  ;;  %v3651_v44 = vrot.slane %v3650_v3, 4 }
 0x234   : > { %4358 = vrot.lane.b32.xlu1 %v5504_v59, %s5817_s13  ;;  %4459 = vrot.lane.b32.xlu0 %v5503_v55, %s5818_s16  ;;  %v7725_v39 = vpop.permute.xlu0 %4274  ;;  %v3637_v59 = vrot.slane %v3636_v25, 4  ;;  %v3627_v11 = vrot.slane %v3626_v42, 4  ;;  %v3641_v63 = vrot.slane %v3639_v16, 5 }
 0x235   : > { %v3666_v32 = vsel %vm5935_vm12, %v3661_v7, %v3665_v56  ;;  %v3656_v22 = vsel %vm5935_vm12, %v3651_v44, %v3655_v52  ;;  %v7760_v52 = vld [vmem:[#allocation3 + $0x4] sm:$0xf]  ;;  %v7787_v25 = vpop.permute.xlu1 %4346  ;;  %v3366_v56 = vld [vmem:[#allocation3 + $0x98] sm:$0x1] }
 0x236   : > { %v3642_v33 = vsel %vm5935_vm12, %v3637_v59, %v3641_v63  ;;  %v5488_v0 = vcombine.low %v3656_v22, %v3666_v32  ;;  %v3632_v27 = vsel %vm5935_vm12, %v3627_v11, %v3631_v37 }
 0x237   : > { %v7729_v15 = vld [vmem:[#allocation3 + $0x78] sm:$0xf]  ;;  %v7767_v46 = vcombine.low %v3632_v27, %v3642_v33 }
 0x238   : > { %4253 = vrot.lane.b32.xlu1 %v5503_v55, %s5813_s30  ;;  %4356 = vrot.lane.b32.xlu0 %v5503_v55, %s5817_s13  ;;  %v7749_v20 = vpop.permute.xlu0 %4449  ;;  %v7751_v19 = vld [vmem:[#allocation3 + $0x6c] sm:$0xf]  ;;  %v3692_v6 = vshrl.u32 %v7729_v15, 16  ;;  %v3695_v45 = vshll.u32 %v7729_v15, 16  ;;  %v5456_v29 = vrot.slane %v7729_v15, 9 }
 0x239   : > { %v7731_v53 = vld [vmem:[#allocation3 + $0x7c] sm:$0xf]  ;;  %v3668_v28 = vshrl.u32 %v7751_v19, 16  ;;  %v7772_v10 = vld [vmem:[#allocation3 + $0x80] sm:$0x1]  ;;  %v3671_v38 = vshll.u32 %v7751_v19, 16 }
 0x23a   : > { %v7735_v30 = vcombine.low %v7729_v15, %v7731_v53  ;;  %v7753_v48 = vld [vmem:[#allocation3 + $0x70] sm:$0xf]  ;;  %v3955_v2 = vrot.slane %v7731_v53, 5  ;;  %v3705_v60 = vshrl.u32 %v7731_v53, 16  ;;  %v7784_v34 = vld [vmem:[#allocation3 + $0x74] sm:$0x1] }
 0x23b   : > { %v7780_v50 = vcombine.low %v7751_v19, %v7753_v48  ;;  %v3948_v3 = vrot.slane %v7753_v48, 5  ;;  %v3958_v15 = vrot.slane %v7772_v10, 5  ;;  %v5455_v11 = vrot.slane %v7751_v19, 9 }
 0x23c   : > { %8749 = vst [vmem:[#allocation10_spill] sm:$0xff] %v7735_v30  ;;  %4292 = vrot.lane.b32.xlu1 %v7735_v30, %s5815_s9  ;;  %4395 = vrot.lane.b32.xlu0 %v7735_v30, %s5816_s10  ;;  %v3957_v40 = vrot.slane %v3955_v2, 4  ;;  %v7789_v7 = vpop.permute.xlu0 %4243  ;;  %v3956_v32 = vsel %vm5912_vm9, %v5456_v29, %v3955_v2  ;;  %v3951_v33 = vrot.slane %v7784_v34, 5  ;;  %v7805_v27 = vrot.slane %v3692_v6, 4 }
 0x23d   : > { %8750 = vst [vmem:[#allocation11_spill] sm:$0xff] %v7780_v50  ;;  %v3949_v2 = vsel %vm5912_vm9, %v5455_v11, %v3948_v3  ;;  %v3701_v29 = vshll.u32 %v7731_v53, 16  ;;  %v3362_v11 = vld [vmem:[#allocation3 + $0x90] sm:$0xf]  ;;  %v3673_v30 = vrot.slane %v3671_v38, 5 }
 0x23f   : > { %v7830_v35 = vrot.slane %v3701_v29, 5 }
 0x240   : > { %4323 = vrot.lane.b32.xlu1 %v5488_v0, %s5819_s19  ;;  %4426 = vrot.lane.b32.xlu0 %v5488_v0, %s5820_s22  ;;  %v5683_v9 = vpop.f32.mrb[20].mxu0 }
 0x241   : > { %v2652_v57 = vmul.f32 %v7632_v26, %v5683_v9  ;;  %v2576_v41 = vpop.f32.mrb[21].mxu0 }
 0x242   : > { %v2650_v37 = vmul.f32 %v7632_v26, %v2576_v41  ;;  %v5684_v51 = vpop.f32.mrb[22].mxu0  ;;  %v3959_v41 = vsel %vm5912_vm9, %v3957_v40, %v3958_v15  ;;  %v7819_v40 = vpop.permute.xlu1 %4241 }
 0x243   : > { %v2691_v55 = vadd.f32 %v7649_v43, %v2652_v57  ;;  %v2653_v5 = vmul.f32 %v7632_v26, %v5684_v51  ;;  %v2579_v24 = vpop.f32.mrb[23].mxu0 }
 0x244   : > { %v2689_v42 = vadd.f32 %v7649_v43, %v2650_v37  ;;  %v2651_v16 = vmul.f32 %v7632_v26, %v2579_v24  ;;  %4393 = vrot.lane.b32.xlu1 %v7780_v50, %s5816_s10  ;;  %4290 = vrot.lane.b32.xlu0 %v7780_v50, %s5815_s9  ;;  %v3950_v37 = vrot.slane %v3948_v3, 4  ;;  %v7815_v24 = vrot.slane %v3695_v45, 5 }
 0x245   : > { %v2723_v44 = vmax.f32 %v2691_v55, 0.0  ;;  %v2692_v59 = vadd.f32 %v7649_v43, %v2653_v5 }
 0x246   : > { %v2721_v63 = vmax.f32 %v2689_v42, 0.0  ;;  %v2690_v22 = vadd.f32 %v7649_v43, %v2651_v16  ;;  %v7817_v42 = vrot.slane %v3705_v60, 4  ;;  %v7821_v16 = vpop.permute.xlu0 %4344  ;;  %v3952_v53 = vsel %vm5912_vm9, %v3950_v37, %v3951_v33 }
 0x247   : > { %v5599_v9 = vpack.c.bf16 %v2723_v44, %v2723_v44  ;;  %v2724_v57 = vmax.f32 %v2692_v59, 0.0  ;;  %v5506_v44 = vcombine.low %v3956_v32, %v3959_v41  ;;  %v7823_v59 = vrot.slane %v3668_v28, 4  ;;  %v3355_v28 = vld [vmem:[#allocation3 + $0x84] sm:$0xf] }
 0x248   : > { %v5597_v51 = vpack.c.bf16 %v2721_v63, %v2721_v63  ;;  %v2722_v55 = vmax.f32 %v2690_v22, 0.0  ;;  %4175 = vrot.lane.b32.xlu1 %v5488_v0, %s5814_s8  ;;  %4321 = vrot.lane.b32.xlu0 %v7767_v46, %s5819_s19 }
 0x249   : > { %v3153_v6 = vshrl.u32 %v5599_v9, 16  ;;  %v5600_v5 = vpack.c.bf16 %v2724_v57, %v2724_v57  ;;  %v3156_v22 = vshll.u32 %v5599_v9, 16  ;;  %v3677_v9 = vshll.u32 %v7753_v48, 16 }
 0x24a   : > { %v3136_v15 = vshrl.u32 %v5597_v51, 16  ;;  %v5598_v0 = vpack.c.bf16 %v2722_v55, %v2722_v55  ;;  %v3139_v57 = vshll.u32 %v5597_v51, 16 }
 0x24b   : > { %v3155_v63 = vrot.slane %v3153_v6, 7  ;;  %v3161_v3 = vshrl.u32 %v5600_v5, 16  ;;  %v3164_v55 = vshll.u32 %v5600_v5, 16  ;;  %v3359_v5 = vld [vmem:[#allocation3 + $0x8c] sm:$0x1] }
 0x24c   : > { %v3138_v45 = vrot.slane %v3136_v15, 7  ;;  %v3144_v60 = vshrl.u32 %v5598_v0, 16  ;;  %4424 = vrot.lane.b32.xlu1 %v7767_v46, %s5820_s22  ;;  %4465 = vrot.lane.b32.xlu0 %v5506_v44, %s5818_s16  ;;  %v3147_v37 = vshll.u32 %v5598_v0, 16 }
 0x24d   : > { %v3158_v32 = vor.u32 %v3156_v22, %v3155_v63  ;;  %v3163_v41 = vrot.slane %v3161_v3, 7  ;;  %v3159_v50 = vrot.slane %v3155_v63, 4  ;;  %v7850_v63 = vrot.slane %v3677_v9, 5 }
 0x24e   : > { %v3141_v6 = vor.u32 %v3139_v57, %v3138_v45  ;;  %v3146_v33 = vrot.slane %v3144_v60, 7  ;;  %v7833_v15 = vpop.permute.xlu1 %4280  ;;  %v7835_v51 = vpop.permute.xlu0 %4383  ;;  %v3142_v49 = vrot.slane %v3138_v45, 4 }
 0x24f   : > { %v3363_v29 = vsel %vm5942_vm13, %v3158_v32, %v3362_v11  ;;  %v3166_v22 = vor.u32 %v3164_v55, %v3163_v41  ;;  %v3168_v3 = vrot.slane %v3163_v41, 4  ;;  %v8751_v11 = vshrl.u32 %v7753_v48, 16 }
 0x250   : > { %3364 = vst [vmem:[#allocation3 + $0x90] sm:$0xf] %v3363_v29  ;;  %v3356_v57 = vsel %vm5942_vm13, %v3141_v6, %v3355_v28  ;;  %v3149_v0 = vor.u32 %v3147_v37, %v3146_v33  ;;  %v3151_v60 = vrot.slane %v3146_v33, 4  ;;  %4173 = vrot.lane.b32.xlu1 %v7767_v46, %s5814_s8  ;;  %4259 = vrot.lane.b32.xlu0 %v5506_v44, %s5813_s30 }
 0x251   : > { %3357 = vst [vmem:[#allocation3 + $0x84] sm:$0xf] %v3356_v57  ;;  %v3167_v19 = vsel %vm5953_vm14, %v3159_v50, %v3166_v22  ;;  %v3367_v38 = vsel %vm5874_vm3, %v3168_v3, %v3366_v56  ;;  %v3683_v45 = vrot.slane %v8751_v11, 4  ;;  %v5505_v41 = vcombine.low %v3949_v2, %v3952_v53 }
 0x252   : > { %3365 = vst.msk [vmem:[#allocation3 + $0x94] sm:$0xf] %vm280_vm0, %v3167_v19  ;;  %3368 = vst [vmem:[#allocation3 + $0x98] sm:$0x1] %v3367_v38  ;;  %v3150_v46 = vsel %vm5953_vm14, %v3142_v49, %v3149_v0  ;;  %v3360_v32 = vsel %vm5874_vm3, %v3151_v60, %v3359_v5  ;;  %v7859_v28 = vpop.permute.xlu1 %4311  ;;  %v4415_v50 = vpop.permute.xlu0 %4414  ;;  %v3708_v56 = vor.u32 %v7817_v42, %v7830_v35  ;;  %v3711_v2 = vshll.u32 %v7772_v10, 16 }
 0x253   : > { %3358 = vst.msk [vmem:[#allocation3 + $0x88] sm:$0xf] %vm280_vm0, %v3150_v46  ;;  %3361 = vst [vmem:[#allocation3 + $0x8c] sm:$0x1] %v3360_v32  ;;  %v8752_v48 = vcombine.low %v7758_v13, %v7760_v52  ;;  %v3698_v49 = vor.u32 %v7815_v24, %v7805_v27  ;;  %v3674_v42 = vor.u32 %v3673_v30, %v7823_v59  ;;  %v3687_v52 = vshll.u32 %v7784_v34, 16 }
 0x254   : > { %4362 = vrot.lane.b32.xlu1 %v5506_v44, %s5817_s13  ;;  %4463 = vrot.lane.b32.xlu0 %v5505_v41, %s5818_s16  ;;  %v3684_v53 = vor.u32 %v3683_v45, %v7850_v63  ;;  %v3709_v13 = vrot.slane %v3708_v56, 4  ;;  %v3713_v10 = vrot.slane %v3711_v2, 5 }
 0x255   : > { %v4483_v55 = vsel %vm2045_vm1, %v8752_v48, %v7668_v36  ;;  %v3699_v27 = vrot.slane %v3698_v49, 4  ;;  %v3675_v44 = vrot.slane %v3674_v42, 4  ;;  %v3689_v3 = vrot.slane %v3687_v52, 5 }
 0x256   : > { %v7876_v9 = vpop.permute.xlu1 %4381  ;;  %v7878_v6 = vpop.permute.xlu0 %4278  ;;  %v4530_v36 = vsel %vm2094_vm2, %v4483_v55, %v7689_v21  ;;  %v3685_v59 = vrot.slane %v3684_v53, 4  ;;  %v3714_v29 = vsel %vm5935_vm12, %v3709_v13, %v3713_v10 }
 0x257   : > { %v7885_v24 = vld [vmem:[#allocation3 + $0x90] sm:$0xf]  ;;  %v4562_v33 = vsel %vm2127_vm4, %v4530_v36, %v7725_v39  ;;  %v3704_v39 = vsel %vm5935_vm12, %v3699_v27, %v7830_v35 }
 0x258   : > { %4257 = vrot.lane.b32.xlu1 %v5505_v41, %s5813_s30  ;;  %4360 = vrot.lane.b32.xlu0 %v5505_v41, %s5817_s13  ;;  %v7910_v0 = vld [vmem:[#allocation3 + $0x84] sm:$0xf]  ;;  %v7914_v19 = vcombine.low %v3704_v39, %v3714_v29  ;;  %v3690_v11 = vsel %vm5935_vm12, %v3685_v59, %v3689_v3  ;;  %v3740_v46 = vshrl.u32 %v7885_v24, 16  ;;  %v3743_v32 = vshll.u32 %v7885_v24, 16 }
 0x259   : > { %v7887_v30 = vld [vmem:[#allocation3 + $0x94] sm:$0xf]  ;;  %v7923_v45 = vld [vmem:[#allocation3 + $0x98] sm:$0x1]  ;;  %v5458_v56 = vrot.slane %v7885_v24, 9  ;;  %v3719_v55 = vshll.u32 %v7910_v0, 16 }
 0x25a   : > { %v7891_v37 = vpop.permute.xlu1 %4163  ;;  %v4310_v21 = vpop.permute.xlu0 %4309  ;;  %v7895_v34 = vcombine.low %v7885_v24, %v7887_v30  ;;  %v3969_v5 = vrot.slane %v7887_v30, 5  ;;  %v7916_v38 = vld [vmem:[#allocation3 + $0x88] sm:$0xf]  ;;  %v7944_v53 = vld [vmem:[#allocation3 + $0x8c] sm:$0x1]  ;;  %v3749_v24 = vshll.u32 %v7887_v30, 16 }
 0x25b   : > { %v4594_v22 = vsel %vm2160_vm6, %v4562_v33, %v4310_v21  ;;  %v3962_v13 = vrot.slane %v7916_v38, 5  ;;  %v7952_v10 = vcombine.low %v7910_v0, %v7916_v38  ;;  %v5457_v29 = vrot.slane %v7910_v0, 9  ;;  %v3380_v33 = vld [vmem:[#allocation3 + $0xb0] sm:$0x1] }
 0x25c   : > { %8753 = vst [vmem:[#allocation12_spill] sm:$0xff] %v7895_v34  ;;  %v4626_v57 = vsel %vm2193_vm7, %v4594_v22, %v7821_v16  ;;  %4296 = vrot.lane.b32.xlu1 %v7895_v34, %s5815_s9  ;;  %4399 = vrot.lane.b32.xlu0 %v7895_v34, %s5816_s10  ;;  %v3680_v16 = vsel %vm5935_vm12, %v3675_v44, %v7850_v63  ;;  %v3716_v63 = vshrl.u32 %v7910_v0, 16  ;;  %v3971_v49 = vrot.slane %v3969_v5, 4 }
 0x25d   : > { %v4658_v60 = vsel %vm2226_vm8, %v4626_v57, %v7712_v8  ;;  %v7941_v42 = vcombine.low %v3680_v16, %v3690_v11  ;;  %8755 = vst [vmem:[#allocation13_spill] sm:$0xff] %v7952_v10  ;;  %v3970_v21 = vsel %vm5912_vm9, %v5458_v56, %v3969_v5  ;;  %v3965_v39 = vrot.slane %v7944_v53, 5 }
 0x25e   : > { %v4690_v35 = vsel %vm2259_vm10, %v4658_v60, %v4415_v50  ;;  %v4162_v8 = vpop.permute.xlu1 %4161  ;;  %v7928_v41 = vpop.permute.xlu0 %4453  ;;  %v3753_v50 = vshrl.u32 %v7887_v30, 16  ;;  %v3964_v11 = vrot.slane %v3962_v13, 4  ;;  %v7978_v56 = vrot.slane %v3749_v24, 5 }
 0x25f   : > { %v4722_v48 = vsel %vm2292_vm11, %v4690_v35, %v7749_v20  ;;  %v3972_v20 = vrot.slane %v7923_v45, 5  ;;  %v4486_v36 = vsel %vm2045_vm1, %v7261_v18, %v4162_v8 }
 0x260   : > { %4769 = vst.msk [vmem:[#allocation5] sm:$0xff] %vm8754_vm15, %v4722_v48  ;;  %4327 = vrot.lane.b32.xlu1 %v7914_v19, %s5819_s19  ;;  %4430 = vrot.lane.b32.xlu0 %v7914_v19, %s5820_s22  ;;  %v5687_v2 = vpop.f32.mrb[24].mxu0  ;;  %v4532_v60 = vsel %vm2094_vm2, %v4486_v36, %v7819_v40  ;;  %v7980_v48 = vrot.slane %v3753_v50, 4  ;;  %vm8759_vm15 = vmmov %vm8756_vm5 }
 0x261   : > { %v2656_v52 = vmul.f32 %v7632_v26, %v5687_v2  ;;  %v2592_v27 = vpop.f32.mrb[25].mxu0  ;;  %v3973_v30 = vsel %vm5912_vm9, %v3971_v49, %v3972_v20  ;;  %v7985_v20 = vrot.slane %v3740_v46, 4  ;;  %v7995_v50 = vsel %vm2127_vm4, %v4532_v60, %v7747_v31 }
 0x262   : > { %v2654_v44 = vmul.f32 %v7632_v26, %v2592_v27  ;;  %v5688_v59 = vpop.f32.mrb[26].mxu0  ;;  %v7962_v3 = vpop.permute.xlu0 %4247  ;;  %v7983_v2 = vcombine.low %v3970_v21, %v3973_v30  ;;  %v3756_v31 = vor.u32 %v7980_v48, %v7978_v56  ;;  %v3721_v60 = vrot.slane %v3719_v55, 5  ;;  %v3369_v55 = vld [vmem:[#allocation3 + $0x9c] sm:$0xf] }
 0x263   : > { %v2695_v18 = vadd.f32 %v7649_v43, %v2656_v52  ;;  %v2657_v22 = vmul.f32 %v7632_v26, %v5688_v59  ;;  %v2595_v57 = vpop.f32.mrb[27].mxu0  ;;  %v7970_v5 = vpop.permute.xlu1 %4350  ;;  %v3963_v59 = vsel %vm5912_vm9, %v5457_v29, %v3962_v13 }
 0x264   : > { %v2693_v16 = vadd.f32 %v7649_v43, %v2654_v44  ;;  %v2655_v0 = vmul.f32 %v7632_v26, %v2595_v57  ;;  %4397 = vrot.lane.b32.xlu1 %v7952_v10, %s5816_s10  ;;  %4294 = vrot.lane.b32.xlu0 %v7952_v10, %s5815_s9 }
 0x265   : > { %v2727_v35 = vmax.f32 %v2695_v18, 0.0  ;;  %v2696_v8 = vadd.f32 %v7649_v43, %v2657_v22  ;;  %v7991_v18 = vrot.slane %v3743_v32, 5  ;;  %v3966_v32 = vsel %vm5912_vm9, %v3964_v11, %v3965_v39 }
 0x266   : > { %v2725_v40 = vmax.f32 %v2693_v16, 0.0  ;;  %v2694_v49 = vadd.f32 %v7649_v43, %v2655_v0  ;;  %v7987_v27 = vpop.permute.xlu0 %4451 }
 0x267   : > { %v5603_v36 = vpack.c.bf16 %v2727_v35, %v2727_v35  ;;  %v2728_v52 = vmax.f32 %v2696_v8, 0.0  ;;  %v4785_v44 = vld [vmem:[#allocation5] sm:$0xff]  ;;  %v8007_v30 = vpop.permute.xlu1 %4245 }
 0x268   : > { %v5601_v24 = vpack.c.bf16 %v2725_v40, %v2725_v40  ;;  %v2726_v22 = vmax.f32 %v2694_v49, 0.0  ;;  %4179 = vrot.lane.b32.xlu1 %v7914_v19, %s5814_s8  ;;  %4325 = vrot.lane.b32.xlu0 %v7941_v42, %s5819_s19  ;;  %v8009_v19 = vrot.slane %v3716_v63, 4  ;;  %v3725_v40 = vshll.u32 %v7916_v38, 16  ;;  %v3376_v49 = vld [vmem:[#allocation3 + $0xa8] sm:$0xf] }
 0x269   : > { %v3187_v21 = vshrl.u32 %v5603_v36, 16  ;;  %v5604_v57 = vpack.c.bf16 %v2728_v52, %v2728_v52  ;;  %5703 = vmatprep.mubr.msk.bf16.mxu1 %vm8756_vm5, %v4785_v44  ;;  %v3190_v0 = vshll.u32 %v5603_v36, 16 }
 0x26a   : > { %v3170_v13 = vshrl.u32 %v5601_v24, 16  ;;  %v5602_v29 = vpack.c.bf16 %v2726_v22, %v2726_v22  ;;  %v8011_v8 = vpop.permute.xlu0 %4348  ;;  %v3173_v39 = vshll.u32 %v5601_v24, 16  ;;  %v8018_v22 = vrot.slane %v3725_v40, 5 }
 0x26b   : > { %v3189_v16 = vrot.slane %v3187_v21, 7  ;;  %v3195_v35 = vshrl.u32 %v5604_v57, 16  ;;  %v3198_v11 = vshll.u32 %v5604_v57, 16  ;;  %v8757_v24 = vshrl.u32 %v7916_v38, 16 }
 0x26c   : > { %v3172_v52 = vrot.slane %v3170_v13, 7  ;;  %v3178_v44 = vshrl.u32 %v5602_v29, 16  ;;  %4428 = vrot.lane.b32.xlu1 %v7941_v42, %s5820_s22  ;;  %4469 = vrot.lane.b32.xlu0 %v7983_v2, %s5818_s16  ;;  %v3181_v36 = vshll.u32 %v5602_v29, 16 }
 0x26d   : > { %v3192_v63 = vor.u32 %v3190_v0, %v3189_v16  ;;  %v3197_v48 = vrot.slane %v3195_v35, 7  ;;  %v3193_v21 = vrot.slane %v3189_v16, 4  ;;  %v3731_v57 = vrot.slane %v8757_v24, 4 }
 0x26e   : > { %v3175_v46 = vor.u32 %v3173_v39, %v3172_v52  ;;  %v3180_v10 = vrot.slane %v3178_v44, 7  ;;  %v8020_v13 = vpop.permute.xlu1 %4284  ;;  %v3176_v23 = vrot.slane %v3172_v52, 4  ;;  %v8026_v35 = vpop.permute.xlu0 %4387  ;;  %v5507_v52 = vcombine.low %v3963_v59, %v3966_v32 }
 0x26f   : > { %v3377_v34 = vsel %vm5942_vm13, %v3192_v63, %v3376_v49  ;;  %v3200_v17 = vor.u32 %v3198_v11, %v3197_v48  ;;  %v3202_v0 = vrot.slane %v3197_v48, 4  ;;  %v3732_v38 = vor.u32 %v3731_v57, %v8018_v22 }
 0x270   : > { %3378 = vst [vmem:[#allocation3 + $0xa8] sm:$0xf] %v3377_v34  ;;  %v3370_v29 = vsel %vm5942_vm13, %v3175_v46, %v3369_v55  ;;  %v3183_v16 = vor.u32 %v3181_v36, %v3180_v10  ;;  %v3185_v40 = vrot.slane %v3180_v10, 4  ;;  %4177 = vrot.lane.b32.xlu1 %v7941_v42, %s5814_s8  ;;  %4263 = vrot.lane.b32.xlu0 %v7983_v2, %s5813_s30  ;;  %v3735_v11 = vshll.u32 %v7944_v53, 16 }
 0x271   : > { %3371 = vst [vmem:[#allocation3 + $0x9c] sm:$0xf] %v3370_v29  ;;  %v3201_v49 = vsel %vm5953_vm14, %v3193_v21, %v3200_v17  ;;  %v3381_v34 = vsel %vm5874_vm3, %v3202_v0, %v3380_v33  ;;  %v3746_v46 = vor.u32 %v7991_v18, %v7985_v20  ;;  %v3722_v17 = vor.u32 %v3721_v60, %v8009_v19 }
 0x272   : > { %3379 = vst.msk [vmem:[#allocation3 + $0xac] sm:$0xf] %vm280_vm0, %v3201_v49  ;;  %3382 = vst [vmem:[#allocation3 + $0xb0] sm:$0x1] %v3381_v34  ;;  %v3184_v42 = vsel %vm5953_vm14, %v3176_v23, %v3183_v16  ;;  %v3374_v10 = vsel %vm5874_vm3, %v3185_v40, %v3373_v58  ;;  %v8046_v39 = vpop.permute.xlu1 %4315  ;;  %v4489_v33 = vsel %vm2045_vm1, %v7244_v12, %v7891_v37  ;;  %v4419_v20 = vpop.permute.xlu0 %4418  ;;  %v3757_v59 = vrot.slane %v3756_v31, 4 }
 0x273   : > { %3372 = vst.msk [vmem:[#allocation3 + $0xa0] sm:$0xf] %vm280_vm0, %v3184_v42  ;;  %3375 = vst [vmem:[#allocation3 + $0xa4] sm:$0x1] %v3374_v10  ;;  %v4596_v58 = vsel %vm2160_vm6, %v7995_v50, %v7859_v28  ;;  %v3733_v23 = vrot.slane %v3732_v38, 4  ;;  %v3747_v53 = vrot.slane %v3746_v46, 4  ;;  %v4534_v12 = vsel %vm2094_vm2, %v4489_v33, %v7789_v7 }
 0x274   : > { %4366 = vrot.lane.b32.xlu1 %v7983_v2, %s5817_s13  ;;  %4467 = vrot.lane.b32.xlu0 %v5507_v52, %s5818_s16  ;;  %v8758_v18 = vshll.u32 %v7923_v45, 16  ;;  %v3723_v31 = vrot.slane %v3722_v17, 4  ;;  %v3737_v19 = vrot.slane %v3735_v11, 5  ;;  %v4628_v28 = vsel %vm2193_vm7, %v4596_v58, %v7787_v25 }
 0x275   : > { %v4566_v44 = vsel %vm2127_vm4, %v4534_v12, %v7878_v6  ;;  %v3752_v25 = vsel %vm5935_vm12, %v3747_v53, %v7978_v56  ;;  %v4660_v6 = vsel %vm2226_vm8, %v4628_v28, %v7876_v9 }
 0x276   : > { %v3761_v32 = vrot.slane %v8758_v18, 5  ;;  %v8064_v37 = vpop.permute.xlu1 %4385  ;;  %v8066_v60 = vpop.permute.xlu0 %4282  ;;  %v3738_v7 = vsel %vm5935_vm12, %v3733_v23, %v3737_v19  ;;  %v3728_v56 = vsel %vm5935_vm12, %v3723_v31, %v8018_v22 }
 0x277   : > { %v8074_v45 = vld [vmem:[#allocation3 + $0xa8] sm:$0xf]  ;;  %v8105_v38 = vcombine.low %v3728_v56, %v3738_v7 }
 0x278   : > { %v3762_v2 = vsel %vm5935_vm12, %v3757_v59, %v3761_v32  ;;  %4261 = vrot.lane.b32.xlu1 %v5507_v52, %s5813_s30  ;;  %4364 = vrot.lane.b32.xlu0 %v5507_v52, %s5817_s13  ;;  %v8076_v50 = vld [vmem:[#allocation3 + $0x9c] sm:$0xf]  ;;  %v3788_v16 = vshrl.u32 %v8074_v45, 16  ;;  %v3791_v52 = vshll.u32 %v8074_v45, 16 }
 0x279   : > { %v8082_v63 = vld [vmem:[#allocation3 + $0xac] sm:$0xf]  ;;  %v3764_v55 = vshrl.u32 %v8076_v50, 16  ;;  %v3767_v48 = vshll.u32 %v8076_v50, 16  ;;  %v8095_v24 = vcombine.low %v3752_v25, %v3762_v2  ;;  %v5459_v22 = vrot.slane %v8076_v50, 9 }
 0x27a   : > { %v8089_v36 = vpop.permute.xlu1 %4167  ;;  %v8093_v21 = vcombine.low %v8074_v45, %v8082_v63  ;;  %v3437_v57 = vld [vmem:[#allocation3 + $0xa0] sm:$0xf]  ;;  %v8102_v0 = vld [vmem:[#allocation3 + $0xa4] sm:$0x1]  ;;  %v4314_v29 = vpop.permute.xlu0 %4313  ;;  %v3983_v4 = vrot.slane %v8082_v63, 5 }
 0x27b   : > { %v3777_v40 = vshrl.u32 %v3437_v57, 16  ;;  %v3976_v49 = vrot.slane %v3437_v57, 5  ;;  %v4598_v34 = vsel %vm2160_vm6, %v4566_v44, %v4314_v29  ;;  %v8114_v9 = vcombine.low %v8076_v50, %v3437_v57 }
 0x27c   : > { %4300 = vrot.lane.b32.xlu1 %v8093_v21, %s5815_s9  ;;  %4434 = vrot.lane.b32.xlu0 %v8095_v24, %s5820_s22  ;;  %v4630_v46 = vsel %vm2193_vm7, %v4598_v34, %v8011_v8  ;;  %v3979_v10 = vrot.slane %v8102_v0, 5  ;;  %v3766_v17 = vrot.slane %v3764_v55, 4  ;;  %v3769_v11 = vrot.slane %v3767_v48, 5 }
 0x27d   : > { %v5691_v42 = vpop.f32.mrb[28].mxu0  ;;  %v4662_v33 = vsel %vm2226_vm8, %v4630_v46, %v7835_v51  ;;  %v3978_v53 = vrot.slane %v3976_v49, 4  ;;  %v3773_v18 = vshll.u32 %v3437_v57, 16  ;;  %v3779_v2 = vrot.slane %v3777_v40, 4 }
 0x27e   : > { %v2660_v59 = vmul.f32 %v7632_v26, %v5691_v42  ;;  %v4417_v58 = vpop.permute.xlu1 %4416  ;;  %v2608_v23 = vpop.f32.mrb[29].mxu0  ;;  %v4694_v32 = vsel %vm2259_vm10, %v4662_v33, %v4419_v20  ;;  %v3801_v44 = vshrl.u32 %v8082_v63, 16 }
 0x27f   : > { %v4692_v12 = vsel %vm2259_vm10, %v4660_v6, %v4417_v58  ;;  %v2658_v8 = vmul.f32 %v7632_v26, %v2608_v23  ;;  %v8126_v31 = vpop.permute.xlu0 %4457  ;;  %v5692_v19 = vpop.f32.mrb[30].mxu0  ;;  %v4728_v28 = vsel %vm2292_vm11, %v4694_v32, %v7928_v41  ;;  %v3980_v57 = vsel %vm5912_vm9, %v3978_v53, %v3979_v10 }
 0x280   : > { %v2699_v51 = vadd.f32 %v7649_v43, %v2660_v59  ;;  %v4725_v50 = vsel %vm2292_vm11, %v4692_v12, %v7987_v27  ;;  %v2661_v7 = vmul.f32 %v7632_v26, %v5692_v19  ;;  %4331 = vrot.lane.b32.xlu1 %v8095_v24, %s5819_s19  ;;  %v2611_v20 = vpop.f32.mrb[31].mxu0  ;;  %4771 = vst.msk [vmem:[#allocation5 + $0x10] sm:$0xff] %vm8759_vm15, %v4728_v28  ;;  %v3775_v56 = vrot.slane %v3773_v18, 5  ;;  %vm8760_vm15 = vmmov %vm8756_vm5 }
 0x281   : > { %4770 = vst.msk [vmem:[#allocation5 + $0x8] sm:$0xff] %vm8756_vm5, %v4725_v50  ;;  %v2697_v25 = vadd.f32 %v7649_v43, %v2658_v8  ;;  %v2659_v41 = vmul.f32 %v7632_v26, %v2611_v20  ;;  %4298 = vrot.lane.b32.xlu0 %v8114_v9, %s5815_s9  ;;  %v3770_v27 = vor.u32 %v3769_v11, %v3766_v17  ;;  %v3783_v26 = vshll.u32 %v8102_v0, 16 }
 0x282   : > { %v2731_v55 = vmax.f32 %v2699_v51, 0.0  ;;  %v2700_v48 = vadd.f32 %v7649_v43, %v2661_v7  ;;  %v8144_v6 = vpop.permute.xlu1 %4165  ;;  %v3977_v17 = vsel %vm5912_vm9, %v5459_v22, %v3976_v49  ;;  %v3780_v11 = vor.u32 %v3779_v2, %v3775_v56  ;;  %v3390_v7 = vld [vmem:[#allocation3 + $0xc0] sm:$0xf] }
 0x283   : > { %v2729_v29 = vmax.f32 %v2697_v25, 0.0  ;;  %v2698_v40 = vadd.f32 %v7649_v43, %v2659_v41  ;;  %v8149_v34 = vpop.permute.xlu0 %4251  ;;  %v3771_v46 = vrot.slane %v3770_v27, 4  ;;  %v8158_v43 = vcombine.low %v3977_v17, %v3980_v57 }
 0x284   : > { %v5607_v42 = vpack.c.bf16 %v2731_v55, %v2731_v55  ;;  %v2732_v33 = vmax.f32 %v2700_v48, 0.0  ;;  %4401 = vrot.lane.b32.xlu1 %v8114_v9, %s5816_s10  ;;  %v8160_v58 = vrot.slane %v3788_v16, 4  ;;  %v3781_v32 = vrot.slane %v3780_v11, 4 }
 0x285   : > { %v5605_v59 = vpack.c.bf16 %v2729_v29, %v2729_v29  ;;  %v2730_v10 = vmax.f32 %v2698_v40, 0.0  ;;  %4329 = vrot.lane.b32.xlu0 %v8105_v38, %s5819_s19  ;;  %v3776_v18 = vsel %vm5935_vm12, %v3771_v46, %v3775_v56  ;;  %v3785_v19 = vrot.slane %v3783_v26, 5  ;;  %v3383_v56 = vld [vmem:[#allocation3 + $0xb4] sm:$0xf] }
 0x286   : > { %v3221_v23 = vshrl.u32 %v5607_v42, 16  ;;  %v5608_v0 = vpack.c.bf16 %v2732_v33, %v2732_v33  ;;  %v8162_v53 = vpop.permute.xlu1 %4354  ;;  %v3224_v12 = vshll.u32 %v5607_v42, 16  ;;  %v3793_v55 = vrot.slane %v3791_v52, 5  ;;  %v3394_v42 = vld [vmem:[#allocation3 + $0xc8] sm:$0x1] }
 0x287   : > { %v3204_v49 = vshrl.u32 %v5605_v59, 16  ;;  %v5606_v22 = vpack.c.bf16 %v2730_v10, %v2730_v10  ;;  %v8166_v8 = vpop.permute.xlu0 %4455  ;;  %v3207_v28 = vshll.u32 %v5605_v59, 16  ;;  %v4787_v41 = vld [vmem:[#allocation5 + $0x10] sm:$0xff]  ;;  %v3786_v27 = vsel %vm5935_vm12, %v3781_v32, %v3785_v19 }
 0x288   : > { %v3223_v2 = vrot.slane %v3221_v23, 7  ;;  %v3229_v51 = vshrl.u32 %v5608_v0, 16  ;;  %v3232_v50 = vshll.u32 %v5608_v0, 16  ;;  %4183 = vrot.lane.b32.xlu1 %v8095_v24, %s5814_s8  ;;  %v4786_v16 = vld [vmem:[#allocation5 + $0x8] sm:$0xff]  ;;  %v8182_v11 = vcombine.low %v3776_v18, %v3786_v27  ;;  %v3387_v23 = vld [vmem:[#allocation3 + $0xbc] sm:$0x1] }
 0x289   : > { %v3206_v20 = vrot.slane %v3204_v49, 7  ;;  %v3212_v25 = vshrl.u32 %v5606_v22, 16  ;;  %4471 = vrot.lane.b32.xlu0 %v8158_v43, %s5818_s16  ;;  %5704 = vmatmul.mubr.msk.bf16.vlgmr.msra.gmra.mrb[0].mxu1 %vm8760_vm15, %v4786_v16  ;;  %v3215_v29 = vshll.u32 %v5606_v22, 16  ;;  %v3441_v0 = vld [vmem:[#allocation3 + $0xb0] sm:$0x1]  ;;  %v3797_v32 = vshll.u32 %v8082_v63, 16 }
 0x28a   : > { %v3226_v48 = vor.u32 %v3224_v12, %v3223_v2  ;;  %v3227_v57 = vrot.slane %v3223_v2, 4  ;;  %v3231_v24 = vrot.slane %v3229_v51, 7  ;;  %v8177_v40 = vpop.permute.xlu1 %4249  ;;  %5707 = vmatprep.mubr.msk.bf16.mxu1 %vm8756_vm5, %v4787_v41  ;;  %v3794_v18 = vor.u32 %v3793_v55, %v8160_v58 }
 0x28b   : > { %v3209_v46 = vor.u32 %v3207_v28, %v3206_v20  ;;  %v3210_v26 = vrot.slane %v3206_v20, 4  ;;  %v3214_v33 = vrot.slane %v3212_v25, 7  ;;  %v8180_v17 = vpop.permute.xlu0 %4352  ;;  %v3799_v51 = vrot.slane %v3797_v32, 5 }
 0x28c   : > { %v3391_v52 = vsel %vm5942_vm13, %v3226_v48, %v3390_v7  ;;  %v3234_v59 = vor.u32 %v3232_v50, %v3231_v24  ;;  %v3236_v10 = vrot.slane %v3231_v24, 4  ;;  %4432 = vrot.lane.b32.xlu1 %v8105_v38, %s5820_s22  ;;  %v3803_v54 = vrot.slane %v3801_v44, 4 }
 0x28d   : > { %3392 = vst [vmem:[#allocation3 + $0xc0] sm:$0xf] %v3391_v52  ;;  %v3384_v12 = vsel %vm5942_vm13, %v3209_v46, %v3383_v56  ;;  %v3217_v49 = vor.u32 %v3215_v29, %v3214_v33  ;;  %v3219_v22 = vrot.slane %v3214_v33, 4  ;;  %4333 = vrot.lane.b32.xlu0 %v8182_v11, %s5819_s19  ;;  %v4492_v16 = vsel %vm2045_vm1, %v7372_v61, %v8144_v6 }
 0x28e   : > { %3385 = vst [vmem:[#allocation3 + $0xb4] sm:$0xf] %v3384_v12  ;;  %v3235_v19 = vsel %vm5953_vm14, %v3227_v57, %v3234_v59  ;;  %v3395_v2 = vsel %vm5874_vm3, %v3236_v10, %v3394_v42  ;;  %v8198_v28 = vpop.permute.xlu1 %4288  ;;  %v3807_v20 = vshll.u32 %v3441_v0, 16  ;;  %v3804_v44 = vor.u32 %v3803_v54, %v3799_v51 }
 0x28f   : > { %3393 = vst.msk [vmem:[#allocation3 + $0xc4] sm:$0xf] %vm280_vm0, %v3235_v19  ;;  %3396 = vst [vmem:[#allocation3 + $0xc8] sm:$0x1] %v3395_v2  ;;  %v3218_v50 = vsel %vm5953_vm14, %v3210_v26, %v3217_v49  ;;  %v3388_v58 = vsel %vm5874_vm3, %v3219_v22, %v3387_v23  ;;  %v8210_v7 = vpop.permute.xlu0 %4391  ;;  %v3795_v1 = vrot.slane %v3794_v18, 4  ;;  %v4495_v61 = vsel %vm2045_vm1, %v7338_v62, %v8089_v36 }
 0x290   : > { %3386 = vst.msk [vmem:[#allocation3 + $0xb8] sm:$0xf] %vm280_vm0, %v3218_v50  ;;  %3389 = vst [vmem:[#allocation3 + $0xbc] sm:$0x1] %v3388_v58  ;;  %4181 = vrot.lane.b32.xlu1 %v8105_v38, %s5814_s8  ;;  %v4536_v6 = vsel %vm2094_vm2, %v4492_v16, %v8007_v30  ;;  %v3805_v41 = vrot.slane %v3804_v44, 4  ;;  %v3809_v27 = vrot.slane %v3807_v20, 5  ;;  %v4538_v48 = vsel %vm2094_vm2, %v4495_v61, %v7962_v3 }
 0x291   : > { %4368 = vrot.lane.b32.xlu0 %v8158_v43, %s5817_s13  ;;  %v3985_v38 = vrot.slane %v3983_v4, 4  ;;  %v4568_v62 = vsel %vm2127_vm4, %v4536_v6, %v7833_v15  ;;  %v3800_v30 = vsel %vm5935_vm12, %v3795_v1, %v3799_v51  ;;  %v5460_v29 = vrot.slane %v8074_v45, 9  ;;  %vm8761_vm0 = vmmov %vm8756_vm5 }
 0x292   : > { %v8223_v25 = vpop.permute.xlu1 %4319  ;;  %v3810_v63 = vsel %vm5935_vm12, %v3805_v41, %v3809_v27  ;;  %v4570_v15 = vsel %vm2127_vm4, %v4538_v48, %v8066_v60  ;;  %v4600_v42 = vsel %vm2160_vm6, %v4568_v62, %v8046_v39  ;;  %vm8762_vm3 = vmmov %vm8761_vm0 }
 0x293   : > { %v4423_v55 = vpop.permute.xlu0 %4422  ;;  %v8239_v57 = vcombine.low %v3800_v30, %v3810_v63  ;;  %v4632_v39 = vsel %vm2193_vm7, %v4600_v42, %v7970_v5  ;;  %vm8763_vm13 = vmmov %vm8761_vm0 }
 0x294   : > { %4265 = vrot.lane.b32.xlu1 %v8158_v43, %s5813_s30  ;;  %v3986_v43 = vrot.slane %v3441_v0, 5  ;;  %v3984_v0 = vsel %vm5912_vm9, %v5460_v29, %v3983_v4  ;;  %v4664_v44 = vsel %vm2226_vm8, %v4632_v39, %v8064_v37  ;;  %v8294_v48 = vld [vmem:[#allocation3 + $0xc0] sm:$0xf]  ;;  %vm8764_vm14 = vmmov %vm8761_vm0 }
 0x295   : > { %4403 = vrot.lane.b32.xlu0 %v8093_v21, %s5816_s10  ;;  %v3442_v56 = vld [vmem:[#allocation3 + $0xb4] sm:$0xf]  ;;  %vm8767_vm15 = vmmov %vm8761_vm0 }
 0x296   : > { %v8237_v36 = vpop.permute.xlu1 %4389  ;;  %v3987_v26 = vsel %vm5912_vm9, %v3985_v38, %v3986_v43  ;;  %v3812_v52 = vshrl.u32 %v3442_v56, 16  ;;  %v3815_v45 = vshll.u32 %v3442_v56, 16  ;;  %v5461_v60 = vrot.slane %v3442_v56, 9  ;;  %vm8768_vm5 = vmmov %vm8761_vm0 }
 0x297   : > { %v8241_v24 = vpop.permute.xlu0 %4286  ;;  %v3443_v3 = vld [vmem:[#allocation3 + $0xb8] sm:$0xf]  ;;  %v3444_v46 = vld [vmem:[#allocation3 + $0xbc] sm:$0x1]  ;;  %v5510_v22 = vcombine.low %v3984_v0, %v3987_v26 }
 0x298   : > { %4335 = vrot.lane.b32.xlu1 %v8239_v57, %s5819_s19  ;;  %v3990_v33 = vrot.slane %v3443_v3, 5  ;;  %v3821_v59 = vshll.u32 %v3443_v3, 16  ;;  %v3825_v10 = vshrl.u32 %v3443_v3, 16  ;;  %v3993_v12 = vrot.slane %v3444_v46, 5 }
 0x299   : > { %4438 = vrot.lane.b32.xlu0 %v8239_v57, %s5820_s22  ;;  %v3814_v5 = vrot.slane %v3812_v52, 4  ;;  %v3817_v16 = vrot.slane %v3815_v45, 5  ;;  %v3831_v37 = vshll.u32 %v3444_v46, 16  ;;  %v8302_v29 = vcombine.low %v3442_v56, %v3443_v3 }
 0x29a   : > { %v8254_v23 = vpop.permute.xlu1 %4171  ;;  %v3992_v32 = vrot.slane %v3990_v33, 4  ;;  %v3823_v18 = vrot.slane %v3821_v59, 5  ;;  %v3827_v19 = vrot.slane %v3825_v10, 4  ;;  %v3991_v51 = vsel %vm5912_vm9, %v5461_v60, %v3990_v33 }
 0x29b   : > { %v4318_v49 = vpop.permute.xlu0 %4317  ;;  %v3833_v30 = vrot.slane %v3831_v37, 5  ;;  %v3996_v46 = vshrl.u32 %v8294_v48, 16 }
 0x29c   : > { %v4602_v2 = vsel %vm2160_vm6, %v4570_v15, %v4318_v49  ;;  %4436 = vrot.lane.b32.xlu1 %v8182_v11, %s5820_s22  ;;  %v3994_v54 = vsel %vm5912_vm9, %v3992_v32, %v3993_v12  ;;  %v3999_v15 = vshll.u32 %v8294_v48, 16  ;;  %v3447_v12 = vld [vmem:[#allocation3 + $0xc8] sm:$0x1] }
 0x29d   : > { %v4634_v50 = vsel %vm2193_vm7, %v4602_v2, %v8180_v17  ;;  %4473 = vrot.lane.b32.xlu0 %v5510_v22, %s5818_s16  ;;  %v8270_v58 = vcombine.low %v3991_v51, %v3994_v54  ;;  %v3828_v17 = vor.u32 %v3827_v19, %v3823_v18  ;;  %v3998_v0 = vrot.slane %v3996_v46, 4  ;;  %v8765_v2 = vld [vmem:[#allocation7_spill] sm:$0xff] }
 0x29e   : > { %v4666_v20 = vsel %vm2226_vm8, %v4634_v50, %v8026_v35  ;;  %v4421_v4 = vpop.permute.xlu1 %4420  ;;  %v3818_v35 = vor.u32 %v3817_v16, %v3814_v5  ;;  %v4001_v60 = vrot.slane %v3999_v15, 5  ;;  %v4015_v19 = vshll.u32 %v3447_v12, 16  ;;  %v8333_v5 = vld [vmem:[#allocation3 + $0xcc] sm:$0xf] }
 0x29f   : > { %v4698_v1 = vsel %vm2259_vm10, %v4666_v20, %v4423_v55  ;;  %v4696_v61 = vsel %vm2259_vm10, %v4664_v44, %v4421_v4  ;;  %v8278_v6 = vpop.permute.xlu0 %4461  ;;  %v8290_v55 = vld [vmem:[#allocation3 + $0xc4] sm:$0xf] }
 0x2a0   : > { %v4734_v41 = vsel %vm2292_vm11, %v4698_v1, %v8126_v31  ;;  %v4731_v27 = vsel %vm2292_vm11, %v4696_v61, %v8166_v8  ;;  %4185 = vrot.lane.b32.xlu1 %v8182_v11, %s5814_s8  ;;  %v3829_v31 = vrot.slane %v3828_v17, 4  ;;  %v4009_v8 = vshrl.u32 %v8290_v55, 16  ;;  %v8339_v1 = vld [vmem:[#allocation3 + $0xd0] sm:$0xf] }
 0x2a1   : > { %4773 = vst.msk [vmem:[#allocation5 + $0x20] sm:$0xff] %vm8761_vm0, %v4734_v41  ;;  %4475 = vrot.lane.b32.xlu0 %v8270_v58, %s5818_s16  ;;  %v4005_v11 = vshll.u32 %v8290_v55, 16  ;;  %v3819_v62 = vrot.slane %v3818_v35, 4  ;;  %v4002_v39 = vor.u32 %v4001_v60, %v3998_v0  ;;  %v4024_v50 = vrot.slane %v8290_v55, 5  ;;  %v8766_v35 = vld [vmem:[#allocation6_spill] sm:$0xff] }
 0x2a2   : > { %4772 = vst.msk [vmem:[#allocation5 + $0x18] sm:$0xff] %vm8762_vm3, %v4731_v27  ;;  %v4170_v63 = vpop.permute.xlu1 %4169  ;;  %v3834_v42 = vsel %vm5935_vm12, %v3829_v31, %v3833_v30  ;;  %v4011_v45 = vrot.slane %v4009_v8, 4  ;;  %v4017_v4 = vrot.slane %v4015_v19, 5  ;;  %v4030_v27 = vshrl.u32 %v8333_v5, 16  ;;  %vm8773_vm3 = vmmov %vm8761_vm0 }
 0x2a3   : > { %v8292_v38 = vpop.permute.xlu0 %4255  ;;  %v4007_v52 = vrot.slane %v4005_v11, 5  ;;  %v3824_v3 = vsel %vm5935_vm12, %v3819_v62, %v3823_v18  ;;  %v4498_v18 = vsel %vm2045_vm1, %v8765_v2, %v4170_v63  ;;  %v4003_v44 = vrot.slane %v4002_v39, 4 }
 0x2a4   : > { %4370 = vrot.lane.b32.xlu1 %v5510_v22, %s5817_s13  ;;  %v5495_v10 = vcombine.low %v3824_v3, %v3834_v42  ;;  %v4540_v16 = vsel %vm2094_vm2, %v4498_v18, %v8177_v40  ;;  %v4026_v41 = vrot.slane %v4024_v50, 4  ;;  %v4033_v40 = vshll.u32 %v8333_v5, 16 }
 0x2a5   : > { %4267 = vrot.lane.b32.xlu0 %v5510_v22, %s5813_s30  ;;  %v4012_v49 = vor.u32 %v4011_v45, %v4007_v52  ;;  %v4501_v37 = vsel %vm2045_vm1, %v8766_v35, %v8254_v23  ;;  %v4572_v63 = vsel %vm2127_vm4, %v4540_v16, %v8020_v13  ;;  %v4039_v31 = vshll.u32 %v8339_v1, 16 }
 0x2a6   : > { %v8300_v43 = vpop.permute.xlu1 %4358  ;;  %v4008_v11 = vsel %vm5935_vm12, %v4003_v44, %v4007_v52  ;;  %v4027_v62 = vrot.slane %v3447_v12, 5  ;;  %v4542_v23 = vsel %vm2094_vm2, %v4501_v37, %v8149_v34  ;;  %v5462_v13 = vrot.slane %v8294_v48, 9 }
 0x2a7   : > { %v8306_v26 = vpop.permute.xlu0 %4459  ;;  %v4013_v54 = vrot.slane %v4012_v49, 4  ;;  %v4604_v42 = vsel %vm2160_vm6, %v4572_v63, %v8223_v25  ;;  %v4035_v52 = vrot.slane %v4033_v40, 5  ;;  %v4041_v45 = vrot.slane %v4039_v31, 5 }
 0x2a8   : > { %4405 = vrot.lane.b32.xlu1 %v8302_v29, %s5816_s10  ;;  %v4789_v56 = vld [vmem:[#allocation5 + $0x20] sm:$0xff]  ;;  %v4028_v15 = vsel %vm5912_vm9, %v4026_v41, %v4027_v62  ;;  %v4025_v34 = vsel %vm5912_vm9, %v5462_v13, %v4024_v50  ;;  %v4636_v60 = vsel %vm2193_vm7, %v4604_v42, %v8162_v53 }
 0x2a9   : > { %v4788_v33 = vld [vmem:[#allocation5 + $0x18] sm:$0xff]  ;;  %4302 = vrot.lane.b32.xlu0 %v8302_v29, %s5815_s9  ;;  %v4018_v17 = vsel %vm5935_vm12, %v4013_v54, %v4017_v4  ;;  %v5514_v0 = vcombine.low %v4025_v34, %v4028_v15  ;;  %v4058_v4 = vrot.slane %v8339_v1, 5 }
 0x2aa   : > { %5708 = vmatmul.mubr.msk.bf16.gmra.mrb[4].mxu1 %vm8763_vm13, %v4788_v33  ;;  %v8317_v59 = vpop.permute.xlu1 %4253  ;;  %v5513_v46 = vcombine.low %v4008_v11, %v4018_v17  ;;  %v4032_v33 = vrot.slane %v4030_v27, 4  ;;  %vm8774_vm13 = vmmov %vm8761_vm0 }
 0x2ab   : > { %5711 = vmatprep.mubr.msk.bf16.mxu1 %vm8764_vm14, %v4789_v56  ;;  %v4357_v32 = vpop.permute.xlu0 %4356  ;;  %v4060_v27 = vrot.slane %v4058_v4, 4  ;;  %vm8775_vm14 = vmmov %vm8761_vm0 }
 0x2ac   : > { %4440 = vrot.lane.b32.xlu1 %v5495_v10, %s5820_s22  ;;  %v4036_v49 = vor.u32 %v4035_v52, %v4032_v33  ;;  %v8771_v52 = vld [vmem:[#allocation8_spill] sm:$0xff] }
 0x2ad   : > { %4337 = vrot.lane.b32.xlu0 %v5495_v10, %s5819_s19 }
 0x2ae   : > { %v8322_v22 = vpop.permute.xlu1 %4292 }
 0x2af   : > { %v8326_v51 = vpop.permute.xlu0 %4395 }
 0x2b0   : > { %4187 = vrot.lane.b32.xlu1 %v8239_v57, %s5814_s8  ;;  %v5512_v57 = vcombine.low %v8294_v48, %v8290_v55  ;;  %v4043_v55 = vshrl.u32 %v8339_v1, 16 }
 0x2b1   : > { %4372 = vrot.lane.b32.xlu0 %v8270_v58, %s5817_s13 }
 0x2b2   : > { %v8337_v20 = vpop.permute.xlu1 %4323  ;;  %v4045_v56 = vrot.slane %v4043_v55, 4 }
 0x2b3   : > { %v4427_v61 = vpop.permute.xlu0 %4426 }
 0x2b4   : > { %4189 = vrot.lane.b32.xlu1 %v5495_v10, %s5814_s8  ;;  %v3450_v10 = vld [vmem:[#allocation3 + $0xd4] sm:$0x1]  ;;  %v4046_v39 = vor.u32 %v4045_v56, %v4041_v45 }
 0x2b5   : > { %4407 = vrot.lane.b32.xlu0 %v5512_v57, %s5816_s10  ;;  %v4049_v19 = vshll.u32 %v3450_v10, 16  ;;  %v4061_v40 = vrot.slane %v3450_v10, 5 }
 0x2b6   : > { %v8356_v8 = vpop.permute.xlu1 %4393 }
 0x2b7   : > { %v8360_v30 = vpop.permute.xlu0 %4290  ;;  %v4051_v44 = vrot.slane %v4049_v19, 5  ;;  %v4062_v31 = vsel %vm5912_vm9, %v4060_v27, %v4061_v40 }
 0x2b8   : > { %4269 = vrot.lane.b32.xlu1 %v8270_v58, %s5813_s30  ;;  %v4574_v58 = vsel %vm2127_vm4, %v4542_v23, %v8241_v24  ;;  %v4668_v24 = vsel %vm2226_vm8, %v4636_v60, %v8237_v36  ;;  %v4047_v36 = vrot.slane %v4046_v39, 4  ;;  %v8770_v23 = vld [vmem:[#allocation9_spill] sm:$0xff] }
 0x2b9   : > { %4442 = vrot.lane.b32.xlu0 %v5513_v46, %s5820_s22 }
 0x2ba   : > { %v4176_v3 = vpop.permute.xlu1 %4175  ;;  %v4052_v41 = vsel %vm5935_vm12, %v4047_v36, %v4051_v44  ;;  %v8777_v44 = vld [vmem:[#allocation10_spill] sm:$0xff] }
 0x2bb   : > { %v4322_v48 = vpop.permute.xlu0 %4321 }
 0x2bc   : > { %v4606_v25 = vsel %vm2160_vm6, %v4574_v58, %v4322_v48  ;;  %4304 = vrot.lane.b32.xlu1 %v5512_v57, %s5815_s9 }
 0x2bd   : > { %v4638_v12 = vsel %vm2193_vm7, %v4606_v25, %v4357_v32  ;;  %4477 = vrot.lane.b32.xlu0 %v5514_v0, %s5818_s16 }
 0x2be   : > { %v4670_v2 = vsel %vm2226_vm8, %v4638_v12, %v8210_v7  ;;  %v4425_v18 = vpop.permute.xlu1 %4424  ;;  %v4037_v7 = vrot.slane %v4036_v49, 4 }
 0x2bf   : > { %v4702_v53 = vsel %vm2259_vm10, %v4670_v2, %v4427_v61  ;;  %v4700_v54 = vsel %vm2259_vm10, %v4668_v24, %v4425_v18  ;;  %v4466_v50 = vpop.permute.xlu0 %4465 }
 0x2c0   : > { %v4740_v32 = vsel %vm2292_vm11, %v4702_v53, %v8278_v6  ;;  %v4737_v16 = vsel %vm2292_vm11, %v4700_v54, %v8306_v26  ;;  %4339 = vrot.lane.b32.xlu1 %v5513_v46, %s5819_s19  ;;  %v5515_v6 = vcombine.low %v8333_v5, %v8339_v1  ;;  %v5463_v26 = vrot.slane %v8333_v5, 9  ;;  %s8559_s19 = scalar_lea.vmem %s8720_s7, %s5543_s26 }
 0x2c1   : > { %4775 = vst.msk [vmem:[#allocation5 + $0x30] sm:$0xff] %vm8767_vm15, %v4740_v32  ;;  %v4042_v17 = vsel %vm5935_vm12, %v4037_v7, %v4041_v45  ;;  %vm8769_vm12 = vmmov %vm8761_vm0  ;;  %v4507_v45 = vsel %vm2045_vm1, %v8771_v52, %v4176_v3 }
 0x2c2   : > { %4774 = vst.msk [vmem:[#allocation5 + $0x28] sm:$0xff] %vm8768_vm5, %v4737_v16  ;;  %v4174_v61 = vpop.permute.xlu1 %4173  ;;  %v5516_v55 = vcombine.low %v4042_v17, %v4052_v41  ;;  %v4059_v5 = vsel %vm5912_vm9, %v5463_v26, %v4058_v4  ;;  %v4546_v58 = vsel %vm2094_vm2, %v4507_v45, %v8292_v38  ;;  %vm8772_vm9 = vmmov %vm8761_vm0  ;;  %v8781_v45 = vld [vmem:[#allocation13_spill] sm:$0xff] }
 0x2c3   : > { %v8396_v57 = vpop.permute.xlu0 %4259  ;;  %v5517_v62 = vcombine.low %v4059_v5, %v4062_v31  ;;  %v4504_v13 = vsel %vm2045_vm1, %v8770_v23, %v4174_v61  ;;  %vm8778_vm15 = vmmov %vm8761_vm0 }
 0x2c4   : > { %4374 = vrot.lane.b32.xlu1 %v5514_v0, %s5817_s13  ;;  %v4544_v42 = vsel %vm2094_vm2, %v4504_v13, %v8317_v59  ;;  %v4578_v59 = vsel %vm2127_vm4, %v4546_v58, %v8360_v30  ;;  %vm8779_vm5 = vmmov %vm8761_vm0 }
 0x2c5   : > { %v4576_v56 = vsel %vm2127_vm4, %v4544_v42, %v8198_v28 }
 0x2c6   : > { %v8406_v35 = vpop.permute.xlu1 %4362  ;;  %v4608_v48 = vsel %vm2160_vm6, %v4576_v56, %v8337_v20 }
 0x2c7   : > { %v4464_v37 = vpop.permute.xlu0 %4463  ;;  %v4640_v25 = vsel %vm2193_vm7, %v4608_v48, %v8300_v43 }
 0x2c8   : > { %4409 = vrot.lane.b32.xlu1 %v5515_v6, %s5816_s10  ;;  %v4791_v1 = vld [vmem:[#allocation5 + $0x30] sm:$0xff]  ;;  %v4672_v38 = vsel %vm2226_vm8, %v4640_v25, %v8356_v8 }
 0x2c9   : > { %v4790_v63 = vld [vmem:[#allocation5 + $0x28] sm:$0xff] }
 0x2ca   : > { %5712 = vmatmul.mubr.msk.bf16.gmra.mrb[8].mxu1 %vm8761_vm0, %v4790_v63  ;;  %v4258_v47 = vpop.permute.xlu1 %4257 }
 0x2cb   : > { %5715 = vmatprep.mubr.msk.bf16.mxu1 %vm8769_vm12, %v4791_v1  ;;  %v4361_v11 = vpop.permute.xlu0 %4360  ;;  %vm8782_vm12 = vmmov %vm8761_vm0 }
 0x2cc   : > { %4444 = vrot.lane.b32.xlu1 %v5516_v55, %s5820_s22 }
 0x2ce   : > { %v8416_v46 = vpop.permute.xlu1 %4296 }
 0x2cf   : > { %v4400_v15 = vpop.permute.xlu0 %4399 }
 0x2d0   : > { %4479 = vrot.lane.b32.xlu1 %v5517_v62, %s5818_s16 }
 0x2d2   : > { %v4328_v14 = vpop.permute.xlu1 %4327 }
 0x2d3   : > { %v4431_v33 = vpop.permute.xlu0 %4430 }
 0x2d6   : > { %v4398_v34 = vpop.permute.xlu1 %4397 }
 0x2d7   : > { %v4295_v10 = vpop.permute.xlu0 %4294 }
 0x2da   : > { %v4180_v0 = vpop.permute.xlu1 %4179 }
 0x2db   : > { %v4326_v60 = vpop.permute.xlu0 %4325  ;;  %v4513_v4 = vsel %vm2045_vm1, %v8777_v44, %v4180_v0 }
 0x2dc   : > { %v4610_v3 = vsel %vm2160_vm6, %v4578_v59, %v4326_v60  ;;  %v4550_v17 = vsel %vm2094_vm2, %v4513_v4, %v8396_v57 }
 0x2dd   : > { %v4642_v28 = vsel %vm2193_vm7, %v4610_v3, %v4361_v11  ;;  %v4582_v40 = vsel %vm2127_vm4, %v4550_v17, %v4295_v10 }
 0x2de   : > { %v4674_v12 = vsel %vm2226_vm8, %v4642_v28, %v8326_v51  ;;  %v4429_v49 = vpop.permute.xlu1 %4428 }
 0x2df   : > { %v4706_v20 = vsel %vm2259_vm10, %v4674_v12, %v4431_v33  ;;  %v4704_v39 = vsel %vm2259_vm10, %v4672_v38, %v4429_v49  ;;  %v4470_v30 = vpop.permute.xlu0 %4469  ;;  %v8780_v33 = vld [vmem:[#allocation12_spill] sm:$0xff] }
 0x2e0   : > { %v4746_v19 = vsel %vm2292_vm11, %v4706_v20, %v4466_v50  ;;  %v4743_v43 = vsel %vm2292_vm11, %v4704_v39, %v4464_v37  ;;  %v8776_v50 = vld [vmem:[#allocation11_spill] sm:$0xff] }
 0x2e1   : > { %4777 = vst.msk [vmem:[#allocation5 + $0x40] sm:$0xff] %vm8772_vm9, %v4746_v19  ;;  %vm8783_vm9 = vmmov %vm8761_vm0 }
 0x2e2   : > { %4776 = vst.msk [vmem:[#allocation5 + $0x38] sm:$0xff] %vm8773_vm3, %v4743_v43  ;;  %v4178_v2 = vpop.permute.xlu1 %4177  ;;  %vm8784_vm3 = vmmov %vm8761_vm0 }
 0x2e3   : > { %v4264_v24 = vpop.permute.xlu0 %4263  ;;  %v4510_v7 = vsel %vm2045_vm1, %v8776_v50, %v4178_v2 }
 0x2e4   : > { %v4548_v61 = vsel %vm2094_vm2, %v4510_v7, %v4258_v47 }
 0x2e5   : > { %v4580_v41 = vsel %vm2127_vm4, %v4548_v61, %v8322_v22 }
 0x2e6   : > { %v4367_v51 = vpop.permute.xlu1 %4366  ;;  %v4612_v55 = vsel %vm2160_vm6, %v4580_v41, %v4328_v14 }
 0x2e7   : > { %v4468_v18 = vpop.permute.xlu0 %4467  ;;  %v4644_v57 = vsel %vm2193_vm7, %v4612_v55, %v8406_v35 }
 0x2e8   : > { %v4793_v8 = vld [vmem:[#allocation5 + $0x40] sm:$0xff]  ;;  %v4676_v62 = vsel %vm2226_vm8, %v4644_v57, %v4398_v34 }
 0x2e9   : > { %v4792_v53 = vld [vmem:[#allocation5 + $0x38] sm:$0xff] }
 0x2ea   : > { %5716 = vmatmul.mubr.msk.bf16.gmra.mrb[12].mxu1 %vm8774_vm13, %v4792_v53  ;;  %v4262_v54 = vpop.permute.xlu1 %4261  ;;  %vm8785_vm13 = vmmov %vm8761_vm0 }
 0x2eb   : > { %5719 = vmatprep.mubr.msk.bf16.mxu1 %vm8775_vm14, %v4793_v8  ;;  %v4365_v32 = vpop.permute.xlu0 %4364  ;;  %vm8786_vm14 = vmmov %vm8761_vm0 }
 0x2ee   : > { %v8449_v16 = vpop.permute.xlu1 %4300 }
 0x2ef   : > { %v4435_v36 = vpop.permute.xlu0 %4434 }
 0x2f2   : > { %v4332_v6 = vpop.permute.xlu1 %4331 }
 0x2f3   : > { %v4299_v26 = vpop.permute.xlu0 %4298 }
 0x2f6   : > { %v4402_v27 = vpop.permute.xlu1 %4401 }
 0x2f7   : > { %v4330_v37 = vpop.permute.xlu0 %4329 }
 0x2f8   : > { %v4614_v63 = vsel %vm2160_vm6, %v4582_v40, %v4330_v37 }
 0x2f9   : > { %v4646_v1 = vsel %vm2193_vm7, %v4614_v63, %v4365_v32 }
 0x2fa   : > { %v4678_v5 = vsel %vm2226_vm8, %v4646_v1, %v4400_v15  ;;  %v4184_v31 = vpop.permute.xlu1 %4183 }
 0x2fb   : > { %v4710_v47 = vsel %vm2259_vm10, %v4678_v5, %v4435_v36  ;;  %v4472_v11 = vpop.permute.xlu0 %4471  ;;  %v4519_v52 = vsel %vm2045_vm1, %v8780_v33, %v4184_v31 }
 0x2fc   : > { %v4752_v22 = vsel %vm2292_vm11, %v4710_v47, %v4470_v30  ;;  %v4554_v58 = vsel %vm2094_vm2, %v4519_v52, %v4264_v24 }
 0x2fd   : > { %4779 = vst.msk [vmem:[#allocation5 + $0x50] sm:$0xff] %vm8778_vm15, %v4752_v22  ;;  %v4586_v25 = vsel %vm2127_vm4, %v4554_v58, %v4299_v26  ;;  %vm8787_vm15 = vmmov %vm8761_vm0 }
 0x2fe   : > { %v4433_v23 = vpop.permute.xlu1 %4432 }
 0x2ff   : > { %v4708_v13 = vsel %vm2259_vm10, %v4676_v62, %v4433_v23  ;;  %v4334_v42 = vpop.permute.xlu0 %4333 }
 0x300   : > { %v4749_v14 = vsel %vm2292_vm11, %v4708_v13, %v4468_v18 }
 0x301   : > { %4778 = vst.msk [vmem:[#allocation5 + $0x48] sm:$0xff] %vm8779_vm5, %v4749_v14  ;;  %vm8788_vm5 = vmmov %vm8761_vm0 }
 0x302   : > { %v4182_v15 = vpop.permute.xlu1 %4181 }
 0x303   : > { %v4516_v35 = vsel %vm2045_vm1, %v8781_v45, %v4182_v15  ;;  %v4369_v56 = vpop.permute.xlu0 %4368 }
 0x304   : > { %v4552_v10 = vsel %vm2094_vm2, %v4516_v35, %v4262_v54  ;;  %v4795_v3 = vld [vmem:[#allocation5 + $0x50] sm:$0xff] }
 0x305   : > { %v4584_v34 = vsel %vm2127_vm4, %v4552_v10, %v8416_v46  ;;  %v4618_v46 = vsel %vm2160_vm6, %v4586_v25, %v4334_v42 }
 0x306   : > { %v4266_v48 = vpop.permute.xlu1 %4265  ;;  %v4616_v60 = vsel %vm2160_vm6, %v4584_v34, %v4332_v6  ;;  %v4650_v49 = vsel %vm2193_vm7, %v4618_v46, %v4369_v56 }
 0x307   : > { %v4404_v0 = vpop.permute.xlu0 %4403  ;;  %v4648_v38 = vsel %vm2193_vm7, %v4616_v60, %v4367_v51 }
 0x308   : > { %v4794_v59 = vld [vmem:[#allocation5 + $0x48] sm:$0xff]  ;;  %v4682_v20 = vsel %vm2226_vm8, %v4650_v49, %v4404_v0  ;;  %v4680_v39 = vsel %vm2226_vm8, %v4648_v38, %v4402_v27  ;;  %v2735_v49 = vld [vmem:[%s5921_s29 + $0x10] sm:$0xff] }
 0x309   : > { %5720 = vmatmul.mubr.msk.bf16.gmra.mrb[16].mxu1 %vm8761_vm0, %v4794_v59 }
 0x30a   : > { %v4336_v28 = vpop.permute.xlu1 %4335  ;;  %5723 = vmatprep.mubr.msk.bf16.mxu1 %vm8782_vm12, %v4795_v3  ;;  %vm8789_vm12 = vmmov %vm8761_vm0  ;;  %v8536_v3 = vld [vmem:[%s8718_s5] ss:$0 sm:$0xff] }
 0x30b   : > { %v4439_v12 = vpop.permute.xlu0 %4438 }
 0x30c   : > { %v4714_v19 = vsel %vm2259_vm10, %v4682_v20, %v4439_v12  ;;  %v8541_v12 = vld [vmem:[%s8719_s6] ss:$0 sm:$0xff] }
 0x30e   : > { %v4437_v30 = vpop.permute.xlu1 %4436 }
 0x30f   : > { %v4712_v43 = vsel %vm2259_vm10, %v4680_v39, %v4437_v30  ;;  %v4474_v2 = vpop.permute.xlu0 %4473 }
 0x310   : > { %v4755_v24 = vsel %vm2292_vm11, %v4712_v43, %v4472_v11  ;;  %v4758_v18 = vsel %vm2292_vm11, %v4714_v19, %v4474_v2  ;;  %v2733_v19 = vld [vmem:[%s5921_s29] sm:$0xff] }
 0x311   : > { %4780 = vst.msk [vmem:[#allocation5 + $0x58] sm:$0xff] %vm8783_vm9, %v4755_v24  ;;  %vm8790_vm9 = vmmov %vm8761_vm0 }
 0x312   : > { %4781 = vst.msk [vmem:[#allocation5 + $0x60] sm:$0xff] %vm8784_vm3, %v4758_v18  ;;  %v4186_v51 = vpop.permute.xlu1 %4185  ;;  %v2736_v18 = vld [vmem:[%s5921_s29 + $0x18] sm:$0xff] }
 0x313   : > { %v4522_v53 = vsel %vm2045_vm1, %v8114_v9, %v4186_v51  ;;  %v4476_v8 = vpop.permute.xlu0 %4475 }
 0x314   : > { %v4556_v54 = vsel %vm2094_vm2, %v4522_v53, %v4266_v48 }
 0x315   : > { %v4588_v50 = vsel %vm2127_vm4, %v4556_v54, %v8449_v16  ;;  %v2734_v54 = vld [vmem:[%s5921_s29 + $0x8] sm:$0xff] }
 0x316   : > { %v4371_v32 = vpop.permute.xlu1 %4370  ;;  %v4620_v4 = vsel %vm2160_vm6, %v4588_v50, %v4336_v28 }
 0x317   : > { %v4268_v7 = vpop.permute.xlu0 %4267  ;;  %v4652_v9 = vsel %vm2193_vm7, %v4620_v4, %v4371_v32 }
 0x318   : > { %v4796_v36 = vld [vmem:[#allocation5 + $0x58] sm:$0xff] }
 0x319   : > { %5724 = vmatmul.mubr.msk.bf16.gmra.mrb[20].mxu1 %vm8785_vm13, %v4796_v36  ;;  %v4797_v44 = vld [vmem:[#allocation5 + $0x60] sm:$0xff] }
 0x31a   : > { %v4406_v61 = vpop.permute.xlu1 %4405  ;;  %5727 = vmatprep.mubr.msk.bf16.mxu1 %vm8786_vm14, %v4797_v44 }
 0x31b   : > { %v4303_v6 = vpop.permute.xlu0 %4302  ;;  %v4684_v26 = vsel %vm2226_vm8, %v4652_v9, %v4406_v61 }
 0x31e   : > { %v4441_v17 = vpop.permute.xlu1 %4440 }
 0x31f   : > { %v4716_v41 = vsel %vm2259_vm10, %v4684_v26, %v4441_v17  ;;  %v4338_v27 = vpop.permute.xlu0 %4337 }
 0x320   : > { %v4761_v16 = vsel %vm2292_vm11, %v4716_v41, %v4476_v8  ;;  %v2739_v41 = vld [vmem:[%s5921_s29 + $0x30] sm:$0xff] }
 0x321   : > { %4782 = vst.msk [vmem:[#allocation5 + $0x68] sm:$0xff] %vm8787_vm15, %v4761_v16 }
 0x322   : > { %v4188_v40 = vpop.permute.xlu1 %4187 }
 0x323   : > { %v4525_v37 = vsel %vm2045_vm1, %v8093_v21, %v4188_v40  ;;  %v4373_v63 = vpop.permute.xlu0 %4372 }
 0x324   : > { %v4558_v55 = vsel %vm2094_vm2, %v4525_v37, %v4268_v7  ;;  %v2737_v37 = vld [vmem:[%s5921_s29 + $0x20] sm:$0xff] }
 0x325   : > { %v4590_v1 = vsel %vm2127_vm4, %v4558_v55, %v4303_v6 }
 0x326   : > { %v4190_v5 = vpop.permute.xlu1 %4189  ;;  %v4622_v47 = vsel %vm2160_vm6, %v4590_v1, %v4338_v27 }
 0x327   : > { %v4408_v31 = vpop.permute.xlu0 %4407  ;;  %v4654_v22 = vsel %vm2193_vm7, %v4622_v47, %v4373_v63  ;;  %v4528_v35 = vsel %vm2045_vm1, %v8302_v29, %v4190_v5  ;;  %v2740_v5 = vld [vmem:[%s5921_s29 + $0x38] sm:$0xff] }
 0x328   : > { %v4798_v11 = vld [vmem:[#allocation5 + $0x68] sm:$0xff]  ;;  %v4686_v23 = vsel %vm2226_vm8, %v4654_v22, %v4408_v31 }
 0x329   : > { %5728 = vmatmul.mubr.msk.bf16.gmra.mrb[24].mxu1 %vm8788_vm5, %v4798_v11 }
 0x32a   : > { %v4270_v57 = vpop.permute.xlu1 %4269 }
 0x32b   : > { %v4443_v62 = vpop.permute.xlu0 %4442  ;;  %v4560_v56 = vsel %vm2094_vm2, %v4528_v35, %v4270_v57  ;;  %vm8791_vm2 = vmmov %vm8761_vm0  ;;  %v2738_v57 = vld [vmem:[%s5921_s29 + $0x28] sm:$0xff]  ;;  %v2743_v35 = vld [vmem:[%s5921_s29 + $0x50] sm:$0xff] }
 0x32c   : > { %v4718_v21 = vsel %vm2259_vm10, %v4686_v23, %v4443_v62 }
 0x32e   : > { %v4305_v13 = vpop.permute.xlu1 %4304 }
 0x32f   : > { %v4478_v42 = vpop.permute.xlu0 %4477  ;;  %v4592_v10 = vsel %vm2127_vm4, %v4560_v56, %v4305_v13 }
 0x330   : > { %v4764_v14 = vsel %vm2292_vm11, %v4718_v21, %v4478_v42 }
 0x331   : > { %4783 = vst.msk [vmem:[#allocation5 + $0x70] sm:$0xff] %vm8761_vm0, %v4764_v14 }
 0x332   : > { %v4340_v15 = vpop.permute.xlu1 %4339 }
 0x333   : > { %v4624_v58 = vsel %vm2160_vm6, %v4592_v10, %v4340_v15 }
 0x336   : > { %v4375_v33 = vpop.permute.xlu1 %4374 }
 0x337   : > { %v4656_v48 = vsel %vm2193_vm7, %v4624_v58, %v4375_v33  ;;  %v2741_v58 = vld [vmem:[%s5921_s29 + $0x40] sm:$0xff] }
 0x338   : > { %v4799_v52 = vld [vmem:[#allocation5 + $0x70] sm:$0xff] }
 0x339   : > { %5731 = vmatprep.mubr.msk.bf16.mxu1 %vm8789_vm12, %v4799_v52 }
 0x33a   : > { %v4410_v45 = vpop.permute.xlu1 %4409 }
 0x33b   : > { %v4688_v0 = vsel %vm2226_vm8, %v4656_v48, %v4410_v45 }
 0x33e   : > { %v4445_v34 = vpop.permute.xlu1 %4444 }
 0x33f   : > { %v4720_v59 = vsel %vm2259_vm10, %v4688_v0, %v4445_v34 }
 0x342   : > { %v4480_v60 = vpop.permute.xlu1 %4479 }
 0x343   : > { %v4767_v25 = vsel %vm2292_vm11, %v4720_v59, %v4480_v60  ;;  %v2744_v60 = vld [vmem:[%s5921_s29 + $0x58] sm:$0xff] }
 0x344   : > { %4784 = vst.msk [vmem:[#allocation5 + $0x78] sm:$0xff] %vm8790_vm9, %v4767_v25 }
 0x34b   : > { %v4800_v29 = vld [vmem:[#allocation5 + $0x78] sm:$0xff] }
 0x34c   : > { %5732 = vmatmul.mubr.msk.bf16.gmra.mrb[28].mxu1 %vm8791_vm2, %v4800_v29 }
 0x35c   : > { %v5705_v28 = vpop.f32.mrb[0].mxu1 }
 0x35d   : > { %v5058_v38 = vmul.f32 %v5705_v28, %v8536_v3  ;;  %v4922_v46 = vpop.f32.mrb[1].mxu1 }
 0x35e   : > { %v5056_v20 = vmul.f32 %v8536_v3, %v4922_v46  ;;  %v5706_v39 = vpop.f32.mrb[2].mxu1 }
 0x35f   : > { %v5097_v30 = vadd.f32 %v8541_v12, %v5058_v38  ;;  %v5059_v43 = vmul.f32 %v5706_v39, %v8536_v3  ;;  %v4925_v2 = vpop.f32.mrb[3].mxu1  ;;  %v2742_v38 = vld [vmem:[%s5921_s29 + $0x48] sm:$0xff] }
 0x360   : > { %v5095_v24 = vadd.f32 %v8541_v12, %v5056_v20  ;;  %v5057_v51 = vmul.f32 %v8536_v3, %v4925_v2 }
 0x361   : > { %v5129_v53 = vadd.f32 %v5097_v30, %v2735_v49  ;;  %v5098_v8 = vadd.f32 %v8541_v12, %v5059_v43 }
 0x362   : > { %v5127_v32 = vadd.f32 %v5095_v24, %v2733_v19  ;;  %v5096_v50 = vadd.f32 %v8541_v12, %v5057_v51 }
 0x363   : > { %v5161_v7 = vmax.f32 %v5129_v53, 0.0  ;;  %v5130_v36 = vadd.f32 %v5098_v8, %v2736_v18  ;;  %v2747_v53 = vld [vmem:[%s5921_s29 + $0x70] sm:$0xff] }
 0x364   : > { %v5159_v44 = vmax.f32 %v5127_v32, 0.0  ;;  %v5128_v4 = vadd.f32 %v5096_v50, %v2734_v54  ;;  %v2745_v50 = vld [vmem:[%s5921_s29 + $0x60] sm:$0xff] }
 0x365   : > { %5193 = vst.msk [vmem:[%s8559_s19 + $0x10] sm:$0xff] %vm2045_vm1, %v5161_v7  ;;  %v5162_v61 = vmax.f32 %v5130_v36, 0.0 }
 0x366   : > { %5191 = vst.msk [vmem:[%s8559_s19] sm:$0xff] %vm2045_vm1, %v5159_v44  ;;  %v5160_v6 = vmax.f32 %v5128_v4, 0.0  ;;  %v2748_v4 = vld [vmem:[%s5921_s29 + $0x78] sm:$0xff] }
 0x367   : > { %5194 = vst.msk [vmem:[%s8559_s19 + $0x18] sm:$0xff] %vm2045_vm1, %v5162_v61 }
 0x368   : > { %5192 = vst.msk [vmem:[%s8559_s19 + $0x8] sm:$0xff] %vm2045_vm1, %v5160_v6 }
 0x37d   : > { %v5709_v9 = vpop.f32.mrb[4].mxu1 }
 0x37e   : > { %v5062_v26 = vmul.f32 %v5709_v9, %v8536_v3  ;;  %v4938_v17 = vpop.f32.mrb[5].mxu1 }
 0x37f   : > { %v5060_v27 = vmul.f32 %v8536_v3, %v4938_v17  ;;  %v5710_v16 = vpop.f32.mrb[6].mxu1 }
 0x380   : > { %v5101_v40 = vadd.f32 %v8541_v12, %v5062_v26  ;;  %v5063_v63 = vmul.f32 %v5710_v16, %v8536_v3  ;;  %v4941_v55 = vpop.f32.mrb[7].mxu1  ;;  %v2746_v26 = vld [vmem:[%s5921_s29 + $0x68] sm:$0xff] }
 0x381   : > { %v5099_v1 = vadd.f32 %v8541_v12, %v5060_v27  ;;  %v5061_v31 = vmul.f32 %v8536_v3, %v4941_v55 }
 0x382   : > { %v5133_v47 = vadd.f32 %v5101_v40, %v2739_v41  ;;  %v5102_v11 = vadd.f32 %v8541_v12, %v5063_v63 }
 0x383   : > { %v5131_v22 = vadd.f32 %v5099_v1, %v2737_v37  ;;  %v5100_v62 = vadd.f32 %v8541_v12, %v5061_v31 }
 0x384   : > { %v5165_v23 = vmax.f32 %v5133_v47, 0.0  ;;  %v5134_v13 = vadd.f32 %v5102_v11, %v2740_v5  ;;  %v2751_v47 = vld [vmem:[%s5921_s29 + $0x90] sm:$0xff] }
 0x385   : > { %v5163_v21 = vmax.f32 %v5131_v22, 0.0  ;;  %v5132_v42 = vadd.f32 %v5100_v62, %v2738_v57  ;;  %v2749_v62 = vld [vmem:[%s5921_s29 + $0x80] sm:$0xff] }
 0x386   : > { %5197 = vst.msk [vmem:[%s8559_s19 + $0x30] sm:$0xff] %vm2045_vm1, %v5165_v23  ;;  %v5166_v14 = vmax.f32 %v5134_v13, 0.0 }
 0x387   : > { %5195 = vst.msk [vmem:[%s8559_s19 + $0x20] sm:$0xff] %vm2045_vm1, %v5163_v21  ;;  %v5164_v15 = vmax.f32 %v5132_v42, 0.0  ;;  %v2752_v42 = vld [vmem:[%s5921_s29 + $0x98] sm:$0xff] }
 0x388   : > { %5198 = vst.msk [vmem:[%s8559_s19 + $0x38] sm:$0xff] %vm2045_vm1, %v5166_v14 }
 0x389   : > { %5196 = vst.msk [vmem:[%s8559_s19 + $0x28] sm:$0xff] %vm2045_vm1, %v5164_v15 }
 0x39d   : > { %v5713_v33 = vpop.f32.mrb[8].mxu1 }
 0x39e   : > { %v5066_v52 = vmul.f32 %v5713_v33, %v8536_v3  ;;  %v4954_v45 = vpop.f32.mrb[9].mxu1 }
 0x39f   : > { %v5064_v56 = vmul.f32 %v8536_v3, %v4954_v45  ;;  %v5714_v10 = vpop.f32.mrb[10].mxu1 }
 0x3a0   : > { %v5105_v34 = vadd.f32 %v8541_v12, %v5066_v52  ;;  %v5067_v48 = vmul.f32 %v5714_v10, %v8536_v3  ;;  %v4957_v0 = vpop.f32.mrb[11].mxu1  ;;  %v2750_v52 = vld [vmem:[%s5921_s29 + $0x88] sm:$0xff] }
 0x3a1   : > { %v5103_v59 = vadd.f32 %v8541_v12, %v5064_v56  ;;  %v5065_v25 = vmul.f32 %v8536_v3, %v4957_v0 }
 0x3a2   : > { %v5137_v29 = vadd.f32 %v5105_v34, %v2743_v35  ;;  %v5106_v28 = vadd.f32 %v8541_v12, %v5067_v48 }
 0x3a3   : > { %v5135_v46 = vadd.f32 %v5103_v59, %v2741_v58  ;;  %v5104_v49 = vadd.f32 %v8541_v12, %v5065_v25 }
 0x3a4   : > { %v5169_v20 = vmax.f32 %v5137_v29, 0.0  ;;  %v5138_v39 = vadd.f32 %v5106_v28, %v2744_v60  ;;  %v2755_v29 = vld [vmem:[%s5921_s29 + $0xb0] sm:$0xff] }
 0x3a5   : > { %v5167_v30 = vmax.f32 %v5135_v46, 0.0  ;;  %v5136_v19 = vadd.f32 %v5104_v49, %v2742_v38  ;;  %v2753_v49 = vld [vmem:[%s5921_s29 + $0xa0] sm:$0xff] }
 0x3a6   : > { %5201 = vst.msk [vmem:[%s8559_s19 + $0x50] sm:$0xff] %vm2045_vm1, %v5169_v20  ;;  %v5170_v43 = vmax.f32 %v5138_v39, 0.0 }
 0x3a7   : > { %5199 = vst.msk [vmem:[%s8559_s19 + $0x40] sm:$0xff] %vm2045_vm1, %v5167_v30  ;;  %v5168_v2 = vmax.f32 %v5136_v19, 0.0  ;;  %v2756_v19 = vld [vmem:[%s5921_s29 + $0xb8] sm:$0xff] }
 0x3a8   : > { %5202 = vst.msk [vmem:[%s8559_s19 + $0x58] sm:$0xff] %vm2045_vm1, %v5170_v43 }
 0x3a9   : > { %5200 = vst.msk [vmem:[%s8559_s19 + $0x48] sm:$0xff] %vm2045_vm1, %v5168_v2 }
 0x3bd   : > { %v5717_v24 = vpop.f32.mrb[12].mxu1 }
 0x3be   : > { %v5070_v18 = vmul.f32 %v5717_v24, %v8536_v3  ;;  %v4970_v51 = vpop.f32.mrb[13].mxu1 }
 0x3bf   : > { %v5068_v8 = vmul.f32 %v8536_v3, %v4970_v51  ;;  %v5718_v54 = vpop.f32.mrb[14].mxu1 }
 0x3c0   : > { %v5109_v32 = vadd.f32 %v8541_v12, %v5070_v18  ;;  %v5071_v7 = vmul.f32 %v5718_v54, %v8536_v3  ;;  %v4973_v36 = vpop.f32.mrb[15].mxu1  ;;  %v2754_v18 = vld [vmem:[%s5921_s29 + $0xa8] sm:$0xff] }
 0x3c1   : > { %v5107_v44 = vadd.f32 %v8541_v12, %v5068_v8  ;;  %v5069_v61 = vmul.f32 %v8536_v3, %v4973_v36 }
 0x3c2   : > { %v5141_v6 = vadd.f32 %v5109_v32, %v2747_v53  ;;  %v5110_v9 = vadd.f32 %v8541_v12, %v5071_v7 }
 0x3c3   : > { %v5139_v17 = vadd.f32 %v5107_v44, %v2745_v50  ;;  %v5108_v41 = vadd.f32 %v8541_v12, %v5069_v61 }
 0x3c4   : > { %v5173_v27 = vmax.f32 %v5141_v6, 0.0  ;;  %v5142_v16 = vadd.f32 %v5110_v9, %v2748_v4  ;;  %v2759_v6 = vld [vmem:[%s5921_s29 + $0xd0] sm:$0xff] }
 0x3c5   : > { %v5171_v40 = vmax.f32 %v5139_v17, 0.0  ;;  %v5140_v37 = vadd.f32 %v5108_v41, %v2746_v26  ;;  %v2757_v41 = vld [vmem:[%s5921_s29 + $0xc0] sm:$0xff] }
 0x3c6   : > { %5205 = vst.msk [vmem:[%s8559_s19 + $0x70] sm:$0xff] %vm2045_vm1, %v5173_v27  ;;  %v5174_v63 = vmax.f32 %v5142_v16, 0.0 }
 0x3c7   : > { %5203 = vst.msk [vmem:[%s8559_s19 + $0x60] sm:$0xff] %vm2045_vm1, %v5171_v40  ;;  %v5172_v55 = vmax.f32 %v5140_v37, 0.0  ;;  %v2760_v37 = vld [vmem:[%s5921_s29 + $0xd8] sm:$0xff] }
 0x3c8   : > { %5206 = vst.msk [vmem:[%s8559_s19 + $0x78] sm:$0xff] %vm2045_vm1, %v5174_v63 }
 0x3c9   : > { %5204 = vst.msk [vmem:[%s8559_s19 + $0x68] sm:$0xff] %vm2045_vm1, %v5172_v55 }
 0x3dc   : > { %v5721_v1 = vpop.f32.mrb[16].mxu1 }
 0x3dd   : > { %v5074_v5 = vmul.f32 %v5721_v1, %v8536_v3  ;;  %v4986_v31 = vpop.f32.mrb[17].mxu1 }
 0x3de   : > { %v5072_v11 = vmul.f32 %v8536_v3, %v4986_v31  ;;  %v5722_v57 = vpop.f32.mrb[18].mxu1 }
 0x3df   : > { %v5113_v22 = vadd.f32 %v8541_v12, %v5074_v5  ;;  %v5075_v23 = vmul.f32 %v5722_v57, %v8536_v3  ;;  %v4989_v13 = vpop.f32.mrb[19].mxu1  ;;  %v2758_v5 = vld [vmem:[%s5921_s29 + $0xc8] sm:$0xff] }
 0x3e0   : > { %v5111_v21 = vadd.f32 %v8541_v12, %v5072_v11  ;;  %v5073_v14 = vmul.f32 %v8536_v3, %v4989_v13 }
 0x3e1   : > { %v5145_v15 = vadd.f32 %v5113_v22, %v2751_v47  ;;  %v5114_v33 = vadd.f32 %v8541_v12, %v5075_v23 }
 0x3e2   : > { %v5143_v45 = vadd.f32 %v5111_v21, %v2749_v62  ;;  %v5112_v35 = vadd.f32 %v8541_v12, %v5073_v14 }
 0x3e3   : > { %v5177_v56 = vmax.f32 %v5145_v15, 0.0  ;;  %v5146_v10 = vadd.f32 %v5114_v33, %v2752_v42  ;;  %v2763_v15 = vld [vmem:[%s5921_s29 + $0xf0] sm:$0xff] }
 0x3e4   : > { %v5175_v34 = vmax.f32 %v5143_v45, 0.0  ;;  %v5144_v58 = vadd.f32 %v5112_v35, %v2750_v52  ;;  %v2761_v35 = vld [vmem:[%s5921_s29 + $0xe0] sm:$0xff] }
 0x3e5   : > { %5209 = vst.msk [vmem:[%s8559_s19 + $0x90] sm:$0xff] %vm2045_vm1, %v5177_v56  ;;  %v5178_v48 = vmax.f32 %v5146_v10, 0.0 }
 0x3e6   : > { %5207 = vst.msk [vmem:[%s8559_s19 + $0x80] sm:$0xff] %vm2045_vm1, %v5175_v34  ;;  %v5176_v0 = vmax.f32 %v5144_v58, 0.0  ;;  %v2764_v58 = vld [vmem:[%s5921_s29 + $0xf8] sm:$0xff] }
 0x3e7   : > { %5210 = vst.msk [vmem:[%s8559_s19 + $0x98] sm:$0xff] %vm2045_vm1, %v5178_v48 }
 0x3e8   : > { %5208 = vst.msk [vmem:[%s8559_s19 + $0x88] sm:$0xff] %vm2045_vm1, %v5176_v0 }
 0x3ec   : > { %v5725_v59 = vpop.f32.mrb[20].mxu1 }
 0x3ed   : > { %v5078_v60 = vmul.f32 %v5725_v59, %v8536_v3  ;;  %v5002_v25 = vpop.f32.mrb[21].mxu1 }
 0x3ee   : > { %v5076_v28 = vmul.f32 %v8536_v3, %v5002_v25  ;;  %v5726_v38 = vpop.f32.mrb[22].mxu1 }
 0x3ef   : > { %v5117_v46 = vadd.f32 %v8541_v12, %v5078_v60  ;;  %v5079_v20 = vmul.f32 %v5726_v38, %v8536_v3  ;;  %v5005_v39 = vpop.f32.mrb[23].mxu1  ;;  %v2762_v60 = vld [vmem:[%s5921_s29 + $0xe8] sm:$0xff] }
 0x3f0   : > { %v5115_v30 = vadd.f32 %v8541_v12, %v5076_v28  ;;  %v5077_v43 = vmul.f32 %v8536_v3, %v5005_v39 }
 0x3f1   : > { %v5149_v2 = vadd.f32 %v5117_v46, %v2755_v29  ;;  %v5118_v24 = vadd.f32 %v8541_v12, %v5079_v20 }
 0x3f2   : > { %v5147_v51 = vadd.f32 %v5115_v30, %v2753_v49  ;;  %v5116_v53 = vadd.f32 %v8541_v12, %v5077_v43 }
 0x3f3   : > { %v5181_v8 = vmax.f32 %v5149_v2, 0.0  ;;  %v5150_v54 = vadd.f32 %v5118_v24, %v2756_v19 }
 0x3f4   : > { %v5179_v32 = vmax.f32 %v5147_v51, 0.0  ;;  %v5148_v50 = vadd.f32 %v5116_v53, %v2754_v18 }
 0x3f5   : > { %5213 = vst.msk [vmem:[%s8559_s19 + $0xb0] sm:$0xff] %vm2045_vm1, %v5181_v8  ;;  %v5182_v7 = vmax.f32 %v5150_v54, 0.0 }
 0x3f6   : > { %5211 = vst.msk [vmem:[%s8559_s19 + $0xa0] sm:$0xff] %vm2045_vm1, %v5179_v32  ;;  %v5180_v36 = vmax.f32 %v5148_v50, 0.0 }
 0x3f7   : > { %5214 = vst.msk [vmem:[%s8559_s19 + $0xb8] sm:$0xff] %vm2045_vm1, %v5182_v7 }
 0x3f8   : > { %5212 = vst.msk [vmem:[%s8559_s19 + $0xa8] sm:$0xff] %vm2045_vm1, %v5180_v36 }
 0x3fc   : > { %v5729_v44 = vpop.f32.mrb[24].mxu1 }
 0x3fd   : > { %v5082_v4 = vmul.f32 %v5729_v44, %v8536_v3  ;;  %v5018_v61 = vpop.f32.mrb[25].mxu1 }
 0x3fe   : > { %v5080_v9 = vmul.f32 %v8536_v3, %v5018_v61  ;;  %v5730_v26 = vpop.f32.mrb[26].mxu1 }
 0x3ff   : > { %v5121_v17 = vadd.f32 %v8541_v12, %v5082_v4  ;;  %v5083_v27 = vmul.f32 %v5730_v26, %v8536_v3  ;;  %v5021_v16 = vpop.f32.mrb[27].mxu1 }
 0x400   : > { %v5119_v40 = vadd.f32 %v8541_v12, %v5080_v9  ;;  %v5081_v63 = vmul.f32 %v8536_v3, %v5021_v16 }
 0x401   : > { %v5153_v55 = vadd.f32 %v5121_v17, %v2759_v6  ;;  %v5122_v1 = vadd.f32 %v8541_v12, %v5083_v27 }
 0x402   : > { %v5151_v31 = vadd.f32 %v5119_v40, %v2757_v41  ;;  %v5120_v47 = vadd.f32 %v8541_v12, %v5081_v63 }
 0x403   : > { %v5185_v11 = vmax.f32 %v5153_v55, 0.0  ;;  %v5154_v57 = vadd.f32 %v5122_v1, %v2760_v37 }
 0x404   : > { %v5183_v22 = vmax.f32 %v5151_v31, 0.0  ;;  %v5152_v62 = vadd.f32 %v5120_v47, %v2758_v5 }
 0x405   : > { %5217 = vst.msk [vmem:[%s8559_s19 + $0xd0] sm:$0xff] %vm2045_vm1, %v5185_v11  ;;  %v5186_v23 = vmax.f32 %v5154_v57, 0.0 }
 0x406   : > { %5215 = vst.msk [vmem:[%s8559_s19 + $0xc0] sm:$0xff] %vm2045_vm1, %v5183_v22  ;;  %v5184_v13 = vmax.f32 %v5152_v62, 0.0 }
 0x407   : > { %5218 = vst.msk [vmem:[%s8559_s19 + $0xd8] sm:$0xff] %vm2045_vm1, %v5186_v23 }
 0x408   : > { %5216 = vst.msk [vmem:[%s8559_s19 + $0xc8] sm:$0xff] %vm2045_vm1, %v5184_v13 }
 0x41f   : > { %v5733_v21 = vpop.f32.mrb[28].mxu1 }
 0x420   : > { %v5086_v42 = vmul.f32 %v5733_v21, %v8536_v3  ;;  %v5034_v14 = vpop.f32.mrb[29].mxu1 }
 0x421   : > { %v5084_v33 = vmul.f32 %v8536_v3, %v5034_v14  ;;  %v5734_v52 = vpop.f32.mrb[30].mxu1 }
 0x422   : > { %v5125_v45 = vadd.f32 %v8541_v12, %v5086_v42  ;;  %v5087_v56 = vmul.f32 %v5734_v52, %v8536_v3  ;;  %v5037_v10 = vpop.f32.mrb[31].mxu1 }
 0x423   : > { %v5123_v34 = vadd.f32 %v8541_v12, %v5084_v33  ;;  %v5085_v48 = vmul.f32 %v8536_v3, %v5037_v10 }
 0x424   : > { %v5157_v0 = vadd.f32 %v5125_v45, %v2763_v15  ;;  %v5126_v59 = vadd.f32 %v8541_v12, %v5087_v56 }
 0x425   : > { %v5155_v25 = vadd.f32 %v5123_v34, %v2761_v35  ;;  %v5124_v29 = vadd.f32 %v8541_v12, %v5085_v48 }
 0x426   : > { %v5189_v28 = vmax.f32 %v5157_v0, 0.0  ;;  %v5158_v38 = vadd.f32 %v5126_v59, %v2764_v58 }
 0x427   : > { %v5187_v46 = vmax.f32 %v5155_v25, 0.0  ;;  %v5156_v49 = vadd.f32 %v5124_v29, %v2762_v60 }
 0x428   : > { %5221 = vst.msk [vmem:[%s8559_s19 + $0xf0] sm:$0xff] %vm2045_vm1, %v5189_v28  ;;  %v5190_v20 = vmax.f32 %v5158_v38, 0.0 }
 0x429   : > { %5219 = vst.msk [vmem:[%s8559_s19 + $0xe0] sm:$0xff] %vm2045_vm1, %v5187_v46  ;;  %v5188_v39 = vmax.f32 %v5156_v49, 0.0 }
 0x42a   : > { %5222 = vst.msk [vmem:[%s8559_s19 + $0xf8] sm:$0xff] %vm2045_vm1, %v5190_v20 }
 0x42b   : > { %5220 = vst.msk [vmem:[%s8559_s19 + $0xe8] sm:$0xff] %vm2045_vm1, %v5188_v39 }
 0x42c PF: > { %s17_s24 = sadd.s32 1, %s5810_s24  }
 0x42d   : > { %p14_p4 = scmp.ge.s32.totalorder %s17_s24, 4  }
 0x42f   :  { %16 = sbr.rel (!%p14_p4) target bundleno = 1 (0x1), region = 82 }

</bundles_post_ra>
